<compile_context>
chip_gen: v5e
topology: v5e:2x2
jax: 0.10.0
libtpu: 0.0.40
codegen_flags: <defaults>
</compile_context>

<pallas_src>
import jax
import jax.numpy as jnp
from jax import lax
from jax.experimental import pallas as pl
from jax.experimental.pallas import tpu as pltpu


# ----------------------------- configuration -----------------------------
D_L, D_A, D_V = 4, 4, 4                 # input dims per modality
D_TOTAL = D_L + D_A + D_V               # 12
DH_L, DH_A, DH_V = 8, 8, 8              # LSTM hidden dims
TOTAL_H = DH_L + DH_A + DH_V            # 24
MEM_DIM = 8
WINDOW_DIM = 2
ATT_IN = TOTAL_H * WINDOW_DIM           # 48
GAMMA_IN = ATT_IN + MEM_DIM             # 56
FINAL_OUT = TOTAL_H + MEM_DIM           # 32
H_ATT1 = H_ATT2 = H_G1 = H_G2 = H_OUT = 32
OUTPUT_DIM = 1
GATES = 4 * TOTAL_H                     # 96

# sublane-aligned row offsets inside lstm_pack
LSTM_HH_ROW = 16                        # w_ih occupies rows 0..11, padded to 16
LSTM_B_ROW = LSTM_HH_ROW + TOTAL_H      # 40
LSTM_ROWS = LSTM_B_ROW + 1              # 41

AG1_OUT = H_ATT2 + H_G1 + H_G2          # 96  (fused layer-1 output width)
AG2_IN = AG1_OUT                        # 96  (fused layer-2 input rows)
AG2_OUT = 3 * MEM_DIM                   # 24  [c_hat | gamma1 | gamma2]

T_STEPS = 8                             # sequence length
BATCH = 2                               # n

N_RAW_WEIGHTS = 29                      # 3 LSTMs * 3 + 10 Linear layers * 2


# ------------------------------- kernel ----------------------------------
def mfn_kernel(x_ref, lstm_ref, a1l1_ref, a1l2_ref, ag1_ref, ag2_ref,
               ol1_ref, ol2_ref, out_ref, gx_ref):
    n = out_ref.shape[0]
    t = x_ref.shape[0] // n

    # ---- hoisted input projection for ALL timesteps (one matmul) ----
    # gx = x2d @ W_ih + (b_ih + b_hh), shape (t*n, 96)
    gx_ref[...] = (
        jnp.dot(x_ref[...], lstm_ref[0:D_TOTAL, :],
                preferred_element_type=jnp.float32)
        + lstm_ref[LSTM_B_ROW:LSTM_B_ROW + 1, :])

    # ---- pre-broadcast loop-invariant biases ONCE (no per-step broadcasts) ----
    a1b1 = jnp.broadcast_to(a1l1_ref[ATT_IN:ATT_IN + 1, :], (n, H_ATT1))
    a1b2 = jnp.broadcast_to(a1l2_ref[H_ATT1:H_ATT1 + 1, :], (n, ATT_IN))
    ag1b = jnp.broadcast_to(ag1_ref[GAMMA_IN:GAMMA_IN + 1, :], (n, AG1_OUT))
    ag2b = jnp.broadcast_to(ag2_ref[AG2_IN:AG2_IN + 1, :], (n, AG2_OUT))

    def step(i, carry):
        h, c, mem = carry                                  # (n,24),(n,24),(n,8)

        # fused 3-modality LSTM, recurrent half only (input half precomputed).
        # gate cols grouped [i | f | g | o], 24 each, modality order [l|a|v].
        gates = (gx_ref[pl.ds(i * n, n), :]
                 + jnp.dot(h, lstm_ref[LSTM_HH_ROW:LSTM_HH_ROW + TOTAL_H, :],
                           preferred_element_type=jnp.float32))      # (n, 96)
        i_g = jax.nn.sigmoid(gates[:, 0 * TOTAL_H:1 * TOTAL_H])
        f_g = jax.nn.sigmoid(gates[:, 1 * TOTAL_H:2 * TOTAL_H])
        g_g = jnp.tanh(gates[:, 2 * TOTAL_H:3 * TOTAL_H])
        o_g = jax.nn.sigmoid(gates[:, 3 * TOTAL_H:4 * TOTAL_H])
        c_new = f_g * c + i_g * g_g
        h_new = o_g * jnp.tanh(c_new)

        c_star = jnp.concatenate([c, c_new], axis=1)       # (n, 48)

        # att1 (dropout == identity in eval mode)
        h1 = jax.nn.relu(
            jnp.dot(c_star, a1l1_ref[0:ATT_IN, :],
                    preferred_element_type=jnp.float32) + a1b1)
        z = (jnp.dot(h1, a1l2_ref[0:H_ATT1, :],
                     preferred_element_type=jnp.float32) + a1b2)     # (n, 48)
        z = z - jnp.max(z, axis=1, keepdims=True)
        e = jnp.exp(z)
        att = e * pl.reciprocal(jnp.sum(e, axis=1, keepdims=True), approx=True)
        attended = att * c_star                            # (n, 48)

        # fused att2 + gamma1 + gamma2 (2 matmuls instead of 4)
        both = jnp.concatenate([attended, mem], axis=1)    # (n, 56)
        u = jax.nn.relu(
            jnp.dot(both, ag1_ref[0:GAMMA_IN, :],
                    preferred_element_type=jnp.float32) + ag1b)      # (n, 96)
        v = (jnp.dot(u, ag2_ref[0:AG2_IN, :],
                     preferred_element_type=jnp.float32) + ag2b)     # (n, 24)
        c_hat = jnp.tanh(v[:, 0:MEM_DIM])
        gam = jax.nn.sigmoid(v[:, MEM_DIM:])               # (n, 16)
        mem_new = gam[:, 0:MEM_DIM] * mem + gam[:, MEM_DIM:] * c_hat

        return h_new, c_new, mem_new

    h0 = jnp.zeros((n, TOTAL_H), jnp.float32)
    c0 = jnp.zeros((n, TOTAL_H), jnp.float32)
    m0 = jnp.zeros((n, MEM_DIM), jnp.float32)
    h_f, _, mem_f = lax.fori_loop(0, t, step, (h0, c0, m0), unroll=True)

    last_hs = jnp.concatenate([h_f, mem_f], axis=1)        # (n, 32)
    o1 = jax.nn.relu(
        jnp.dot(last_hs, ol1_ref[0:FINAL_OUT, :],
                preferred_element_type=jnp.float32)
        + ol1_ref[FINAL_OUT:FINAL_OUT + 1, :])
    out = (jnp.dot(o1, ol2_ref[0:H_OUT, :], preferred_element_type=jnp.float32)
           + ol2_ref[H_OUT:H_OUT + 1, :])
    out_ref[...] = out.astype(out_ref.dtype)


# ------------------------------- wrapper ----------------------------------
def mfn_forward(x, packed_weights):
    t, n, _ = x.shape
    x2d = x.reshape(t * n, D_TOTAL)
    # No grid: single invocation, every operand whole-array resident in VMEM
    # (total footprint is a few tens of KiB).
    return pl.pallas_call(
        mfn_kernel,
        out_shape=jax.ShapeDtypeStruct((n, OUTPUT_DIM), jnp.float32),
        scratch_shapes=[pltpu.VMEM((t * n, GATES), jnp.float32)],
    )(x2d, *packed_weights)


# --------------------------- parameter setup -------------------------------
def init_raw_params(key):
    """Per-layer weights, pre-transposed to (in, out); LSTM biases folded."""
    def dense(key, fan_in, fan_out):
        kw, kb = jax.random.split(key)
        w_t = jax.random.normal(kw, (fan_in, fan_out), jnp.float32) * 0.1
        b = jax.random.normal(kb, (1, fan_out), jnp.float32) * 0.1
        return w_t, b

    keys = jax.random.split(key, 16)
    ki = iter(keys)

    def lstm(key, d_in, dh):
        k1, k2, k3, k4 = jax.random.split(key, 4)
        w_ih_t = jax.random.normal(k1, (d_in, 4 * dh), jnp.float32) * 0.1
        w_hh_t = jax.random.normal(k2, (dh, 4 * dh), jnp.float32) * 0.1
        b_ih = jax.random.normal(k3, (1, 4 * dh), jnp.float32) * 0.1
        b_hh = jax.random.normal(k4, (1, 4 * dh), jnp.float32) * 0.1
        return w_ih_t, w_hh_t, b_ih + b_hh   # fold the two biases

    wl = lstm(next(ki), D_L, DH_L)
    wa = lstm(next(ki), D_A, DH_A)
    wv = lstm(next(ki), D_V, DH_V)

    a1_1 = dense(next(ki), ATT_IN, H_ATT1)
    a1_2 = dense(next(ki), H_ATT1, ATT_IN)
    a2_1 = dense(next(ki), ATT_IN, H_ATT2)
    a2_2 = dense(next(ki), H_ATT2, MEM_DIM)
    g1_1 = dense(next(ki), GAMMA_IN, H_G1)
    g1_2 = dense(next(ki), H_G1, MEM_DIM)
    g2_1 = dense(next(ki), GAMMA_IN, H_G2)
    g2_2 = dense(next(ki), H_G2, MEM_DIM)
    o_1 = dense(next(ki), FINAL_OUT, H_OUT)
    o_2 = dense(next(ki), H_OUT, OUTPUT_DIM)

    weights = (list(wl) + list(wa) + list(wv)
               + list(a1_1) + list(a1_2) + list(a2_1) + list(a2_2)
               + list(g1_1) + list(g1_2) + list(g2_1) + list(g2_2)
               + list(o_1) + list(o_2))
    assert len(weights) == N_RAW_WEIGHTS
    return weights


def pack_params(raw):
    """Fuse the 3 LSTMs, fuse att2+gamma1+gamma2, sublane-align all packs."""
    (wl_ih, wl_hh, bl, wa_ih, wa_hh, ba, wv_ih, wv_hh, bv,
     a1w1, a1b1, a1w2, a1b2, a2w1, a2b1, a2w2, a2b2,
     g1w1, g1b1, g1w2, g1b2, g2w1, g2b1, g2w2, g2b2,
     ow1, ob1, ow2, ob2) = raw

    # --- block-diagonal fused LSTM gate weights, grouped by gate type ---
    dims = [(D_L, DH_L), (D_A, DH_A), (D_V, DH_V)]
    w_ihs, w_hhs, bs = [wl_ih, wa_ih, wv_ih], [wl_hh, wa_hh, wv_hh], [bl, ba, bv]
    w_ih_f = jnp.zeros((D_TOTAL, GATES), jnp.float32)
    w_hh_f = jnp.zeros((TOTAL_H, GATES), jnp.float32)
    b_f = jnp.zeros((1, GATES), jnp.float32)
    x_off, h_off = 0, 0
    for (d_m, dh_m), wi, wh, bm in zip(dims, w_ihs, w_hhs, bs):
        for k in range(4):                      # gate order: i, f, g, o
            col = k * TOTAL_H + h_off
            w_ih_f = w_ih_f.at[x_off:x_off + d_m, col:col + dh_m].set(
                wi[:, k * dh_m:(k + 1) * dh_m])
            w_hh_f = w_hh_f.at[h_off:h_off + dh_m, col:col + dh_m].set(
                wh[:, k * dh_m:(k + 1) * dh_m])
            b_f = b_f.at[:, col:col + dh_m].set(bm[:, k * dh_m:(k + 1) * dh_m])
        x_off += d_m
        h_off += dh_m

    # sublane-aligned pack: rows [0:12]=W_ih, [16:40]=W_hh, [40]=bias
    lstm_pack = jnp.zeros((LSTM_ROWS, GATES), jnp.float32)
    lstm_pack = lstm_pack.at[0:D_TOTAL, :].set(w_ih_f)
    lstm_pack = lstm_pack.at[LSTM_HH_ROW:LSTM_HH_ROW + TOTAL_H, :].set(w_hh_f)
    lstm_pack = lstm_pack.at[LSTM_B_ROW:LSTM_B_ROW + 1, :].set(b_f)

    def stack(w, b):
        return jnp.concatenate([w, b], axis=0)

    # --- fused att2 + gamma1 + gamma2 ---
    # layer 1: both (n,56) -> (n,96); a2 branch ignores the mem lanes (zeros).
    a2w1_pad = jnp.concatenate(
        [a2w1, jnp.zeros((MEM_DIM, H_ATT2), jnp.float32)], axis=0)   # (56, 32)
    ag1_w = jnp.concatenate([a2w1_pad, g1w1, g2w1], axis=1)          # (56, 96)
    ag1_b = jnp.concatenate([a2b1, g1b1, g2b1], axis=1)              # (1, 96)
    # layer 2: block-diagonal (96, 24): [c_hat | gamma1 | gamma2]
    ag2_w = jnp.zeros((AG2_IN, AG2_OUT), jnp.float32)
    ag2_w = ag2_w.at[0:H_ATT2, 0:MEM_DIM].set(a2w2)
    ag2_w = ag2_w.at[H_ATT2:H_ATT2 + H_G1, MEM_DIM:2 * MEM_DIM].set(g1w2)
    ag2_w = ag2_w.at[H_ATT2 + H_G1:, 2 * MEM_DIM:].set(g2w2)
    ag2_b = jnp.concatenate([a2b2, g1b2, g2b2], axis=1)              # (1, 24)

    return (
        lstm_pack,                           # (41, 96)
        stack(a1w1, a1b1),                   # (49, 32)
        stack(a1w2, a1b2),                   # (33, 48)
        stack(ag1_w, ag1_b),                 # (57, 96)
        stack(ag2_w, ag2_b),                 # (97, 24)
        stack(ow1, ob1),                     # (33, 32)
        stack(ow2, ob2),                     # (33, 1)
    )


# --------------------------- pure-JAX reference -----------------------------
def _linear(x, w_t, b):
    return x @ w_t + b


def _lstm_cell_ref(x_t, h, c, w_ih_t, w_hh_t, b, dh):
    gates = x_t @ w_ih_t + h @ w_hh_t + b
    i = jax.nn.sigmoid(gates[:, 0:dh])
    f = jax.nn.sigmoid(gates[:, dh:2 * dh])
    g = jnp.tanh(gates[:, 2 * dh:3 * dh])
    o = jax.nn.sigmoid(gates[:, 3 * dh:4 * dh])
    c_new = f * c + i * g
    h_new = o * jnp.tanh(c_new)
    return h_new, c_new


def mfn_reference(x, raw):
    (wl_ih, wl_hh, bl, wa_ih, wa_hh, ba, wv_ih, wv_hh, bv,
     a1w1, a1b1, a1w2, a1b2, a2w1, a2b1, a2w2, a2b2,
     g1w1, g1b1, g1w2, g1b2, g2w1, g2b1, g2w2, g2b2,
     ow1, ob1, ow2, ob2) = raw

    t, n, _ = x.shape
    h_l = jnp.zeros((n, DH_L)); c_l = jnp.zeros((n, DH_L))
    h_a = jnp.zeros((n, DH_A)); c_a = jnp.zeros((n, DH_A))
    h_v = jnp.zeros((n, DH_V)); c_v = jnp.zeros((n, DH_V))
    mem = jnp.zeros((n, MEM_DIM))

    for i in range(t):
        x_t = x[i]
        x_l, x_a, x_v = x_t[:, :D_L], x_t[:, D_L:D_L + D_A], x_t[:, D_L + D_A:]
        p_cl, p_ca, p_cv = c_l, c_a, c_v
        h_l, c_l = _lstm_cell_ref(x_l, h_l, p_cl, wl_ih, wl_hh, bl, DH_L)
        h_a, c_a = _lstm_cell_ref(x_a, h_a, p_ca, wa_ih, wa_hh, ba, DH_A)
        h_v, c_v = _lstm_cell_ref(x_v, h_v, p_cv, wv_ih, wv_hh, bv, DH_V)
        c_star = jnp.concatenate([p_cl, p_ca, p_cv, c_l, c_a, c_v], axis=1)
        att = jax.nn.softmax(
            _linear(jax.nn.relu(_linear(c_star, a1w1, a1b1)), a1w2, a1b2), axis=1)
        attended = att * c_star
        c_hat = jnp.tanh(
            _linear(jax.nn.relu(_linear(attended, a2w1, a2b1)), a2w2, a2b2))
        both = jnp.concatenate([attended, mem], axis=1)
        g1 = jax.nn.sigmoid(
            _linear(jax.nn.relu(_linear(both, g1w1, g1b1)), g1w2, g1b2))
        g2 = jax.nn.sigmoid(
            _linear(jax.nn.relu(_linear(both, g2w1, g2b1)), g2w2, g2b2))
        mem = g1 * mem + g2 * c_hat

    last_hs = jnp.concatenate([h_l, h_a, h_v, mem], axis=1)
    return _linear(jax.nn.relu(_linear(last_hs, ow1, ob1)), ow2, ob2)


# --------------------------------- main -------------------------------------
if __name__ == "__main__":
    key = jax.random.PRNGKey(0)
    k_x, k_w = jax.random.split(key)

    x = jax.random.normal(k_x, (T_STEPS, BATCH, D_TOTAL), jnp.float32)
    raw = init_raw_params(k_w)
    packed = pack_params(raw)

    out = mfn_forward(x, packed)
    out = jax.block_until_ready(out)

    ref = mfn_reference(x, raw)
    assert out.shape == (BATCH, OUTPUT_DIM)
    # Tolerance slightly relaxed vs. exact math: the in-kernel softmax uses
    # pl.reciprocal(..., approx=True) (EUP reciprocal approximation).
    assert jnp.allclose(out, ref, rtol=3e-3, atol=1e-3), (out, ref)

    # TODO(synk): dropout layers are treated as identity (eval-mode semantics).
    print("KERNEL_OK")
</pallas_src>

<mosaic_0001>
module attributes {stable_mosaic.version = 11 : i64} {
  func.func @mfn_kernel(%arg0: memref<16x12xf32, #tpu.memory_space<vmem>>, %arg1: memref<41x96xf32, #tpu.memory_space<vmem>>, %arg2: memref<49x32xf32, #tpu.memory_space<vmem>>, %arg3: memref<33x48xf32, #tpu.memory_space<vmem>>, %arg4: memref<57x96xf32, #tpu.memory_space<vmem>>, %arg5: memref<97x24xf32, #tpu.memory_space<vmem>>, %arg6: memref<33x32xf32, #tpu.memory_space<vmem>>, %arg7: memref<33x1xf32, #tpu.memory_space<vmem>>, %arg8: memref<2x1xf32, #tpu.memory_space<vmem>>, %arg9: memref<16x96xf32, #tpu.memory_space<vmem>>) attributes {dimension_semantics = [], scalar_prefetch = 0 : i64, scratch_operands = 1 : i64, tpu.core_type = #tpu.core_type<tc>} {
    %c0 = arith.constant 0 : index
    %c0_0 = arith.constant 0 : index
    %0 = vector.load %arg0[%c0, %c0_0] : memref<16x12xf32, #tpu.memory_space<vmem>>, vector<16x12xf32>
    %c0_1 = arith.constant 0 : index
    %c0_2 = arith.constant 0 : index
    %1 = vector.load %arg1[%c0_1, %c0_2] : memref<41x96xf32, #tpu.memory_space<vmem>>, vector<12x96xf32>
    %cst = arith.constant dense<0.000000e+00> : vector<16x96xf32>
    %2 = tpu.matmul %0, %1, %cst {dimension_numbers = #tpu.dot_dimension_numbers<[1], [0], [0], [1], [0, 0, 1, 1], [], []>} : vector<16x12xf32>, vector<12x96xf32>, vector<16x96xf32> -> vector<16x96xf32>
    %c40 = arith.constant 40 : index
    %c0_3 = arith.constant 0 : index
    %3 = vector.load %arg1[%c40, %c0_3] : memref<41x96xf32, #tpu.memory_space<vmem>>, vector<1x96xf32>
    %4 = vector.broadcast %3 : vector<1x96xf32> to vector<16x96xf32>
    %5 = arith.addf %2, %4 : vector<16x96xf32>
    %c0_4 = arith.constant 0 : index
    %c0_5 = arith.constant 0 : index
    %6 = vector.load %arg9[%c0_4, %c0_5] : memref<16x96xf32, #tpu.memory_space<vmem>>, vector<16x96xf32>
    tpu.vector_store %arg9[%c0_4, %c0_5], %5 {strides = array<i32>} : memref<16x96xf32, #tpu.memory_space<vmem>>, vector<16x96xf32>,
    %c48 = arith.constant 48 : index
    %c0_6 = arith.constant 0 : index
    %7 = vector.load %arg2[%c48, %c0_6] : memref<49x32xf32, #tpu.memory_space<vmem>>, vector<1x32xf32>
    %8 = vector.shape_cast %7 : vector<1x32xf32> to vector<1x32xf32>
    %9 = vector.broadcast %8 : vector<1x32xf32> to vector<2x32xf32>
    %c32 = arith.constant 32 : index
    %c0_7 = arith.constant 0 : index
    %10 = vector.load %arg3[%c32, %c0_7] : memref<33x48xf32, #tpu.memory_space<vmem>>, vector<1x48xf32>
    %11 = vector.shape_cast %10 : vector<1x48xf32> to vector<1x48xf32>
    %12 = vector.broadcast %11 : vector<1x48xf32> to vector<2x48xf32>
    %c56 = arith.constant 56 : index
    %c0_8 = arith.constant 0 : index
    %13 = vector.load %arg4[%c56, %c0_8] : memref<57x96xf32, #tpu.memory_space<vmem>>, vector<1x96xf32>
    %14 = vector.shape_cast %13 : vector<1x96xf32> to vector<1x96xf32>
    %15 = vector.broadcast %14 : vector<1x96xf32> to vector<2x96xf32>
    %c96 = arith.constant 96 : index
    %c0_9 = arith.constant 0 : index
    %16 = vector.load %arg5[%c96, %c0_9] : memref<97x24xf32, #tpu.memory_space<vmem>>, vector<1x24xf32>
    %17 = vector.shape_cast %16 : vector<1x24xf32> to vector<1x24xf32>
    %18 = vector.broadcast %17 : vector<1x24xf32> to vector<2x24xf32>
    %cst_10 = arith.constant 0.000000e+00 : f32
    %19 = vector.broadcast %cst_10 : f32 to vector<2x24xf32>
    %cst_11 = arith.constant 0.000000e+00 : f32
    %20 = vector.broadcast %cst_11 : f32 to vector<2x24xf32>
    %cst_12 = arith.constant 0.000000e+00 : f32
    %21 = vector.broadcast %cst_12 : f32 to vector<2x8xf32>
    %c0_i32 = arith.constant 0 : i32
    %c2_i32 = arith.constant 2 : i32
    %22 = arith.muli %c0_i32, %c2_i32 : i32
    %23 = arith.index_cast %22 : i32 to index
    %c0_13 = arith.constant 0 : index
    %24 = vector.load %arg9[%23, %c0_13] : memref<16x96xf32, #tpu.memory_space<vmem>>, vector<2x96xf32>
    %c16 = arith.constant 16 : index
    %c0_14 = arith.constant 0 : index
    %25 = vector.load %arg1[%c16, %c0_14] : memref<41x96xf32, #tpu.memory_space<vmem>>, vector<24x96xf32>
    %cst_15 = arith.constant dense<0.000000e+00> : vector<2x96xf32>
    %26 = tpu.matmul %19, %25, %cst_15 {dimension_numbers = #tpu.dot_dimension_numbers<[1], [0], [0], [1], [0, 0, 1, 1], [], []>} : vector<2x24xf32>, vector<24x96xf32>, vector<2x96xf32> -> vector<2x96xf32>
    %27 = arith.addf %24, %26 : vector<2x96xf32>
    %28 = vector.extract_strided_slice %27 {offsets = [0, 0], sizes = [2, 24], strides = [1, 1]} : vector<2x96xf32> to vector<2x24xf32>
    %29 = arith.negf %28 : vector<2x24xf32>
    %30 = math.exp %29 : vector<2x24xf32>
    %cst_16 = arith.constant 1.000000e+00 : f32
    %31 = vector.broadcast %cst_16 : f32 to vector<2x24xf32>
    %32 = arith.addf %31, %30 : vector<2x24xf32>
    %33 = arith.divf %31, %32 : vector<2x24xf32>
    %34 = vector.extract_strided_slice %27 {offsets = [0, 24], sizes = [2, 24], strides = [1, 1]} : vector<2x96xf32> to vector<2x24xf32>
    %35 = arith.negf %34 : vector<2x24xf32>
    %36 = math.exp %35 : vector<2x24xf32>
    %cst_17 = arith.constant 1.000000e+00 : f32
    %37 = vector.broadcast %cst_17 : f32 to vector<2x24xf32>
    %38 = arith.addf %37, %36 : vector<2x24xf32>
    %39 = arith.divf %37, %38 : vector<2x24xf32>
    %40 = vector.extract_strided_slice %27 {offsets = [0, 48], sizes = [2, 24], strides = [1, 1]} : vector<2x96xf32> to vector<2x24xf32>
    %41 = math.tanh %40 : vector<2x24xf32>
    %42 = vector.extract_strided_slice %27 {offsets = [0, 72], sizes = [2, 24], strides = [1, 1]} : vector<2x96xf32> to vector<2x24xf32>
    %43 = arith.negf %42 : vector<2x24xf32>
    %44 = math.exp %43 : vector<2x24xf32>
    %cst_18 = arith.constant 1.000000e+00 : f32
    %45 = vector.broadcast %cst_18 : f32 to vector<2x24xf32>
    %46 = arith.addf %45, %44 : vector<2x24xf32>
    %47 = arith.divf %45, %46 : vector<2x24xf32>
    %48 = arith.mulf %39, %20 : vector<2x24xf32>
    %49 = arith.mulf %33, %41 : vector<2x24xf32>
    %50 = arith.addf %48, %49 : vector<2x24xf32>
    %51 = math.tanh %50 : vector<2x24xf32>
    %52 = arith.mulf %47, %51 : vector<2x24xf32>
    %53 = tpu.concatenate %20, %50 in 1 : vector<2x24xf32>, vector<2x24xf32> -> vector<2x48xf32>
    %c0_19 = arith.constant 0 : index
    %c0_20 = arith.constant 0 : index
    %54 = vector.load %arg2[%c0_19, %c0_20] : memref<49x32xf32, #tpu.memory_space<vmem>>, vector<48x32xf32>
    %cst_21 = arith.constant dense<0.000000e+00> : vector<2x32xf32>
    %55 = tpu.matmul %53, %54, %cst_21 {dimension_numbers = #tpu.dot_dimension_numbers<[1], [0], [0], [1], [0, 0, 1, 1], [], []>} : vector<2x48xf32>, vector<48x32xf32>, vector<2x32xf32> -> vector<2x32xf32>
    %56 = arith.addf %55, %9 : vector<2x32xf32>
    %cst_22 = arith.constant 0.000000e+00 : f32
    %57 = vector.broadcast %cst_22 : f32 to vector<2x32xf32>
    %58 = arith.maximumf %56, %57 : vector<2x32xf32>
    %c0_23 = arith.constant 0 : index
    %c0_24 = arith.constant 0 : index
    %59 = vector.load %arg3[%c0_23, %c0_24] : memref<33x48xf32, #tpu.memory_space<vmem>>, vector<32x48xf32>
    %cst_25 = arith.constant dense<0.000000e+00> : vector<2x48xf32>
    %60 = tpu.matmul %58, %59, %cst_25 {dimension_numbers = #tpu.dot_dimension_numbers<[1], [0], [0], [1], [0, 0, 1, 1], [], []>} : vector<2x32xf32>, vector<32x48xf32>, vector<2x48xf32> -> vector<2x48xf32>
    %61 = arith.addf %60, %12 : vector<2x48xf32>
    %cst_26 = arith.constant dense<0xFF800000> : vector<2xf32>
    %62 = vector.multi_reduction <maximumf>, %61, %cst_26 [1] : vector<2x48xf32> to vector<2xf32>
    %63 = vector.shape_cast %62 : vector<2xf32> to vector<2x1xf32>
    %64 = vector.broadcast %63 : vector<2x1xf32> to vector<2x48xf32>
    %65 = arith.subf %61, %64 : vector<2x48xf32>
    %66 = math.exp %65 : vector<2x48xf32>
    %cst_27 = arith.constant dense<0.000000e+00> : vector<2xf32>
    %67 = vector.multi_reduction <add>, %66, %cst_27 [1] : vector<2x48xf32> to vector<2xf32>
    %68 = vector.shape_cast %67 : vector<2xf32> to vector<2x1xf32>
    %69 = tpu.reciprocal %68 {approx = true} : vector<2x1xf32> -> vector<2x1xf32>
    %70 = vector.broadcast %69 : vector<2x1xf32> to vector<2x48xf32>
    %71 = arith.mulf %66, %70 : vector<2x48xf32>
    %72 = arith.mulf %71, %53 : vector<2x48xf32>
    %73 = tpu.concatenate %72, %21 in 1 : vector<2x48xf32>, vector<2x8xf32> -> vector<2x56xf32>
    %c0_28 = arith.constant 0 : index
    %c0_29 = arith.constant 0 : index
    %74 = vector.load %arg4[%c0_28, %c0_29] : memref<57x96xf32, #tpu.memory_space<vmem>>, vector<56x96xf32>
    %cst_30 = arith.constant dense<0.000000e+00> : vector<2x96xf32>
    %75 = tpu.matmul %73, %74, %cst_30 {dimension_numbers = #tpu.dot_dimension_numbers<[1], [0], [0], [1], [0, 0, 1, 1], [], []>} : vector<2x56xf32>, vector<56x96xf32>, vector<2x96xf32> -> vector<2x96xf32>
    %76 = arith.addf %75, %15 : vector<2x96xf32>
    %cst_31 = arith.constant 0.000000e+00 : f32
    %77 = vector.broadcast %cst_31 : f32 to vector<2x96xf32>
    %78 = arith.maximumf %76, %77 : vector<2x96xf32>
    %c0_32 = arith.constant 0 : index
    %c0_33 = arith.constant 0 : index
    %79 = vector.load %arg5[%c0_32, %c0_33] : memref<97x24xf32, #tpu.memory_space<vmem>>, vector<96x24xf32>
    %cst_34 = arith.constant dense<0.000000e+00> : vector<2x24xf32>
    %80 = tpu.matmul %78, %79, %cst_34 {dimension_numbers = #tpu.dot_dimension_numbers<[1], [0], [0], [1], [0, 0, 1, 1], [], []>} : vector<2x96xf32>, vector<96x24xf32>, vector<2x24xf32> -> vector<2x24xf32>
    %81 = arith.addf %80, %18 : vector<2x24xf32>
    %82 = vector.extract_strided_slice %81 {offsets = [0, 0], sizes = [2, 8], strides = [1, 1]} : vector<2x24xf32> to vector<2x8xf32>
    %83 = math.tanh %82 : vector<2x8xf32>
    %84 = vector.extract_strided_slice %81 {offsets = [0, 8], sizes = [2, 16], strides = [1, 1]} : vector<2x24xf32> to vector<2x16xf32>
    %85 = arith.negf %84 : vector<2x16xf32>
    %86 = math.exp %85 : vector<2x16xf32>
    %cst_35 = arith.constant 1.000000e+00 : f32
    %87 = vector.broadcast %cst_35 : f32 to vector<2x16xf32>
    %88 = arith.addf %87, %86 : vector<2x16xf32>
    %89 = arith.divf %87, %88 : vector<2x16xf32>
    %90 = vector.extract_strided_slice %89 {offsets = [0, 0], sizes = [2, 8], strides = [1, 1]} : vector<2x16xf32> to vector<2x8xf32>
    %91 = arith.mulf %90, %21 : vector<2x8xf32>
    %92 = vector.extract_strided_slice %89 {offsets = [0, 8], sizes = [2, 8], strides = [1, 1]} : vector<2x16xf32> to vector<2x8xf32>
    %93 = arith.mulf %92, %83 : vector<2x8xf32>
    %94 = arith.addf %91, %93 : vector<2x8xf32>
    %c1_i32 = arith.constant 1 : i32
    %c2_i32_36 = arith.constant 2 : i32
    %95 = arith.muli %c1_i32, %c2_i32_36 : i32
    %96 = arith.index_cast %95 : i32 to index
    %c0_37 = arith.constant 0 : index
    %97 = vector.load %arg9[%96, %c0_37] : memref<16x96xf32, #tpu.memory_space<vmem>>, vector<2x96xf32>
    %c16_38 = arith.constant 16 : index
    %c0_39 = arith.constant 0 : index
    %98 = vector.load %arg1[%c16_38, %c0_39] : memref<41x96xf32, #tpu.memory_space<vmem>>, vector<24x96xf32>
    %cst_40 = arith.constant dense<0.000000e+00> : vector<2x96xf32>
    %99 = tpu.matmul %52, %98, %cst_40 {dimension_numbers = #tpu.dot_dimension_numbers<[1], [0], [0], [1], [0, 0, 1, 1], [], []>} : vector<2x24xf32>, vector<24x96xf32>, vector<2x96xf32> -> vector<2x96xf32>
    %100 = arith.addf %97, %99 : vector<2x96xf32>
    %101 = vector.extract_strided_slice %100 {offsets = [0, 0], sizes = [2, 24], strides = [1, 1]} : vector<2x96xf32> to vector<2x24xf32>
    %102 = arith.negf %101 : vector<2x24xf32>
    %103 = math.exp %102 : vector<2x24xf32>
    %cst_41 = arith.constant 1.000000e+00 : f32
    %104 = vector.broadcast %cst_41 : f32 to vector<2x24xf32>
    %105 = arith.addf %104, %103 : vector<2x24xf32>
    %106 = arith.divf %104, %105 : vector<2x24xf32>
    %107 = vector.extract_strided_slice %100 {offsets = [0, 24], sizes = [2, 24], strides = [1, 1]} : vector<2x96xf32> to vector<2x24xf32>
    %108 = arith.negf %107 : vector<2x24xf32>
    %109 = math.exp %108 : vector<2x24xf32>
    %cst_42 = arith.constant 1.000000e+00 : f32
    %110 = vector.broadcast %cst_42 : f32 to vector<2x24xf32>
    %111 = arith.addf %110, %109 : vector<2x24xf32>
    %112 = arith.divf %110, %111 : vector<2x24xf32>
    %113 = vector.extract_strided_slice %100 {offsets = [0, 48], sizes = [2, 24], strides = [1, 1]} : vector<2x96xf32> to vector<2x24xf32>
    %114 = math.tanh %113 : vector<2x24xf32>
    %115 = vector.extract_strided_slice %100 {offsets = [0, 72], sizes = [2, 24], strides = [1, 1]} : vector<2x96xf32> to vector<2x24xf32>
    %116 = arith.negf %115 : vector<2x24xf32>
    %117 = math.exp %116 : vector<2x24xf32>
    %cst_43 = arith.constant 1.000000e+00 : f32
    %118 = vector.broadcast %cst_43 : f32 to vector<2x24xf32>
    %119 = arith.addf %118, %117 : vector<2x24xf32>
    %120 = arith.divf %118, %119 : vector<2x24xf32>
    %121 = arith.mulf %112, %50 : vector<2x24xf32>
    %122 = arith.mulf %106, %114 : vector<2x24xf32>
    %123 = arith.addf %121, %122 : vector<2x24xf32>
    %124 = math.tanh %123 : vector<2x24xf32>
    %125 = arith.mulf %120, %124 : vector<2x24xf32>
    %126 = tpu.concatenate %50, %123 in 1 : vector<2x24xf32>, vector<2x24xf32> -> vector<2x48xf32>
    %c0_44 = arith.constant 0 : index
    %c0_45 = arith.constant 0 : index
    %127 = vector.load %arg2[%c0_44, %c0_45] : memref<49x32xf32, #tpu.memory_space<vmem>>, vector<48x32xf32>
    %cst_46 = arith.constant dense<0.000000e+00> : vector<2x32xf32>
    %128 = tpu.matmul %126, %127, %cst_46 {dimension_numbers = #tpu.dot_dimension_numbers<[1], [0], [0], [1], [0, 0, 1, 1], [], []>} : vector<2x48xf32>, vector<48x32xf32>, vector<2x32xf32> -> vector<2x32xf32>
    %129 = arith.addf %128, %9 : vector<2x32xf32>
    %cst_47 = arith.constant 0.000000e+00 : f32
    %130 = vector.broadcast %cst_47 : f32 to vector<2x32xf32>
    %131 = arith.maximumf %129, %130 : vector<2x32xf32>
    %c0_48 = arith.constant 0 : index
    %c0_49 = arith.constant 0 : index
    %132 = vector.load %arg3[%c0_48, %c0_49] : memref<33x48xf32, #tpu.memory_space<vmem>>, vector<32x48xf32>
    %cst_50 = arith.constant dense<0.000000e+00> : vector<2x48xf32>
    %133 = tpu.matmul %131, %132, %cst_50 {dimension_numbers = #tpu.dot_dimension_numbers<[1], [0], [0], [1], [0, 0, 1, 1], [], []>} : vector<2x32xf32>, vector<32x48xf32>, vector<2x48xf32> -> vector<2x48xf32>
    %134 = arith.addf %133, %12 : vector<2x48xf32>
    %cst_51 = arith.constant dense<0xFF800000> : vector<2xf32>
    %135 = vector.multi_reduction <maximumf>, %134, %cst_51 [1] : vector<2x48xf32> to vector<2xf32>
    %136 = vector.shape_cast %135 : vector<2xf32> to vector<2x1xf32>
    %137 = vector.broadcast %136 : vector<2x1xf32> to vector<2x48xf32>
    %138 = arith.subf %134, %137 : vector<2x48xf32>
    %139 = math.exp %138 : vector<2x48xf32>
    %cst_52 = arith.constant dense<0.000000e+00> : vector<2xf32>
    %140 = vector.multi_reduction <add>, %139, %cst_52 [1] : vector<2x48xf32> to vector<2xf32>
    %141 = vector.shape_cast %140 : vector<2xf32> to vector<2x1xf32>
    %142 = tpu.reciprocal %141 {approx = true} : vector<2x1xf32> -> vector<2x1xf32>
    %143 = vector.broadcast %142 : vector<2x1xf32> to vector<2x48xf32>
    %144 = arith.mulf %139, %143 : vector<2x48xf32>
    %145 = arith.mulf %144, %126 : vector<2x48xf32>
    %146 = tpu.concatenate %145, %94 in 1 : vector<2x48xf32>, vector<2x8xf32> -> vector<2x56xf32>
    %c0_53 = arith.constant 0 : index
    %c0_54 = arith.constant 0 : index
    %147 = vector.load %arg4[%c0_53, %c0_54] : memref<57x96xf32, #tpu.memory_space<vmem>>, vector<56x96xf32>
    %cst_55 = arith.constant dense<0.000000e+00> : vector<2x96xf32>
    %148 = tpu.matmul %146, %147, %cst_55 {dimension_numbers = #tpu.dot_dimension_numbers<[1], [0], [0], [1], [0, 0, 1, 1], [], []>} : vector<2x56xf32>, vector<56x96xf32>, vector<2x96xf32> -> vector<2x96xf32>
    %149 = arith.addf %148, %15 : vector<2x96xf32>
    %cst_56 = arith.constant 0.000000e+00 : f32
    %150 = vector.broadcast %cst_56 : f32 to vector<2x96xf32>
    %151 = arith.maximumf %149, %150 : vector<2x96xf32>
    %c0_57 = arith.constant 0 : index
    %c0_58 = arith.constant 0 : index
    %152 = vector.load %arg5[%c0_57, %c0_58] : memref<97x24xf32, #tpu.memory_space<vmem>>, vector<96x24xf32>
    %cst_59 = arith.constant dense<0.000000e+00> : vector<2x24xf32>
    %153 = tpu.matmul %151, %152, %cst_59 {dimension_numbers = #tpu.dot_dimension_numbers<[1], [0], [0], [1], [0, 0, 1, 1], [], []>} : vector<2x96xf32>, vector<96x24xf32>, vector<2x24xf32> -> vector<2x24xf32>
    %154 = arith.addf %153, %18 : vector<2x24xf32>
    %155 = vector.extract_strided_slice %154 {offsets = [0, 0], sizes = [2, 8], strides = [1, 1]} : vector<2x24xf32> to vector<2x8xf32>
    %156 = math.tanh %155 : vector<2x8xf32>
    %157 = vector.extract_strided_slice %154 {offsets = [0, 8], sizes = [2, 16], strides = [1, 1]} : vector<2x24xf32> to vector<2x16xf32>
    %158 = arith.negf %157 : vector<2x16xf32>
    %159 = math.exp %158 : vector<2x16xf32>
    %cst_60 = arith.constant 1.000000e+00 : f32
    %160 = vector.broadcast %cst_60 : f32 to vector<2x16xf32>
    %161 = arith.addf %160, %159 : vector<2x16xf32>
    %162 = arith.divf %160, %161 : vector<2x16xf32>
    %163 = vector.extract_strided_slice %162 {offsets = [0, 0], sizes = [2, 8], strides = [1, 1]} : vector<2x16xf32> to vector<2x8xf32>
    %164 = arith.mulf %163, %94 : vector<2x8xf32>
    %165 = vector.extract_strided_slice %162 {offsets = [0, 8], sizes = [2, 8], strides = [1, 1]} : vector<2x16xf32> to vector<2x8xf32>
    %166 = arith.mulf %165, %156 : vector<2x8xf32>
    %167 = arith.addf %164, %166 : vector<2x8xf32>
    %c2_i32_61 = arith.constant 2 : i32
    %c2_i32_62 = arith.constant 2 : i32
    %168 = arith.muli %c2_i32_61, %c2_i32_62 : i32
    %169 = arith.index_cast %168 : i32 to index
    %c0_63 = arith.constant 0 : index
    %170 = vector.load %arg9[%169, %c0_63] : memref<16x96xf32, #tpu.memory_space<vmem>>, vector<2x96xf32>
    %c16_64 = arith.constant 16 : index
    %c0_65 = arith.constant 0 : index
    %171 = vector.load %arg1[%c16_64, %c0_65] : memref<41x96xf32, #tpu.memory_space<vmem>>, vector<24x96xf32>
    %cst_66 = arith.constant dense<0.000000e+00> : vector<2x96xf32>
    %172 = tpu.matmul %125, %171, %cst_66 {dimension_numbers = #tpu.dot_dimension_numbers<[1], [0], [0], [1], [0, 0, 1, 1], [], []>} : vector<2x24xf32>, vector<24x96xf32>, vector<2x96xf32> -> vector<2x96xf32>
    %173 = arith.addf %170, %172 : vector<2x96xf32>
    %174 = vector.extract_strided_slice %173 {offsets = [0, 0], sizes = [2, 24], strides = [1, 1]} : vector<2x96xf32> to vector<2x24xf32>
    %175 = arith.negf %174 : vector<2x24xf32>
    %176 = math.exp %175 : vector<2x24xf32>
    %cst_67 = arith.constant 1.000000e+00 : f32
    %177 = vector.broadcast %cst_67 : f32 to vector<2x24xf32>
    %178 = arith.addf %177, %176 : vector<2x24xf32>
    %179 = arith.divf %177, %178 : vector<2x24xf32>
    %180 = vector.extract_strided_slice %173 {offsets = [0, 24], sizes = [2, 24], strides = [1, 1]} : vector<2x96xf32> to vector<2x24xf32>
    %181 = arith.negf %180 : vector<2x24xf32>
    %182 = math.exp %181 : vector<2x24xf32>
    %cst_68 = arith.constant 1.000000e+00 : f32
    %183 = vector.broadcast %cst_68 : f32 to vector<2x24xf32>
    %184 = arith.addf %183, %182 : vector<2x24xf32>
    %185 = arith.divf %183, %184 : vector<2x24xf32>
    %186 = vector.extract_strided_slice %173 {offsets = [0, 48], sizes = [2, 24], strides = [1, 1]} : vector<2x96xf32> to vector<2x24xf32>
    %187 = math.tanh %186 : vector<2x24xf32>
    %188 = vector.extract_strided_slice %173 {offsets = [0, 72], sizes = [2, 24], strides = [1, 1]} : vector<2x96xf32> to vector<2x24xf32>
    %189 = arith.negf %188 : vector<2x24xf32>
    %190 = math.exp %189 : vector<2x24xf32>
    %cst_69 = arith.constant 1.000000e+00 : f32
    %191 = vector.broadcast %cst_69 : f32 to vector<2x24xf32>
    %192 = arith.addf %191, %190 : vector<2x24xf32>
    %193 = arith.divf %191, %192 : vector<2x24xf32>
    %194 = arith.mulf %185, %123 : vector<2x24xf32>
    %195 = arith.mulf %179, %187 : vector<2x24xf32>
    %196 = arith.addf %194, %195 : vector<2x24xf32>
    %197 = math.tanh %196 : vector<2x24xf32>
    %198 = arith.mulf %193, %197 : vector<2x24xf32>
    %199 = tpu.concatenate %123, %196 in 1 : vector<2x24xf32>, vector<2x24xf32> -> vector<2x48xf32>
    %c0_70 = arith.constant 0 : index
    %c0_71 = arith.constant 0 : index
    %200 = vector.load %arg2[%c0_70, %c0_71] : memref<49x32xf32, #tpu.memory_space<vmem>>, vector<48x32xf32>
    %cst_72 = arith.constant dense<0.000000e+00> : vector<2x32xf32>
    %201 = tpu.matmul %199, %200, %cst_72 {dimension_numbers = #tpu.dot_dimension_numbers<[1], [0], [0], [1], [0, 0, 1, 1], [], []>} : vector<2x48xf32>, vector<48x32xf32>, vector<2x32xf32> -> vector<2x32xf32>
    %202 = arith.addf %201, %9 : vector<2x32xf32>
    %cst_73 = arith.constant 0.000000e+00 : f32
    %203 = vector.broadcast %cst_73 : f32 to vector<2x32xf32>
    %204 = arith.maximumf %202, %203 : vector<2x32xf32>
    %c0_74 = arith.constant 0 : index
    %c0_75 = arith.constant 0 : index
    %205 = vector.load %arg3[%c0_74, %c0_75] : memref<33x48xf32, #tpu.memory_space<vmem>>, vector<32x48xf32>
    %cst_76 = arith.constant dense<0.000000e+00> : vector<2x48xf32>
    %206 = tpu.matmul %204, %205, %cst_76 {dimension_numbers = #tpu.dot_dimension_numbers<[1], [0], [0], [1], [0, 0, 1, 1], [], []>} : vector<2x32xf32>, vector<32x48xf32>, vector<2x48xf32> -> vector<2x48xf32>
    %207 = arith.addf %206, %12 : vector<2x48xf32>
    %cst_77 = arith.constant dense<0xFF800000> : vector<2xf32>
    %208 = vector.multi_reduction <maximumf>, %207, %cst_77 [1] : vector<2x48xf32> to vector<2xf32>
    %209 = vector.shape_cast %208 : vector<2xf32> to vector<2x1xf32>
    %210 = vector.broadcast %209 : vector<2x1xf32> to vector<2x48xf32>
    %211 = arith.subf %207, %210 : vector<2x48xf32>
    %212 = math.exp %211 : vector<2x48xf32>
    %cst_78 = arith.constant dense<0.000000e+00> : vector<2xf32>
    %213 = vector.multi_reduction <add>, %212, %cst_78 [1] : vector<2x48xf32> to vector<2xf32>
    %214 = vector.shape_cast %213 : vector<2xf32> to vector<2x1xf32>
    %215 = tpu.reciprocal %214 {approx = true} : vector<2x1xf32> -> vector<2x1xf32>
    %216 = vector.broadcast %215 : vector<2x1xf32> to vector<2x48xf32>
    %217 = arith.mulf %212, %216 : vector<2x48xf32>
    %218 = arith.mulf %217, %199 : vector<2x48xf32>
    %219 = tpu.concatenate %218, %167 in 1 : vector<2x48xf32>, vector<2x8xf32> -> vector<2x56xf32>
    %c0_79 = arith.constant 0 : index
    %c0_80 = arith.constant 0 : index
    %220 = vector.load %arg4[%c0_79, %c0_80] : memref<57x96xf32, #tpu.memory_space<vmem>>, vector<56x96xf32>
    %cst_81 = arith.constant dense<0.000000e+00> : vector<2x96xf32>
    %221 = tpu.matmul %219, %220, %cst_81 {dimension_numbers = #tpu.dot_dimension_numbers<[1], [0], [0], [1], [0, 0, 1, 1], [], []>} : vector<2x56xf32>, vector<56x96xf32>, vector<2x96xf32> -> vector<2x96xf32>
    %222 = arith.addf %221, %15 : vector<2x96xf32>
    %cst_82 = arith.constant 0.000000e+00 : f32
    %223 = vector.broadcast %cst_82 : f32 to vector<2x96xf32>
    %224 = arith.maximumf %222, %223 : vector<2x96xf32>
    %c0_83 = arith.constant 0 : index
    %c0_84 = arith.constant 0 : index
    %225 = vector.load %arg5[%c0_83, %c0_84] : memref<97x24xf32, #tpu.memory_space<vmem>>, vector<96x24xf32>
    %cst_85 = arith.constant dense<0.000000e+00> : vector<2x24xf32>
    %226 = tpu.matmul %224, %225, %cst_85 {dimension_numbers = #tpu.dot_dimension_numbers<[1], [0], [0], [1], [0, 0, 1, 1], [], []>} : vector<2x96xf32>, vector<96x24xf32>, vector<2x24xf32> -> vector<2x24xf32>
    %227 = arith.addf %226, %18 : vector<2x24xf32>
    %228 = vector.extract_strided_slice %227 {offsets = [0, 0], sizes = [2, 8], strides = [1, 1]} : vector<2x24xf32> to vector<2x8xf32>
    %229 = math.tanh %228 : vector<2x8xf32>
    %230 = vector.extract_strided_slice %227 {offsets = [0, 8], sizes = [2, 16], strides = [1, 1]} : vector<2x24xf32> to vector<2x16xf32>
    %231 = arith.negf %230 : vector<2x16xf32>
    %232 = math.exp %231 : vector<2x16xf32>
    %cst_86 = arith.constant 1.000000e+00 : f32
    %233 = vector.broadcast %cst_86 : f32 to vector<2x16xf32>
    %234 = arith.addf %233, %232 : vector<2x16xf32>
    %235 = arith.divf %233, %234 : vector<2x16xf32>
    %236 = vector.extract_strided_slice %235 {offsets = [0, 0], sizes = [2, 8], strides = [1, 1]} : vector<2x16xf32> to vector<2x8xf32>
    %237 = arith.mulf %236, %167 : vector<2x8xf32>
    %238 = vector.extract_strided_slice %235 {offsets = [0, 8], sizes = [2, 8], strides = [1, 1]} : vector<2x16xf32> to vector<2x8xf32>
    %239 = arith.mulf %238, %229 : vector<2x8xf32>
    %240 = arith.addf %237, %239 : vector<2x8xf32>
    %c3_i32 = arith.constant 3 : i32
    %c2_i32_87 = arith.constant 2 : i32
    %241 = arith.muli %c3_i32, %c2_i32_87 : i32
    %242 = arith.index_cast %241 : i32 to index
    %c0_88 = arith.constant 0 : index
    %243 = vector.load %arg9[%242, %c0_88] : memref<16x96xf32, #tpu.memory_space<vmem>>, vector<2x96xf32>
    %c16_89 = arith.constant 16 : index
    %c0_90 = arith.constant 0 : index
    %244 = vector.load %arg1[%c16_89, %c0_90] : memref<41x96xf32, #tpu.memory_space<vmem>>, vector<24x96xf32>
    %cst_91 = arith.constant dense<0.000000e+00> : vector<2x96xf32>
    %245 = tpu.matmul %198, %244, %cst_91 {dimension_numbers = #tpu.dot_dimension_numbers<[1], [0], [0], [1], [0, 0, 1, 1], [], []>} : vector<2x24xf32>, vector<24x96xf32>, vector<2x96xf32> -> vector<2x96xf32>
    %246 = arith.addf %243, %245 : vector<2x96xf32>
    %247 = vector.extract_strided_slice %246 {offsets = [0, 0], sizes = [2, 24], strides = [1, 1]} : vector<2x96xf32> to vector<2x24xf32>
    %248 = arith.negf %247 : vector<2x24xf32>
    %249 = math.exp %248 : vector<2x24xf32>
    %cst_92 = arith.constant 1.000000e+00 : f32
    %250 = vector.broadcast %cst_92 : f32 to vector<2x24xf32>
    %251 = arith.addf %250, %249 : vector<2x24xf32>
    %252 = arith.divf %250, %251 : vector<2x24xf32>
    %253 = vector.extract_strided_slice %246 {offsets = [0, 24], sizes = [2, 24], strides = [1, 1]} : vector<2x96xf32> to vector<2x24xf32>
    %254 = arith.negf %253 : vector<2x24xf32>
    %255 = math.exp %254 : vector<2x24xf32>
    %cst_93 = arith.constant 1.000000e+00 : f32
    %256 = vector.broadcast %cst_93 : f32 to vector<2x24xf32>
    %257 = arith.addf %256, %255 : vector<2x24xf32>
    %258 = arith.divf %256, %257 : vector<2x24xf32>
    %259 = vector.extract_strided_slice %246 {offsets = [0, 48], sizes = [2, 24], strides = [1, 1]} : vector<2x96xf32> to vector<2x24xf32>
    %260 = math.tanh %259 : vector<2x24xf32>
    %261 = vector.extract_strided_slice %246 {offsets = [0, 72], sizes = [2, 24], strides = [1, 1]} : vector<2x96xf32> to vector<2x24xf32>
    %262 = arith.negf %261 : vector<2x24xf32>
    %263 = math.exp %262 : vector<2x24xf32>
    %cst_94 = arith.constant 1.000000e+00 : f32
    %264 = vector.broadcast %cst_94 : f32 to vector<2x24xf32>
    %265 = arith.addf %264, %263 : vector<2x24xf32>
    %266 = arith.divf %264, %265 : vector<2x24xf32>
    %267 = arith.mulf %258, %196 : vector<2x24xf32>
    %268 = arith.mulf %252, %260 : vector<2x24xf32>
    %269 = arith.addf %267, %268 : vector<2x24xf32>
    %270 = math.tanh %269 : vector<2x24xf32>
    %271 = arith.mulf %266, %270 : vector<2x24xf32>
    %272 = tpu.concatenate %196, %269 in 1 : vector<2x24xf32>, vector<2x24xf32> -> vector<2x48xf32>
    %c0_95 = arith.constant 0 : index
    %c0_96 = arith.constant 0 : index
    %273 = vector.load %arg2[%c0_95, %c0_96] : memref<49x32xf32, #tpu.memory_space<vmem>>, vector<48x32xf32>
    %cst_97 = arith.constant dense<0.000000e+00> : vector<2x32xf32>
    %274 = tpu.matmul %272, %273, %cst_97 {dimension_numbers = #tpu.dot_dimension_numbers<[1], [0], [0], [1], [0, 0, 1, 1], [], []>} : vector<2x48xf32>, vector<48x32xf32>, vector<2x32xf32> -> vector<2x32xf32>
    %275 = arith.addf %274, %9 : vector<2x32xf32>
    %cst_98 = arith.constant 0.000000e+00 : f32
    %276 = vector.broadcast %cst_98 : f32 to vector<2x32xf32>
    %277 = arith.maximumf %275, %276 : vector<2x32xf32>
    %c0_99 = arith.constant 0 : index
    %c0_100 = arith.constant 0 : index
    %278 = vector.load %arg3[%c0_99, %c0_100] : memref<33x48xf32, #tpu.memory_space<vmem>>, vector<32x48xf32>
    %cst_101 = arith.constant dense<0.000000e+00> : vector<2x48xf32>
    %279 = tpu.matmul %277, %278, %cst_101 {dimension_numbers = #tpu.dot_dimension_numbers<[1], [0], [0], [1], [0, 0, 1, 1], [], []>} : vector<2x32xf32>, vector<32x48xf32>, vector<2x48xf32> -> vector<2x48xf32>
    %280 = arith.addf %279, %12 : vector<2x48xf32>
    %cst_102 = arith.constant dense<0xFF800000> : vector<2xf32>
    %281 = vector.multi_reduction <maximumf>, %280, %cst_102 [1] : vector<2x48xf32> to vector<2xf32>
    %282 = vector.shape_cast %281 : vector<2xf32> to vector<2x1xf32>
    %283 = vector.broadcast %282 : vector<2x1xf32> to vector<2x48xf32>
    %284 = arith.subf %280, %283 : vector<2x48xf32>
    %285 = math.exp %284 : vector<2x48xf32>
    %cst_103 = arith.constant dense<0.000000e+00> : vector<2xf32>
    %286 = vector.multi_reduction <add>, %285, %cst_103 [1] : vector<2x48xf32> to vector<2xf32>
    %287 = vector.shape_cast %286 : vector<2xf32> to vector<2x1xf32>
    %288 = tpu.reciprocal %287 {approx = true} : vector<2x1xf32> -> vector<2x1xf32>
    %289 = vector.broadcast %288 : vector<2x1xf32> to vector<2x48xf32>
    %290 = arith.mulf %285, %289 : vector<2x48xf32>
    %291 = arith.mulf %290, %272 : vector<2x48xf32>
    %292 = tpu.concatenate %291, %240 in 1 : vector<2x48xf32>, vector<2x8xf32> -> vector<2x56xf32>
    %c0_104 = arith.constant 0 : index
    %c0_105 = arith.constant 0 : index
    %293 = vector.load %arg4[%c0_104, %c0_105] : memref<57x96xf32, #tpu.memory_space<vmem>>, vector<56x96xf32>
    %cst_106 = arith.constant dense<0.000000e+00> : vector<2x96xf32>
    %294 = tpu.matmul %292, %293, %cst_106 {dimension_numbers = #tpu.dot_dimension_numbers<[1], [0], [0], [1], [0, 0, 1, 1], [], []>} : vector<2x56xf32>, vector<56x96xf32>, vector<2x96xf32> -> vector<2x96xf32>
    %295 = arith.addf %294, %15 : vector<2x96xf32>
    %cst_107 = arith.constant 0.000000e+00 : f32
    %296 = vector.broadcast %cst_107 : f32 to vector<2x96xf32>
    %297 = arith.maximumf %295, %296 : vector<2x96xf32>
    %c0_108 = arith.constant 0 : index
    %c0_109 = arith.constant 0 : index
    %298 = vector.load %arg5[%c0_108, %c0_109] : memref<97x24xf32, #tpu.memory_space<vmem>>, vector<96x24xf32>
    %cst_110 = arith.constant dense<0.000000e+00> : vector<2x24xf32>
    %299 = tpu.matmul %297, %298, %cst_110 {dimension_numbers = #tpu.dot_dimension_numbers<[1], [0], [0], [1], [0, 0, 1, 1], [], []>} : vector<2x96xf32>, vector<96x24xf32>, vector<2x24xf32> -> vector<2x24xf32>
    %300 = arith.addf %299, %18 : vector<2x24xf32>
    %301 = vector.extract_strided_slice %300 {offsets = [0, 0], sizes = [2, 8], strides = [1, 1]} : vector<2x24xf32> to vector<2x8xf32>
    %302 = math.tanh %301 : vector<2x8xf32>
    %303 = vector.extract_strided_slice %300 {offsets = [0, 8], sizes = [2, 16], strides = [1, 1]} : vector<2x24xf32> to vector<2x16xf32>
    %304 = arith.negf %303 : vector<2x16xf32>
    %305 = math.exp %304 : vector<2x16xf32>
    %cst_111 = arith.constant 1.000000e+00 : f32
    %306 = vector.broadcast %cst_111 : f32 to vector<2x16xf32>
    %307 = arith.addf %306, %305 : vector<2x16xf32>
    %308 = arith.divf %306, %307 : vector<2x16xf32>
    %309 = vector.extract_strided_slice %308 {offsets = [0, 0], sizes = [2, 8], strides = [1, 1]} : vector<2x16xf32> to vector<2x8xf32>
    %310 = arith.mulf %309, %240 : vector<2x8xf32>
    %311 = vector.extract_strided_slice %308 {offsets = [0, 8], sizes = [2, 8], strides = [1, 1]} : vector<2x16xf32> to vector<2x8xf32>
    %312 = arith.mulf %311, %302 : vector<2x8xf32>
    %313 = arith.addf %310, %312 : vector<2x8xf32>
    %c4_i32 = arith.constant 4 : i32
    %c2_i32_112 = arith.constant 2 : i32
    %314 = arith.muli %c4_i32, %c2_i32_112 : i32
    %315 = arith.index_cast %314 : i32 to index
    %c0_113 = arith.constant 0 : index
    %316 = vector.load %arg9[%315, %c0_113] : memref<16x96xf32, #tpu.memory_space<vmem>>, vector<2x96xf32>
    %c16_114 = arith.constant 16 : index
    %c0_115 = arith.constant 0 : index
    %317 = vector.load %arg1[%c16_114, %c0_115] : memref<41x96xf32, #tpu.memory_space<vmem>>, vector<24x96xf32>
    %cst_116 = arith.constant dense<0.000000e+00> : vector<2x96xf32>
    %318 = tpu.matmul %271, %317, %cst_116 {dimension_numbers = #tpu.dot_dimension_numbers<[1], [0], [0], [1], [0, 0, 1, 1], [], []>} : vector<2x24xf32>, vector<24x96xf32>, vector<2x96xf32> -> vector<2x96xf32>
    %319 = arith.addf %316, %318 : vector<2x96xf32>
    %320 = vector.extract_strided_slice %319 {offsets = [0, 0], sizes = [2, 24], strides = [1, 1]} : vector<2x96xf32> to vector<2x24xf32>
    %321 = arith.negf %320 : vector<2x24xf32>
    %322 = math.exp %321 : vector<2x24xf32>
    %cst_117 = arith.constant 1.000000e+00 : f32
    %323 = vector.broadcast %cst_117 : f32 to vector<2x24xf32>
    %324 = arith.addf %323, %322 : vector<2x24xf32>
    %325 = arith.divf %323, %324 : vector<2x24xf32>
    %326 = vector.extract_strided_slice %319 {offsets = [0, 24], sizes = [2, 24], strides = [1, 1]} : vector<2x96xf32> to vector<2x24xf32>
    %327 = arith.negf %326 : vector<2x24xf32>
    %328 = math.exp %327 : vector<2x24xf32>
    %cst_118 = arith.constant 1.000000e+00 : f32
    %329 = vector.broadcast %cst_118 : f32 to vector<2x24xf32>
    %330 = arith.addf %329, %328 : vector<2x24xf32>
    %331 = arith.divf %329, %330 : vector<2x24xf32>
    %332 = vector.extract_strided_slice %319 {offsets = [0, 48], sizes = [2, 24], strides = [1, 1]} : vector<2x96xf32> to vector<2x24xf32>
    %333 = math.tanh %332 : vector<2x24xf32>
    %334 = vector.extract_strided_slice %319 {offsets = [0, 72], sizes = [2, 24], strides = [1, 1]} : vector<2x96xf32> to vector<2x24xf32>
    %335 = arith.negf %334 : vector<2x24xf32>
    %336 = math.exp %335 : vector<2x24xf32>
    %cst_119 = arith.constant 1.000000e+00 : f32
    %337 = vector.broadcast %cst_119 : f32 to vector<2x24xf32>
    %338 = arith.addf %337, %336 : vector<2x24xf32>
    %339 = arith.divf %337, %338 : vector<2x24xf32>
    %340 = arith.mulf %331, %269 : vector<2x24xf32>
    %341 = arith.mulf %325, %333 : vector<2x24xf32>
    %342 = arith.addf %340, %341 : vector<2x24xf32>
    %343 = math.tanh %342 : vector<2x24xf32>
    %344 = arith.mulf %339, %343 : vector<2x24xf32>
    %345 = tpu.concatenate %269, %342 in 1 : vector<2x24xf32>, vector<2x24xf32> -> vector<2x48xf32>
    %c0_120 = arith.constant 0 : index
    %c0_121 = arith.constant 0 : index
    %346 = vector.load %arg2[%c0_120, %c0_121] : memref<49x32xf32, #tpu.memory_space<vmem>>, vector<48x32xf32>
    %cst_122 = arith.constant dense<0.000000e+00> : vector<2x32xf32>
    %347 = tpu.matmul %345, %346, %cst_122 {dimension_numbers = #tpu.dot_dimension_numbers<[1], [0], [0], [1], [0, 0, 1, 1], [], []>} : vector<2x48xf32>, vector<48x32xf32>, vector<2x32xf32> -> vector<2x32xf32>
    %348 = arith.addf %347, %9 : vector<2x32xf32>
    %cst_123 = arith.constant 0.000000e+00 : f32
    %349 = vector.broadcast %cst_123 : f32 to vector<2x32xf32>
    %350 = arith.maximumf %348, %349 : vector<2x32xf32>
    %c0_124 = arith.constant 0 : index
    %c0_125 = arith.constant 0 : index
    %351 = vector.load %arg3[%c0_124, %c0_125] : memref<33x48xf32, #tpu.memory_space<vmem>>, vector<32x48xf32>
    %cst_126 = arith.constant dense<0.000000e+00> : vector<2x48xf32>
    %352 = tpu.matmul %350, %351, %cst_126 {dimension_numbers = #tpu.dot_dimension_numbers<[1], [0], [0], [1], [0, 0, 1, 1], [], []>} : vector<2x32xf32>, vector<32x48xf32>, vector<2x48xf32> -> vector<2x48xf32>
    %353 = arith.addf %352, %12 : vector<2x48xf32>
    %cst_127 = arith.constant dense<0xFF800000> : vector<2xf32>
    %354 = vector.multi_reduction <maximumf>, %353, %cst_127 [1] : vector<2x48xf32> to vector<2xf32>
    %355 = vector.shape_cast %354 : vector<2xf32> to vector<2x1xf32>
    %356 = vector.broadcast %355 : vector<2x1xf32> to vector<2x48xf32>
    %357 = arith.subf %353, %356 : vector<2x48xf32>
    %358 = math.exp %357 : vector<2x48xf32>
    %cst_128 = arith.constant dense<0.000000e+00> : vector<2xf32>
    %359 = vector.multi_reduction <add>, %358, %cst_128 [1] : vector<2x48xf32> to vector<2xf32>
    %360 = vector.shape_cast %359 : vector<2xf32> to vector<2x1xf32>
    %361 = tpu.reciprocal %360 {approx = true} : vector<2x1xf32> -> vector<2x1xf32>
    %362 = vector.broadcast %361 : vector<2x1xf32> to vector<2x48xf32>
    %363 = arith.mulf %358, %362 : vector<2x48xf32>
    %364 = arith.mulf %363, %345 : vector<2x48xf32>
    %365 = tpu.concatenate %364, %313 in 1 : vector<2x48xf32>, vector<2x8xf32> -> vector<2x56xf32>
    %c0_129 = arith.constant 0 : index
    %c0_130 = arith.constant 0 : index
    %366 = vector.load %arg4[%c0_129, %c0_130] : memref<57x96xf32, #tpu.memory_space<vmem>>, vector<56x96xf32>
    %cst_131 = arith.constant dense<0.000000e+00> : vector<2x96xf32>
    %367 = tpu.matmul %365, %366, %cst_131 {dimension_numbers = #tpu.dot_dimension_numbers<[1], [0], [0], [1], [0, 0, 1, 1], [], []>} : vector<2x56xf32>, vector<56x96xf32>, vector<2x96xf32> -> vector<2x96xf32>
    %368 = arith.addf %367, %15 : vector<2x96xf32>
    %cst_132 = arith.constant 0.000000e+00 : f32
    %369 = vector.broadcast %cst_132 : f32 to vector<2x96xf32>
    %370 = arith.maximumf %368, %369 : vector<2x96xf32>
    %c0_133 = arith.constant 0 : index
    %c0_134 = arith.constant 0 : index
    %371 = vector.load %arg5[%c0_133, %c0_134] : memref<97x24xf32, #tpu.memory_space<vmem>>, vector<96x24xf32>
    %cst_135 = arith.constant dense<0.000000e+00> : vector<2x24xf32>
    %372 = tpu.matmul %370, %371, %cst_135 {dimension_numbers = #tpu.dot_dimension_numbers<[1], [0], [0], [1], [0, 0, 1, 1], [], []>} : vector<2x96xf32>, vector<96x24xf32>, vector<2x24xf32> -> vector<2x24xf32>
    %373 = arith.addf %372, %18 : vector<2x24xf32>
    %374 = vector.extract_strided_slice %373 {offsets = [0, 0], sizes = [2, 8], strides = [1, 1]} : vector<2x24xf32> to vector<2x8xf32>
    %375 = math.tanh %374 : vector<2x8xf32>
    %376 = vector.extract_strided_slice %373 {offsets = [0, 8], sizes = [2, 16], strides = [1, 1]} : vector<2x24xf32> to vector<2x16xf32>
    %377 = arith.negf %376 : vector<2x16xf32>
    %378 = math.exp %377 : vector<2x16xf32>
    %cst_136 = arith.constant 1.000000e+00 : f32
    %379 = vector.broadcast %cst_136 : f32 to vector<2x16xf32>
    %380 = arith.addf %379, %378 : vector<2x16xf32>
    %381 = arith.divf %379, %380 : vector<2x16xf32>
    %382 = vector.extract_strided_slice %381 {offsets = [0, 0], sizes = [2, 8], strides = [1, 1]} : vector<2x16xf32> to vector<2x8xf32>
    %383 = arith.mulf %382, %313 : vector<2x8xf32>
    %384 = vector.extract_strided_slice %381 {offsets = [0, 8], sizes = [2, 8], strides = [1, 1]} : vector<2x16xf32> to vector<2x8xf32>
    %385 = arith.mulf %384, %375 : vector<2x8xf32>
    %386 = arith.addf %383, %385 : vector<2x8xf32>
    %c5_i32 = arith.constant 5 : i32
    %c2_i32_137 = arith.constant 2 : i32
    %387 = arith.muli %c5_i32, %c2_i32_137 : i32
    %388 = arith.index_cast %387 : i32 to index
    %c0_138 = arith.constant 0 : index
    %389 = vector.load %arg9[%388, %c0_138] : memref<16x96xf32, #tpu.memory_space<vmem>>, vector<2x96xf32>
    %c16_139 = arith.constant 16 : index
    %c0_140 = arith.constant 0 : index
    %390 = vector.load %arg1[%c16_139, %c0_140] : memref<41x96xf32, #tpu.memory_space<vmem>>, vector<24x96xf32>
    %cst_141 = arith.constant dense<0.000000e+00> : vector<2x96xf32>
    %391 = tpu.matmul %344, %390, %cst_141 {dimension_numbers = #tpu.dot_dimension_numbers<[1], [0], [0], [1], [0, 0, 1, 1], [], []>} : vector<2x24xf32>, vector<24x96xf32>, vector<2x96xf32> -> vector<2x96xf32>
    %392 = arith.addf %389, %391 : vector<2x96xf32>
    %393 = vector.extract_strided_slice %392 {offsets = [0, 0], sizes = [2, 24], strides = [1, 1]} : vector<2x96xf32> to vector<2x24xf32>
    %394 = arith.negf %393 : vector<2x24xf32>
    %395 = math.exp %394 : vector<2x24xf32>
    %cst_142 = arith.constant 1.000000e+00 : f32
    %396 = vector.broadcast %cst_142 : f32 to vector<2x24xf32>
    %397 = arith.addf %396, %395 : vector<2x24xf32>
    %398 = arith.divf %396, %397 : vector<2x24xf32>
    %399 = vector.extract_strided_slice %392 {offsets = [0, 24], sizes = [2, 24], strides = [1, 1]} : vector<2x96xf32> to vector<2x24xf32>
    %400 = arith.negf %399 : vector<2x24xf32>
    %401 = math.exp %400 : vector<2x24xf32>
    %cst_143 = arith.constant 1.000000e+00 : f32
    %402 = vector.broadcast %cst_143 : f32 to vector<2x24xf32>
    %403 = arith.addf %402, %401 : vector<2x24xf32>
    %404 = arith.divf %402, %403 : vector<2x24xf32>
    %405 = vector.extract_strided_slice %392 {offsets = [0, 48], sizes = [2, 24], strides = [1, 1]} : vector<2x96xf32> to vector<2x24xf32>
    %406 = math.tanh %405 : vector<2x24xf32>
    %407 = vector.extract_strided_slice %392 {offsets = [0, 72], sizes = [2, 24], strides = [1, 1]} : vector<2x96xf32> to vector<2x24xf32>
    %408 = arith.negf %407 : vector<2x24xf32>
    %409 = math.exp %408 : vector<2x24xf32>
    %cst_144 = arith.constant 1.000000e+00 : f32
    %410 = vector.broadcast %cst_144 : f32 to vector<2x24xf32>
    %411 = arith.addf %410, %409 : vector<2x24xf32>
    %412 = arith.divf %410, %411 : vector<2x24xf32>
    %413 = arith.mulf %404, %342 : vector<2x24xf32>
    %414 = arith.mulf %398, %406 : vector<2x24xf32>
    %415 = arith.addf %413, %414 : vector<2x24xf32>
    %416 = math.tanh %415 : vector<2x24xf32>
    %417 = arith.mulf %412, %416 : vector<2x24xf32>
    %418 = tpu.concatenate %342, %415 in 1 : vector<2x24xf32>, vector<2x24xf32> -> vector<2x48xf32>
    %c0_145 = arith.constant 0 : index
    %c0_146 = arith.constant 0 : index
    %419 = vector.load %arg2[%c0_145, %c0_146] : memref<49x32xf32, #tpu.memory_space<vmem>>, vector<48x32xf32>
    %cst_147 = arith.constant dense<0.000000e+00> : vector<2x32xf32>
    %420 = tpu.matmul %418, %419, %cst_147 {dimension_numbers = #tpu.dot_dimension_numbers<[1], [0], [0], [1], [0, 0, 1, 1], [], []>} : vector<2x48xf32>, vector<48x32xf32>, vector<2x32xf32> -> vector<2x32xf32>
    %421 = arith.addf %420, %9 : vector<2x32xf32>
    %cst_148 = arith.constant 0.000000e+00 : f32
    %422 = vector.broadcast %cst_148 : f32 to vector<2x32xf32>
    %423 = arith.maximumf %421, %422 : vector<2x32xf32>
    %c0_149 = arith.constant 0 : index
    %c0_150 = arith.constant 0 : index
    %424 = vector.load %arg3[%c0_149, %c0_150] : memref<33x48xf32, #tpu.memory_space<vmem>>, vector<32x48xf32>
    %cst_151 = arith.constant dense<0.000000e+00> : vector<2x48xf32>
    %425 = tpu.matmul %423, %424, %cst_151 {dimension_numbers = #tpu.dot_dimension_numbers<[1], [0], [0], [1], [0, 0, 1, 1], [], []>} : vector<2x32xf32>, vector<32x48xf32>, vector<2x48xf32> -> vector<2x48xf32>
    %426 = arith.addf %425, %12 : vector<2x48xf32>
    %cst_152 = arith.constant dense<0xFF800000> : vector<2xf32>
    %427 = vector.multi_reduction <maximumf>, %426, %cst_152 [1] : vector<2x48xf32> to vector<2xf32>
    %428 = vector.shape_cast %427 : vector<2xf32> to vector<2x1xf32>
    %429 = vector.broadcast %428 : vector<2x1xf32> to vector<2x48xf32>
    %430 = arith.subf %426, %429 : vector<2x48xf32>
    %431 = math.exp %430 : vector<2x48xf32>
    %cst_153 = arith.constant dense<0.000000e+00> : vector<2xf32>
    %432 = vector.multi_reduction <add>, %431, %cst_153 [1] : vector<2x48xf32> to vector<2xf32>
    %433 = vector.shape_cast %432 : vector<2xf32> to vector<2x1xf32>
    %434 = tpu.reciprocal %433 {approx = true} : vector<2x1xf32> -> vector<2x1xf32>
    %435 = vector.broadcast %434 : vector<2x1xf32> to vector<2x48xf32>
    %436 = arith.mulf %431, %435 : vector<2x48xf32>
    %437 = arith.mulf %436, %418 : vector<2x48xf32>
    %438 = tpu.concatenate %437, %386 in 1 : vector<2x48xf32>, vector<2x8xf32> -> vector<2x56xf32>
    %c0_154 = arith.constant 0 : index
    %c0_155 = arith.constant 0 : index
    %439 = vector.load %arg4[%c0_154, %c0_155] : memref<57x96xf32, #tpu.memory_space<vmem>>, vector<56x96xf32>
    %cst_156 = arith.constant dense<0.000000e+00> : vector<2x96xf32>
    %440 = tpu.matmul %438, %439, %cst_156 {dimension_numbers = #tpu.dot_dimension_numbers<[1], [0], [0], [1], [0, 0, 1, 1], [], []>} : vector<2x56xf32>, vector<56x96xf32>, vector<2x96xf32> -> vector<2x96xf32>
    %441 = arith.addf %440, %15 : vector<2x96xf32>
    %cst_157 = arith.constant 0.000000e+00 : f32
    %442 = vector.broadcast %cst_157 : f32 to vector<2x96xf32>
    %443 = arith.maximumf %441, %442 : vector<2x96xf32>
    %c0_158 = arith.constant 0 : index
    %c0_159 = arith.constant 0 : index
    %444 = vector.load %arg5[%c0_158, %c0_159] : memref<97x24xf32, #tpu.memory_space<vmem>>, vector<96x24xf32>
    %cst_160 = arith.constant dense<0.000000e+00> : vector<2x24xf32>
    %445 = tpu.matmul %443, %444, %cst_160 {dimension_numbers = #tpu.dot_dimension_numbers<[1], [0], [0], [1], [0, 0, 1, 1], [], []>} : vector<2x96xf32>, vector<96x24xf32>, vector<2x24xf32> -> vector<2x24xf32>
    %446 = arith.addf %445, %18 : vector<2x24xf32>
    %447 = vector.extract_strided_slice %446 {offsets = [0, 0], sizes = [2, 8], strides = [1, 1]} : vector<2x24xf32> to vector<2x8xf32>
    %448 = math.tanh %447 : vector<2x8xf32>
    %449 = vector.extract_strided_slice %446 {offsets = [0, 8], sizes = [2, 16], strides = [1, 1]} : vector<2x24xf32> to vector<2x16xf32>
    %450 = arith.negf %449 : vector<2x16xf32>
    %451 = math.exp %450 : vector<2x16xf32>
    %cst_161 = arith.constant 1.000000e+00 : f32
    %452 = vector.broadcast %cst_161 : f32 to vector<2x16xf32>
    %453 = arith.addf %452, %451 : vector<2x16xf32>
    %454 = arith.divf %452, %453 : vector<2x16xf32>
    %455 = vector.extract_strided_slice %454 {offsets = [0, 0], sizes = [2, 8], strides = [1, 1]} : vector<2x16xf32> to vector<2x8xf32>
    %456 = arith.mulf %455, %386 : vector<2x8xf32>
    %457 = vector.extract_strided_slice %454 {offsets = [0, 8], sizes = [2, 8], strides = [1, 1]} : vector<2x16xf32> to vector<2x8xf32>
    %458 = arith.mulf %457, %448 : vector<2x8xf32>
    %459 = arith.addf %456, %458 : vector<2x8xf32>
    %c6_i32 = arith.constant 6 : i32
    %c2_i32_162 = arith.constant 2 : i32
    %460 = arith.muli %c6_i32, %c2_i32_162 : i32
    %461 = arith.index_cast %460 : i32 to index
    %c0_163 = arith.constant 0 : index
    %462 = vector.load %arg9[%461, %c0_163] : memref<16x96xf32, #tpu.memory_space<vmem>>, vector<2x96xf32>
    %c16_164 = arith.constant 16 : index
    %c0_165 = arith.constant 0 : index
    %463 = vector.load %arg1[%c16_164, %c0_165] : memref<41x96xf32, #tpu.memory_space<vmem>>, vector<24x96xf32>
    %cst_166 = arith.constant dense<0.000000e+00> : vector<2x96xf32>
    %464 = tpu.matmul %417, %463, %cst_166 {dimension_numbers = #tpu.dot_dimension_numbers<[1], [0], [0], [1], [0, 0, 1, 1], [], []>} : vector<2x24xf32>, vector<24x96xf32>, vector<2x96xf32> -> vector<2x96xf32>
    %465 = arith.addf %462, %464 : vector<2x96xf32>
    %466 = vector.extract_strided_slice %465 {offsets = [0, 0], sizes = [2, 24], strides = [1, 1]} : vector<2x96xf32> to vector<2x24xf32>
    %467 = arith.negf %466 : vector<2x24xf32>
    %468 = math.exp %467 : vector<2x24xf32>
    %cst_167 = arith.constant 1.000000e+00 : f32
    %469 = vector.broadcast %cst_167 : f32 to vector<2x24xf32>
    %470 = arith.addf %469, %468 : vector<2x24xf32>
    %471 = arith.divf %469, %470 : vector<2x24xf32>
    %472 = vector.extract_strided_slice %465 {offsets = [0, 24], sizes = [2, 24], strides = [1, 1]} : vector<2x96xf32> to vector<2x24xf32>
    %473 = arith.negf %472 : vector<2x24xf32>
    %474 = math.exp %473 : vector<2x24xf32>
    %cst_168 = arith.constant 1.000000e+00 : f32
    %475 = vector.broadcast %cst_168 : f32 to vector<2x24xf32>
    %476 = arith.addf %475, %474 : vector<2x24xf32>
    %477 = arith.divf %475, %476 : vector<2x24xf32>
    %478 = vector.extract_strided_slice %465 {offsets = [0, 48], sizes = [2, 24], strides = [1, 1]} : vector<2x96xf32> to vector<2x24xf32>
    %479 = math.tanh %478 : vector<2x24xf32>
    %480 = vector.extract_strided_slice %465 {offsets = [0, 72], sizes = [2, 24], strides = [1, 1]} : vector<2x96xf32> to vector<2x24xf32>
    %481 = arith.negf %480 : vector<2x24xf32>
    %482 = math.exp %481 : vector<2x24xf32>
    %cst_169 = arith.constant 1.000000e+00 : f32
    %483 = vector.broadcast %cst_169 : f32 to vector<2x24xf32>
    %484 = arith.addf %483, %482 : vector<2x24xf32>
    %485 = arith.divf %483, %484 : vector<2x24xf32>
    %486 = arith.mulf %477, %415 : vector<2x24xf32>
    %487 = arith.mulf %471, %479 : vector<2x24xf32>
    %488 = arith.addf %486, %487 : vector<2x24xf32>
    %489 = math.tanh %488 : vector<2x24xf32>
    %490 = arith.mulf %485, %489 : vector<2x24xf32>
    %491 = tpu.concatenate %415, %488 in 1 : vector<2x24xf32>, vector<2x24xf32> -> vector<2x48xf32>
    %c0_170 = arith.constant 0 : index
    %c0_171 = arith.constant 0 : index
    %492 = vector.load %arg2[%c0_170, %c0_171] : memref<49x32xf32, #tpu.memory_space<vmem>>, vector<48x32xf32>
    %cst_172 = arith.constant dense<0.000000e+00> : vector<2x32xf32>
    %493 = tpu.matmul %491, %492, %cst_172 {dimension_numbers = #tpu.dot_dimension_numbers<[1], [0], [0], [1], [0, 0, 1, 1], [], []>} : vector<2x48xf32>, vector<48x32xf32>, vector<2x32xf32> -> vector<2x32xf32>
    %494 = arith.addf %493, %9 : vector<2x32xf32>
    %cst_173 = arith.constant 0.000000e+00 : f32
    %495 = vector.broadcast %cst_173 : f32 to vector<2x32xf32>
    %496 = arith.maximumf %494, %495 : vector<2x32xf32>
    %c0_174 = arith.constant 0 : index
    %c0_175 = arith.constant 0 : index
    %497 = vector.load %arg3[%c0_174, %c0_175] : memref<33x48xf32, #tpu.memory_space<vmem>>, vector<32x48xf32>
    %cst_176 = arith.constant dense<0.000000e+00> : vector<2x48xf32>
    %498 = tpu.matmul %496, %497, %cst_176 {dimension_numbers = #tpu.dot_dimension_numbers<[1], [0], [0], [1], [0, 0, 1, 1], [], []>} : vector<2x32xf32>, vector<32x48xf32>, vector<2x48xf32> -> vector<2x48xf32>
    %499 = arith.addf %498, %12 : vector<2x48xf32>
    %cst_177 = arith.constant dense<0xFF800000> : vector<2xf32>
    %500 = vector.multi_reduction <maximumf>, %499, %cst_177 [1] : vector<2x48xf32> to vector<2xf32>
    %501 = vector.shape_cast %500 : vector<2xf32> to vector<2x1xf32>
    %502 = vector.broadcast %501 : vector<2x1xf32> to vector<2x48xf32>
    %503 = arith.subf %499, %502 : vector<2x48xf32>
    %504 = math.exp %503 : vector<2x48xf32>
    %cst_178 = arith.constant dense<0.000000e+00> : vector<2xf32>
    %505 = vector.multi_reduction <add>, %504, %cst_178 [1] : vector<2x48xf32> to vector<2xf32>
    %506 = vector.shape_cast %505 : vector<2xf32> to vector<2x1xf32>
    %507 = tpu.reciprocal %506 {approx = true} : vector<2x1xf32> -> vector<2x1xf32>
    %508 = vector.broadcast %507 : vector<2x1xf32> to vector<2x48xf32>
    %509 = arith.mulf %504, %508 : vector<2x48xf32>
    %510 = arith.mulf %509, %491 : vector<2x48xf32>
    %511 = tpu.concatenate %510, %459 in 1 : vector<2x48xf32>, vector<2x8xf32> -> vector<2x56xf32>
    %c0_179 = arith.constant 0 : index
    %c0_180 = arith.constant 0 : index
    %512 = vector.load %arg4[%c0_179, %c0_180] : memref<57x96xf32, #tpu.memory_space<vmem>>, vector<56x96xf32>
    %cst_181 = arith.constant dense<0.000000e+00> : vector<2x96xf32>
    %513 = tpu.matmul %511, %512, %cst_181 {dimension_numbers = #tpu.dot_dimension_numbers<[1], [0], [0], [1], [0, 0, 1, 1], [], []>} : vector<2x56xf32>, vector<56x96xf32>, vector<2x96xf32> -> vector<2x96xf32>
    %514 = arith.addf %513, %15 : vector<2x96xf32>
    %cst_182 = arith.constant 0.000000e+00 : f32
    %515 = vector.broadcast %cst_182 : f32 to vector<2x96xf32>
    %516 = arith.maximumf %514, %515 : vector<2x96xf32>
    %c0_183 = arith.constant 0 : index
    %c0_184 = arith.constant 0 : index
    %517 = vector.load %arg5[%c0_183, %c0_184] : memref<97x24xf32, #tpu.memory_space<vmem>>, vector<96x24xf32>
    %cst_185 = arith.constant dense<0.000000e+00> : vector<2x24xf32>
    %518 = tpu.matmul %516, %517, %cst_185 {dimension_numbers = #tpu.dot_dimension_numbers<[1], [0], [0], [1], [0, 0, 1, 1], [], []>} : vector<2x96xf32>, vector<96x24xf32>, vector<2x24xf32> -> vector<2x24xf32>
    %519 = arith.addf %518, %18 : vector<2x24xf32>
    %520 = vector.extract_strided_slice %519 {offsets = [0, 0], sizes = [2, 8], strides = [1, 1]} : vector<2x24xf32> to vector<2x8xf32>
    %521 = math.tanh %520 : vector<2x8xf32>
    %522 = vector.extract_strided_slice %519 {offsets = [0, 8], sizes = [2, 16], strides = [1, 1]} : vector<2x24xf32> to vector<2x16xf32>
    %523 = arith.negf %522 : vector<2x16xf32>
    %524 = math.exp %523 : vector<2x16xf32>
    %cst_186 = arith.constant 1.000000e+00 : f32
    %525 = vector.broadcast %cst_186 : f32 to vector<2x16xf32>
    %526 = arith.addf %525, %524 : vector<2x16xf32>
    %527 = arith.divf %525, %526 : vector<2x16xf32>
    %528 = vector.extract_strided_slice %527 {offsets = [0, 0], sizes = [2, 8], strides = [1, 1]} : vector<2x16xf32> to vector<2x8xf32>
    %529 = arith.mulf %528, %459 : vector<2x8xf32>
    %530 = vector.extract_strided_slice %527 {offsets = [0, 8], sizes = [2, 8], strides = [1, 1]} : vector<2x16xf32> to vector<2x8xf32>
    %531 = arith.mulf %530, %521 : vector<2x8xf32>
    %532 = arith.addf %529, %531 : vector<2x8xf32>
    %c7_i32 = arith.constant 7 : i32
    %c2_i32_187 = arith.constant 2 : i32
    %533 = arith.muli %c7_i32, %c2_i32_187 : i32
    %534 = arith.index_cast %533 : i32 to index
    %c0_188 = arith.constant 0 : index
    %535 = vector.load %arg9[%534, %c0_188] : memref<16x96xf32, #tpu.memory_space<vmem>>, vector<2x96xf32>
    %c16_189 = arith.constant 16 : index
    %c0_190 = arith.constant 0 : index
    %536 = vector.load %arg1[%c16_189, %c0_190] : memref<41x96xf32, #tpu.memory_space<vmem>>, vector<24x96xf32>
    %cst_191 = arith.constant dense<0.000000e+00> : vector<2x96xf32>
    %537 = tpu.matmul %490, %536, %cst_191 {dimension_numbers = #tpu.dot_dimension_numbers<[1], [0], [0], [1], [0, 0, 1, 1], [], []>} : vector<2x24xf32>, vector<24x96xf32>, vector<2x96xf32> -> vector<2x96xf32>
    %538 = arith.addf %535, %537 : vector<2x96xf32>
    %539 = vector.extract_strided_slice %538 {offsets = [0, 0], sizes = [2, 24], strides = [1, 1]} : vector<2x96xf32> to vector<2x24xf32>
    %540 = arith.negf %539 : vector<2x24xf32>
    %541 = math.exp %540 : vector<2x24xf32>
    %cst_192 = arith.constant 1.000000e+00 : f32
    %542 = vector.broadcast %cst_192 : f32 to vector<2x24xf32>
    %543 = arith.addf %542, %541 : vector<2x24xf32>
    %544 = arith.divf %542, %543 : vector<2x24xf32>
    %545 = vector.extract_strided_slice %538 {offsets = [0, 24], sizes = [2, 24], strides = [1, 1]} : vector<2x96xf32> to vector<2x24xf32>
    %546 = arith.negf %545 : vector<2x24xf32>
    %547 = math.exp %546 : vector<2x24xf32>
    %cst_193 = arith.constant 1.000000e+00 : f32
    %548 = vector.broadcast %cst_193 : f32 to vector<2x24xf32>
    %549 = arith.addf %548, %547 : vector<2x24xf32>
    %550 = arith.divf %548, %549 : vector<2x24xf32>
    %551 = vector.extract_strided_slice %538 {offsets = [0, 48], sizes = [2, 24], strides = [1, 1]} : vector<2x96xf32> to vector<2x24xf32>
    %552 = math.tanh %551 : vector<2x24xf32>
    %553 = vector.extract_strided_slice %538 {offsets = [0, 72], sizes = [2, 24], strides = [1, 1]} : vector<2x96xf32> to vector<2x24xf32>
    %554 = arith.negf %553 : vector<2x24xf32>
    %555 = math.exp %554 : vector<2x24xf32>
    %cst_194 = arith.constant 1.000000e+00 : f32
    %556 = vector.broadcast %cst_194 : f32 to vector<2x24xf32>
    %557 = arith.addf %556, %555 : vector<2x24xf32>
    %558 = arith.divf %556, %557 : vector<2x24xf32>
    %559 = arith.mulf %550, %488 : vector<2x24xf32>
    %560 = arith.mulf %544, %552 : vector<2x24xf32>
    %561 = arith.addf %559, %560 : vector<2x24xf32>
    %562 = math.tanh %561 : vector<2x24xf32>
    %563 = arith.mulf %558, %562 : vector<2x24xf32>
    %564 = tpu.concatenate %488, %561 in 1 : vector<2x24xf32>, vector<2x24xf32> -> vector<2x48xf32>
    %c0_195 = arith.constant 0 : index
    %c0_196 = arith.constant 0 : index
    %565 = vector.load %arg2[%c0_195, %c0_196] : memref<49x32xf32, #tpu.memory_space<vmem>>, vector<48x32xf32>
    %cst_197 = arith.constant dense<0.000000e+00> : vector<2x32xf32>
    %566 = tpu.matmul %564, %565, %cst_197 {dimension_numbers = #tpu.dot_dimension_numbers<[1], [0], [0], [1], [0, 0, 1, 1], [], []>} : vector<2x48xf32>, vector<48x32xf32>, vector<2x32xf32> -> vector<2x32xf32>
    %567 = arith.addf %566, %9 : vector<2x32xf32>
    %cst_198 = arith.constant 0.000000e+00 : f32
    %568 = vector.broadcast %cst_198 : f32 to vector<2x32xf32>
    %569 = arith.maximumf %567, %568 : vector<2x32xf32>
    %c0_199 = arith.constant 0 : index
    %c0_200 = arith.constant 0 : index
    %570 = vector.load %arg3[%c0_199, %c0_200] : memref<33x48xf32, #tpu.memory_space<vmem>>, vector<32x48xf32>
    %cst_201 = arith.constant dense<0.000000e+00> : vector<2x48xf32>
    %571 = tpu.matmul %569, %570, %cst_201 {dimension_numbers = #tpu.dot_dimension_numbers<[1], [0], [0], [1], [0, 0, 1, 1], [], []>} : vector<2x32xf32>, vector<32x48xf32>, vector<2x48xf32> -> vector<2x48xf32>
    %572 = arith.addf %571, %12 : vector<2x48xf32>
    %cst_202 = arith.constant dense<0xFF800000> : vector<2xf32>
    %573 = vector.multi_reduction <maximumf>, %572, %cst_202 [1] : vector<2x48xf32> to vector<2xf32>
    %574 = vector.shape_cast %573 : vector<2xf32> to vector<2x1xf32>
    %575 = vector.broadcast %574 : vector<2x1xf32> to vector<2x48xf32>
    %576 = arith.subf %572, %575 : vector<2x48xf32>
    %577 = math.exp %576 : vector<2x48xf32>
    %cst_203 = arith.constant dense<0.000000e+00> : vector<2xf32>
    %578 = vector.multi_reduction <add>, %577, %cst_203 [1] : vector<2x48xf32> to vector<2xf32>
    %579 = vector.shape_cast %578 : vector<2xf32> to vector<2x1xf32>
    %580 = tpu.reciprocal %579 {approx = true} : vector<2x1xf32> -> vector<2x1xf32>
    %581 = vector.broadcast %580 : vector<2x1xf32> to vector<2x48xf32>
    %582 = arith.mulf %577, %581 : vector<2x48xf32>
    %583 = arith.mulf %582, %564 : vector<2x48xf32>
    %584 = tpu.concatenate %583, %532 in 1 : vector<2x48xf32>, vector<2x8xf32> -> vector<2x56xf32>
    %c0_204 = arith.constant 0 : index
    %c0_205 = arith.constant 0 : index
    %585 = vector.load %arg4[%c0_204, %c0_205] : memref<57x96xf32, #tpu.memory_space<vmem>>, vector<56x96xf32>
    %cst_206 = arith.constant dense<0.000000e+00> : vector<2x96xf32>
    %586 = tpu.matmul %584, %585, %cst_206 {dimension_numbers = #tpu.dot_dimension_numbers<[1], [0], [0], [1], [0, 0, 1, 1], [], []>} : vector<2x56xf32>, vector<56x96xf32>, vector<2x96xf32> -> vector<2x96xf32>
    %587 = arith.addf %586, %15 : vector<2x96xf32>
    %cst_207 = arith.constant 0.000000e+00 : f32
    %588 = vector.broadcast %cst_207 : f32 to vector<2x96xf32>
    %589 = arith.maximumf %587, %588 : vector<2x96xf32>
    %c0_208 = arith.constant 0 : index
    %c0_209 = arith.constant 0 : index
    %590 = vector.load %arg5[%c0_208, %c0_209] : memref<97x24xf32, #tpu.memory_space<vmem>>, vector<96x24xf32>
    %cst_210 = arith.constant dense<0.000000e+00> : vector<2x24xf32>
    %591 = tpu.matmul %589, %590, %cst_210 {dimension_numbers = #tpu.dot_dimension_numbers<[1], [0], [0], [1], [0, 0, 1, 1], [], []>} : vector<2x96xf32>, vector<96x24xf32>, vector<2x24xf32> -> vector<2x24xf32>
    %592 = arith.addf %591, %18 : vector<2x24xf32>
    %593 = vector.extract_strided_slice %592 {offsets = [0, 0], sizes = [2, 8], strides = [1, 1]} : vector<2x24xf32> to vector<2x8xf32>
    %594 = math.tanh %593 : vector<2x8xf32>
    %595 = vector.extract_strided_slice %592 {offsets = [0, 8], sizes = [2, 16], strides = [1, 1]} : vector<2x24xf32> to vector<2x16xf32>
    %596 = arith.negf %595 : vector<2x16xf32>
    %597 = math.exp %596 : vector<2x16xf32>
    %cst_211 = arith.constant 1.000000e+00 : f32
    %598 = vector.broadcast %cst_211 : f32 to vector<2x16xf32>
    %599 = arith.addf %598, %597 : vector<2x16xf32>
    %600 = arith.divf %598, %599 : vector<2x16xf32>
    %601 = vector.extract_strided_slice %600 {offsets = [0, 0], sizes = [2, 8], strides = [1, 1]} : vector<2x16xf32> to vector<2x8xf32>
    %602 = arith.mulf %601, %532 : vector<2x8xf32>
    %603 = vector.extract_strided_slice %600 {offsets = [0, 8], sizes = [2, 8], strides = [1, 1]} : vector<2x16xf32> to vector<2x8xf32>
    %604 = arith.mulf %603, %594 : vector<2x8xf32>
    %605 = arith.addf %602, %604 : vector<2x8xf32>
    %c8_i32 = arith.constant 8 : i32
    %606 = tpu.concatenate %563, %605 in 1 : vector<2x24xf32>, vector<2x8xf32> -> vector<2x32xf32>
    %c0_212 = arith.constant 0 : index
    %c0_213 = arith.constant 0 : index
    %607 = vector.load %arg6[%c0_212, %c0_213] : memref<33x32xf32, #tpu.memory_space<vmem>>, vector<32x32xf32>
    %cst_214 = arith.constant dense<0.000000e+00> : vector<2x32xf32>
    %608 = tpu.matmul %606, %607, %cst_214 {dimension_numbers = #tpu.dot_dimension_numbers<[1], [0], [0], [1], [0, 0, 1, 1], [], []>} : vector<2x32xf32>, vector<32x32xf32>, vector<2x32xf32> -> vector<2x32xf32>
    %c32_215 = arith.constant 32 : index
    %c0_216 = arith.constant 0 : index
    %609 = vector.load %arg6[%c32_215, %c0_216] : memref<33x32xf32, #tpu.memory_space<vmem>>, vector<1x32xf32>
    %610 = vector.broadcast %609 : vector<1x32xf32> to vector<2x32xf32>
    %611 = arith.addf %608, %610 : vector<2x32xf32>
    %cst_217 = arith.constant 0.000000e+00 : f32
    %612 = vector.broadcast %cst_217 : f32 to vector<2x32xf32>
    %613 = arith.maximumf %611, %612 : vector<2x32xf32>
    %c0_218 = arith.constant 0 : index
    %c0_219 = arith.constant 0 : index
    %614 = vector.load %arg7[%c0_218, %c0_219] : memref<33x1xf32, #tpu.memory_space<vmem>>, vector<32x1xf32>
    %cst_220 = arith.constant dense<0.000000e+00> : vector<2x1xf32>
    %615 = tpu.matmul %613, %614, %cst_220 {dimension_numbers = #tpu.dot_dimension_numbers<[1], [0], [0], [1], [0, 0, 1, 1], [], []>} : vector<2x32xf32>, vector<32x1xf32>, vector<2x1xf32> -> vector<2x1xf32>
    %c32_221 = arith.constant 32 : index
    %c0_222 = arith.constant 0 : index
    %616 = vector.load %arg7[%c32_221, %c0_222] : memref<33x1xf32, #tpu.memory_space<vmem>>, vector<1x1xf32>
    %617 = vector.broadcast %616 : vector<1x1xf32> to vector<2x1xf32>
    %618 = arith.addf %615, %617 : vector<2x1xf32>
    %c0_223 = arith.constant 0 : index
    %c0_224 = arith.constant 0 : index
    %619 = vector.load %arg8[%c0_223, %c0_224] : memref<2x1xf32, #tpu.memory_space<vmem>>, vector<2x1xf32>
    tpu.vector_store %arg8[%c0_223, %c0_224], %618 {strides = array<i32>} : memref<2x1xf32, #tpu.memory_space<vmem>>, vector<2x1xf32>,
    return
  }
}

</mosaic_0001>

<bundles_post_ra>
// kernel: tpu_custom_call.1
= control target key start
LH: loop header
LB: loop body
LE: loop exit
PB: predicated region body
PF: predicated region fallthrough
CT: control target
= control target key end

     0   :  { %vm42_vm0 = vcmask 1043456   ;;  %vm35_vm1 = vcmask 97280   ;;  %v2125_v6 = vmov 0.0   ;;  %vm69_vm2 = vcmask 785408   ;;  %s2126_s19 = smov 80   ;;  %s2127_s28 = smov 24   ;;  %s3137_s1 = inlined_call_operand.vmem [shape: f32[41,96], index: 1, kind: input, shape index: {}]   ;;  %s3138_s0 = inlined_call_operand.vmem [shape: f32[16,12], index: 0, kind: input, shape index: {}]   ;;  %s3139_s2 = inlined_call_operand.vmem [shape: f32[49,32], index: 2, kind: input, shape index: {}]   ;;  %s3140_s3 = inlined_call_operand.vmem [shape: f32[33,48], index: 3, kind: input, shape index: {}]   ;;  %s3141_s4 = inlined_call_operand.vmem [shape: f32[57,96], index: 4, kind: input, shape index: {}]   ;;  %s3142_s5 = inlined_call_operand.vmem [shape: f32[97,24], index: 5, kind: input, shape index: {}]   ;;  %s3143_s6 = inlined_call_operand.vmem [shape: f32[33,32], index: 6, kind: input, shape index: {}]   ;;  %s3144_s7 = inlined_call_operand.vmem [shape: f32[33,1], index: 7, kind: input, shape index: {}]   ;;  %s3145_s8 = inlined_call_operand.vmem [shape: f32[2,1], index: 8, kind: output, shape index: {}]  }
   0x1   :  { %v32_v0 = vld [vmem:[%s3137_s1 + $0x8] sm:$0xf]  ;;  %v31_v1 = vld [vmem:[%s3137_s1] sm:$0xff]  ;;  %v2196_v4 = vld [vmem:[%s3137_s1 + $0x18] sm:$0xff]  ;;  %vm84_vm7 = vcmask 195584   ;;  %vm153_vm8 = vcmask 392192  }
   0x2   :  { %1869 = vmatpush.msk.msra.mxu0 %vm42_vm0, %v32_v0  ;;  %v29_v2 = vld [vmem:[%s3138_s0] sm:$0xff]  ;;  %v2202_v5 = vld [vmem:[%s3137_s1 + $0x10] sm:$0xff]  ;;  %v2210_v7 = vld [vmem:[%s3137_s1 + $0x28] ss:$0 sm:$0xff]  ;;  %s2128_s11 = smov 48   ;;  %s2129_s21 = smov 56  }
   0x3   :  { %v2191_v3 = vld [vmem:[%s3137_s1 + $0x20] sm:$0xff]  ;;  %v2218_v17 = vld [vmem:[%s3139_s2 + $0x28] sm:$0xff]  ;;  %v2229_v19 = vld [vmem:[%s3139_s2 + $0x18] sm:$0xff]  ;;  %vm182_vm9 = vcmask 261120   ;;  %vm206_vm10 = vcmask 386048   ;;  %s2130_s9 = smov 104  }
   0x4   :  { %101 = vmatpush.msra.mxu1 %v2191_v3  ;;  %61 = vmatpush.msra.mxu0 %v31_v1  ;;  %v2223_v18 = vld [vmem:[%s3139_s2 + $0x20] sm:$0xff]  ;;  %v2235_v20 = vld [vmem:[%s3139_s2 + $0x10] sm:$0xff]  ;;  %v2243_v33 = vld [vmem:[%s3139_s2 + $0x8] sm:$0xff]  ;;  %vm227_vm15 = vcmask 457728   ;;  %s2131_s15 = smov 16   ;;  %s2132_s16 = smov 120  }
   0x5   :  { %1870 = vmatmul.msk.f32.vlgmr.msra.gmra.mxu0 %vm35_vm1, %v29_v2  ;;  %167 = vmatpush.msra.mxu2 %v2218_v17  ;;  %v2249_v34 = vld [vmem:[%s3139_s2] sm:$0xff]  ;;  %v2271_v40 = vld [vmem:[%s3140_s3 + $0x18] sm:$0xff]  ;;  %v2277_v41 = vld [vmem:[%s3140_s3 + $0x10] sm:$0xff]  ;;  %s2133_s17 = smov 40  }
   0x6   :  { %102 = vmatpush.msra.mxu1 %v2196_v4  ;;  %198 = vmatpush.msra.mxu3 %v2271_v40  ;;  %v2283_v42 = vld [vmem:[%s3140_s3 + $0x8] sm:$0xff]  ;;  %v2289_v43 = vld [vmem:[%s3140_s3] sm:$0xff]  ;;  %v2299_v46 = vld [vmem:[%s3139_s2 + $0x30] ss:$0 sm:$0xff] }
   0x7   :  { %168 = vmatpush.msra.mxu2 %v2223_v18  ;;  %v2314_v51 = vld [vmem:[%s3140_s3 + $0x20] ss:$0 sm:$0xff] }
   0x8   :  { %103 = vmatpush.msra.mxu1 %v2202_v5  ;;  %199 = vmatpush.msra.mxu3 %v2277_v41 }
   0x9   :  { %104 = vmatmul.f32.vlgmr.msra.gmra.mxu1 %v2125_v6  ;;  %169 = vmatpush.msra.mxu2 %v2229_v19 }
   0xa   :  { %200 = vmatpush.msra.mxu3 %v2283_v42 }
   0xb   :  { %170 = vmatpush.msra.mxu2 %v2235_v20 }
   0xc   :  { %201 = vmatpush.msra.mxu3 %v2289_v43 }
   0xd   :  { %171 = vmatpush.msra.mxu2 %v2243_v33 }
   0xe   :  { %337 = vmatpush.msrb.mxu3 %v2191_v3 }
   0xf   :  { %172 = vmatpush.msra.mxu2 %v2249_v34 }
  0x10   :  { %338 = vmatpush.msrb.mxu3 %v2196_v4 }
  0x11   :  { %400 = vmatpush.msrb.mxu2 %v2218_v17 }
  0x12   :  { %339 = vmatpush.msrb.mxu3 %v2202_v5 }
  0x13   :  { %401 = vmatpush.msrb.mxu2 %v2223_v18 }
  0x15   :  { %402 = vmatpush.msrb.mxu2 %v2229_v19 }
  0x17   :  { %403 = vmatpush.msrb.mxu2 %v2235_v20 }
  0x19   :  { %404 = vmatpush.msrb.mxu2 %v2243_v33 }
  0x1b   :  { %405 = vmatpush.msrb.mxu2 %v2249_v34 }
  0x82   :  { %v63_v8 = vpop.f32.mrf.mxu0 }
  0x83   :  { %v64_v9 = vadd.f32 %v2210_v7, %v63_v8  ;;  %v2323_v8 = vld [vmem:[%s3141_s4 + $0x30] sm:$0xff] }
  0x84   :  { %240 = vmatpush.msrb.mxu0 %v2323_v8 }
  0x85   :  { %70 = vst.msk [vmem:[#allocation2] sm:$0xff] %vm69_vm2, %v64_v9  ;;  %v2328_v9 = vld [vmem:[%s3141_s4 + $0x28] sm:$0xff] }
  0x86   :  { %v105_v10 = vpop.f32.mrf.mxu1  ;;  %241 = vmatpush.msrb.mxu0 %v2328_v9 }
  0x8c   :  { %v80_v11 = vld [vmem:[#allocation2] sm:$0x3]  ;;  %v318_v55 = vld [vmem:[#allocation2 + $0x2] sm:$0x3] }
  0x8d   :  { %v108_v12 = vadd.f32 %v105_v10, %v80_v11 }
  0x8f   :  { %1945 = vtanh.f32 %v108_v12  ;;  %v1872_v14 = vmul.f32 -1.442695, %v108_v12 }
  0x91   :  { %1947 = vpow2.f32 %v1872_v14 }
  0x95   :  { %v1946_v13 = vpop.eup %1945 }
  0x96   :  { %131 = vrot.lane.b32.xlu0 %v1946_v13, %s2126_s19 }
  0x97   :  { %v1948_v15 = vpop.eup %1947 }
  0x98   :  { %v112_v16 = vadd.f32 1.0, %v1948_v15 }
  0x9a   :  { %1949 = vrcp.f32 %v112_v16  ;;  %v124_v26 = vand.u32 2147483648, %v112_v16  ;;  %vm118_vm4 = vweird.f32 %v112_v16  ;;  %v122_v27 = vand.u32 2147483647, %v112_v16 }
  0x9c   :  { %v125_v29 = vor.u32 1.1754944e-38, %v124_v26  ;;  %vm123_vm6 = vcmp.eq.f32.partialorder %v122_v27, 8.507059e+37  ;;  %v2346_v26 = vld [vmem:[%s3141_s4 + $0x18] sm:$0xff]  ;;  %v30_v27 = vld [vmem:[%s3138_s0 + $0x8] sm:$0xff] }
  0x9d   :  { %1871 = vmatmul.msk.f32.gmra.mxu0 %vm35_vm1, %v30_v27 }
  0xa0   :  { %v1950_v21 = vpop.eup %1949 }
  0xa1   :  { %v114_v22 = vmul.f32 %v1950_v21, %v112_v16  ;;  %vm119_vm3 = vweird.f32 %v1950_v21 }
  0xa2   :  { %vm120_vm5 = vmor %vm118_vm4, %vm119_vm3 }
  0xa3   :  { %v115_v23 = vsub.f32 1.0, %v114_v22 }
  0xa5   :  { %v116_v24 = vmul.f32 %v1950_v21, %v115_v23 }
  0xa7   :  { %v117_v25 = vadd.f32 %v1950_v21, %v116_v24 }
  0xa9   :  { %v121_v28 = vsel %vm120_vm5, %v1950_v21, %v117_v25  ;;  %v2341_v25 = vld [vmem:[%s3141_s4 + $0x20] sm:$0xff] }
  0xaa   :  { %v126_v31 = vsel %vm123_vm6, %v125_v29, %v121_v28  ;;  %242 = vmatpush.msrb.mxu0 %v2341_v25  ;;  %v2356_v28 = vld [vmem:[%s3141_s4 + $0x10] sm:$0xff]  ;;  %v2362_v29 = vld [vmem:[%s3141_s4 + $0x8] sm:$0xff] }
  0xab   :  { %v129_v35 = vmul.f32 0.0, %v126_v31 }
  0xac   :  { %243 = vmatpush.msrb.mxu0 %v2346_v26 }
  0xae   :  { %244 = vmatpush.msrb.mxu0 %v2356_v28 }
  0xb0   :  { %245 = vmatpush.msrb.mxu0 %v2362_v29 }
 0x108   :  { %v132_v30 = vpop.permute.xlu0 %131 }
 0x109   :  { %v134_v32 = vmul.f32 %v132_v30, %v126_v31  ;;  %v2368_v30 = vld [vmem:[%s3141_s4] sm:$0xff] }
 0x10a   :  { %246 = vmatpush.msrb.mxu0 %v2368_v30 }
 0x10b   :  { %136 = vrot.lane.b32.xlu0 %v134_v32, %s2127_s28 }
 0x10c   :  { %463 = vmatpush.msra.mxu0 %v2323_v8 }
 0x10e   :  { %464 = vmatpush.msra.mxu0 %v2328_v9 }
 0x110   :  { %465 = vmatpush.msra.mxu0 %v2341_v25 }
 0x112   :  { %466 = vmatpush.msra.mxu0 %v2346_v26 }
 0x114   :  { %467 = vmatpush.msra.mxu0 %v2356_v28 }
 0x116   :  { %468 = vmatpush.msra.mxu0 %v2362_v29 }
 0x118   :  { %469 = vmatpush.msra.mxu0 %v2368_v30 }
 0x17d   :  { %v137_v36 = vpop.permute.xlu0 %136 }
 0x17e   :  { %v2258_v37 = vadd.f32 %v137_v36, %v129_v35 }
 0x180   :  { %v2262_v38 = vsel %vm84_vm7, 0.0, %v2258_v37  ;;  %1951 = vtanh.f32 %v2258_v37 }
 0x181   :  { %1873 = vmatmul.msk.f32.vlgmr.msra.gmra.mxu2 %vm153_vm8, %v2262_v38 }
 0x186   :  { %v1952_v39 = vpop.eup %1951 }
 0x187   :  { %142 = vrot.lane.b32.xlu1 %v1952_v39, %s2128_s11 }
 0x1f9   :  { %v143_v44 = vpop.permute.xlu1 %142 }
 0x1fa   :  { %v145_v45 = vmul.f32 %v143_v44, %v126_v31  ;;  %v2397_v44 = vld [vmem:[%s3142_s5 + $0x50] sm:$0xff] }
 0x1fc   :  { %320 = vrot.lane.b32.xlu1 %v145_v45, %s2129_s21  ;;  %v2404_v45 = vld [vmem:[%s3142_s5 + $0x48] sm:$0xff] }
 0x204   :  { %v174_v47 = vpop.f32.mrf.mxu2 }
 0x205   :  { %v175_v48 = vadd.f32 %v2299_v46, %v174_v47  ;;  %v2411_v47 = vld [vmem:[%s3142_s5 + $0x40] sm:$0xff] }
 0x207   :  { %v177_v49 = vmax.f32 %v175_v48, 0.0  ;;  %v2418_v48 = vld [vmem:[%s3142_s5 + $0x38] sm:$0xff] }
 0x209   :  { %1874 = vmatmul.msk.f32.vlgmr.msra.gmra.mxu3 %vm182_vm9, %v177_v49  ;;  %v2427_v49 = vld [vmem:[%s3142_s5 + $0x30] sm:$0xff] }
 0x20a   :  { %426 = vmatpush.msra.mxu3 %v2271_v40 }
 0x20c   :  { %427 = vmatpush.msra.mxu3 %v2277_v41 }
 0x20e   :  { %428 = vmatpush.msra.mxu3 %v2283_v42 }
 0x210   :  { %429 = vmatpush.msra.mxu3 %v2289_v43 }
 0x26e   :  { %v321_v50 = vpop.permute.xlu1 %320 }
 0x26f   :  { %1878 = vmatmul.msk.f32.vlgmr.msrb.gmra.mxu3 %vm84_vm7, %v321_v50  ;;  %v2432_v50 = vld [vmem:[%s3142_s5 + $0x28] sm:$0xff] }
 0x270   :  { %548 = vmatpush.msrb.mxu3 %v2191_v3 }
 0x272   :  { %549 = vmatpush.msrb.mxu3 %v2196_v4 }
 0x274   :  { %550 = vmatpush.msrb.mxu3 %v2202_v5 }
 0x28c   :  { %v203_v52 = vpop.f32.mrf.mxu3 }
 0x28d   :  { %v204_v53 = vadd.f32 %v2314_v51, %v203_v52  ;;  %v2439_v52 = vld [vmem:[%s3142_s5 + $0x20] sm:$0xff] }
 0x28f   :  { %v207_v54 = vsel %vm206_vm10, %v204_v53, -inf }
 0x290   :  { %208 = vmax.xlane.f32.xlu2 %v207_v54  ;;  %v2448_v54 = vld [vmem:[%s3142_s5 + $0x18] sm:$0xff] }
 0x2f2   :  { %v341_v56 = vpop.f32.mrf.mxu3 }
 0x2f3   :  { %v344_v57 = vadd.f32 %v341_v56, %v318_v55 }
 0x2f5   :  { %1953 = vtanh.f32 %v344_v57  ;;  %v1879_v0 = vmul.f32 -1.442695, %v344_v57 }
 0x2fb   :  { %v1954_v58 = vpop.eup %1953 }
 0x2fc   :  { %367 = vrot.lane.b32.xlu2 %v1954_v58, %s2126_s19 }
 0x303   :  { %v209_v59 = vpop.xlane.xlu2 %208 }
 0x304   :  { %v210_v60 = vsub.f32 %v204_v53, %v209_v59  ;;  %v66_v59 = vpop.f32.mrf.mxu0 }
 0x306   :  { %v211_v61 = vmul.f32 1.442695, %v210_v60  ;;  %v67_v60 = vadd.f32 %v2210_v7, %v66_v59  ;;  %v2483_v7 = vld [vmem:[%s3142_s5] sm:$0xff] }
 0x308   :  { %1955 = vpow2.f32 %v211_v61  ;;  %71 = vst.msk [vmem:[#allocation2 + $0x8] sm:$0xff] %vm69_vm2, %v67_v60  ;;  %v2469_v61 = vld [vmem:[%s3142_s5 + $0x10] sm:$0xff] }
 0x309   :  { %1957 = vpow2.f32 %v1879_v0 }
 0x30e   :  { %v1956_v62 = vpop.eup %1955 }
 0x30f   :  { %v213_v63 = vsel %vm206_vm10, %v1956_v62, 0.0  ;;  %v1958_v1 = vpop.eup %1957 }
 0x310   :  { %214 = vadd.xlane.f32.xlu0 %v213_v63  ;;  %v348_v2 = vadd.f32 1.0, %v1958_v1  ;;  %v2508_v63 = vld [vmem:[%s3141_s4 + $0x38] ss:$0 sm:$0xff] }
 0x312   :  { %1959 = vrcp.f32 %v348_v2  ;;  %v360_v14 = vand.u32 2147483648, %v348_v2  ;;  %vm354_vm12 = vweird.f32 %v348_v2  ;;  %v358_v15 = vand.u32 2147483647, %v348_v2 }
 0x314   :  { %v361_v21 = vor.u32 1.1754944e-38, %v360_v14  ;;  %vm359_vm14 = vcmp.eq.f32.partialorder %v358_v15, 8.507059e+37  ;;  %v2526_v14 = vld [vmem:[%s3142_s5 + $0x60] ss:$0 sm:$0xff] }
 0x318   :  { %v1960_v6 = vpop.eup %1959 }
 0x319   :  { %v350_v10 = vmul.f32 %v1960_v6, %v348_v2  ;;  %vm355_vm11 = vweird.f32 %v1960_v6 }
 0x31a   :  { %vm356_vm13 = vmor %vm354_vm12, %vm355_vm11 }
 0x31b   :  { %v351_v11 = vsub.f32 1.0, %v350_v10 }
 0x31d   :  { %v352_v12 = vmul.f32 %v1960_v6, %v351_v11 }
 0x31f   :  { %v353_v13 = vadd.f32 %v1960_v6, %v352_v12 }
 0x321   :  { %v357_v16 = vsel %vm356_vm13, %v1960_v6, %v353_v13 }
 0x322   :  { %v2332_v23 = vsel %vm359_vm14, %v361_v21, %v357_v16 }
 0x323   :  { %v365_v53 = vmul.f32 %v2332_v23, %v2258_v37 }
 0x356   :  { %v368_v22 = vpop.permute.xlu2 %367 }
 0x357   :  { %v370_v24 = vmul.f32 %v368_v22, %v2332_v23 }
 0x359   :  { %372 = vrot.lane.b32.xlu1 %v370_v24, %s2127_s28 }
 0x361   :  { %383 = vrot.lane.b32.xlu1 %v2258_v37, %s2130_s9 }
 0x383   :  { %v215_v31 = vpop.xlane.xlu0 %214 }
 0x384   :  { %1961 = vrcp.f32 %v215_v31 }
 0x38a   :  { %v1962_v32 = vpop.eup %1961 }
 0x38b   :  { %v217_v35 = vmul.f32 %v1962_v32, %v1956_v62  ;;  %v2476_v62 = vld [vmem:[%s3142_s5 + $0x8] sm:$0xff] }
 0x38d   :  { %v218_v36 = vmul.f32 %v217_v35, %v2262_v38  ;;  %v2392_v38 = vld [vmem:[%s3142_s5 + $0x58] sm:$0xff] }
 0x38e   :  { %271 = vmatpush.msrb.mxu1 %v2392_v38  ;;  %482 = vmatpush.msra.mxu2 %v2392_v38 }
 0x38f   :  { %v219_v39 = vsel %vm153_vm8, %v218_v36, 0.0 }
 0x390   :  { %1875 = vmatmul.msk.f32.vlgmr.msrb.gmra.mxu0 %vm227_vm15, %v219_v39  ;;  %272 = vmatpush.msrb.mxu1 %v2397_v44 }
 0x391   :  { %674 = vmatpush.msrb.mxu0 %v2323_v8  ;;  %483 = vmatpush.msra.mxu2 %v2397_v44 }
 0x392   :  { %273 = vmatpush.msrb.mxu1 %v2404_v45 }
 0x393   :  { %675 = vmatpush.msrb.mxu0 %v2328_v9  ;;  %484 = vmatpush.msra.mxu2 %v2404_v45 }
 0x394   :  { %274 = vmatpush.msrb.mxu1 %v2411_v47 }
 0x395   :  { %676 = vmatpush.msrb.mxu0 %v2341_v25  ;;  %485 = vmatpush.msra.mxu2 %v2411_v47 }
 0x396   :  { %275 = vmatpush.msrb.mxu1 %v2418_v48 }
 0x397   :  { %677 = vmatpush.msrb.mxu0 %v2346_v26  ;;  %486 = vmatpush.msra.mxu2 %v2418_v48 }
 0x398   :  { %276 = vmatpush.msrb.mxu1 %v2427_v49 }
 0x399   :  { %678 = vmatpush.msrb.mxu0 %v2356_v28  ;;  %487 = vmatpush.msra.mxu2 %v2427_v49 }
 0x39a   :  { %277 = vmatpush.msrb.mxu1 %v2432_v50 }
 0x39b   :  { %679 = vmatpush.msrb.mxu0 %v2362_v29  ;;  %488 = vmatpush.msra.mxu2 %v2432_v50 }
 0x39c   :  { %278 = vmatpush.msrb.mxu1 %v2439_v52 }
 0x39d   :  { %680 = vmatpush.msrb.mxu0 %v2368_v30  ;;  %489 = vmatpush.msra.mxu2 %v2439_v52 }
 0x39e   :  { %279 = vmatpush.msrb.mxu1 %v2448_v54 }
 0x39f   :  { %490 = vmatpush.msra.mxu2 %v2448_v54 }
 0x3a0   :  { %280 = vmatpush.msrb.mxu1 %v2469_v61 }
 0x3a1   :  { %491 = vmatpush.msra.mxu2 %v2469_v61 }
 0x3a2   :  { %281 = vmatpush.msrb.mxu1 %v2476_v62 }
 0x3a3   :  { %492 = vmatpush.msra.mxu2 %v2476_v62 }
 0x3a4   :  { %282 = vmatpush.msrb.mxu1 %v2483_v7 }
 0x3a5   :  { %493 = vmatpush.msra.mxu2 %v2483_v7 }
 0x3a6   :  { %611 = vmatpush.msra.mxu1 %v2218_v17 }
 0x3a8   :  { %612 = vmatpush.msra.mxu1 %v2223_v18 }
 0x3aa   :  { %613 = vmatpush.msra.mxu1 %v2229_v19 }
 0x3ac   :  { %614 = vmatpush.msra.mxu1 %v2235_v20 }
 0x3ae   :  { %615 = vmatpush.msra.mxu1 %v2243_v33 }
 0x3b0   :  { %616 = vmatpush.msra.mxu1 %v2249_v34 }
 0x3cb   :  { %v373_v55 = vpop.permute.xlu1 %372 }
 0x3cc   :  { %v2452_v56 = vadd.f32 %v373_v55, %v365_v53 }
 0x3ce   :  { %1963 = vtanh.f32 %v2452_v56 }
 0x3d3   :  { %v384_v57 = vpop.permute.xlu1 %383 }
 0x3d4   :  { %v1964_v37 = vpop.eup %1963  ;;  %v2459_v58 = vsel %vm84_vm7, %v384_v57, %v2452_v56 }
 0x3d5   :  { %1880 = vmatmul.msk.f32.vlgmr.msrb.gmra.mxu2 %vm153_vm8, %v2459_v58  ;;  %378 = vrot.lane.b32.xlu1 %v1964_v37, %s2128_s11 }
 0x3d6   :  { %904 = vmatpush.msrb.mxu2 %v2392_v38 }
 0x3d8   :  { %905 = vmatpush.msrb.mxu2 %v2397_v44 }
 0x3da   :  { %906 = vmatpush.msrb.mxu2 %v2404_v45 }
 0x3dc   :  { %907 = vmatpush.msrb.mxu2 %v2411_v47 }
 0x3de   :  { %908 = vmatpush.msrb.mxu2 %v2418_v48 }
 0x3e0   :  { %909 = vmatpush.msrb.mxu2 %v2427_v49 }
 0x3e2   :  { %910 = vmatpush.msrb.mxu2 %v2432_v50 }
 0x3e4   :  { %911 = vmatpush.msrb.mxu2 %v2439_v52 }
 0x3e6   :  { %912 = vmatpush.msrb.mxu2 %v2448_v54 }
 0x3e8   :  { %913 = vmatpush.msrb.mxu2 %v2469_v61 }
 0x3ea   :  { %914 = vmatpush.msrb.mxu2 %v2476_v62 }
 0x3ec   :  { %915 = vmatpush.msrb.mxu2 %v2483_v7 }
 0x40d   :  { %v248_v0 = vpop.f32.mrf.mxu0 }
 0x40e   :  { %v249_v1 = vadd.f32 %v2508_v63, %v248_v0 }
 0x410   :  { %v251_v2 = vmax.f32 %v249_v1, 0.0 }
 0x412   :  { %1876 = vmatmul.msk.f32.vlgmr.msrb.gmra.mxu1 %vm69_vm2, %v251_v2 }
 0x413   :  { %759 = vmatpush.msrb.mxu1 %v2191_v3 }
 0x415   :  { %760 = vmatpush.msrb.mxu1 %v2196_v4 }
 0x417   :  { %761 = vmatpush.msrb.mxu1 %v2202_v5 }
 0x447   :  { %v379_v6 = vpop.permute.xlu1 %378 }
 0x448   :  { %v381_v10 = vmul.f32 %v379_v6, %v2332_v23 }
 0x44a   :  { %531 = vrot.lane.b32.xlu2 %v381_v10, %s2129_s21  ;;  %v529_v10 = vld [vmem:[#allocation2 + $0x4] sm:$0x3] }
 0x458   :  { %v407_v11 = vpop.f32.mrf.mxu2 }
 0x459   :  { %v408_v12 = vadd.f32 %v2299_v46, %v407_v11 }
 0x45b   :  { %v410_v13 = vmax.f32 %v408_v12, 0.0 }
 0x45d   :  { %1881 = vmatmul.msk.f32.vlgmr.msra.gmra.mxu3 %vm182_vm9, %v410_v13 }
 0x45e   :  { %637 = vmatpush.msra.mxu3 %v2271_v40 }
 0x460   :  { %638 = vmatpush.msra.mxu3 %v2277_v41 }
 0x462   :  { %639 = vmatpush.msra.mxu3 %v2283_v42 }
 0x464   :  { %640 = vmatpush.msra.mxu3 %v2289_v43 }
 0x48f   :  { %v284_v15 = vpop.f32.mrf.mxu1 }
 0x490   :  { %v285_v16 = vadd.f32 %v2526_v14, %v284_v15 }
 0x492   :  { %1965 = vtanh.f32 %v285_v16  ;;  %v1877_v23 = vmul.f32 -1.442695, %v285_v16 }
 0x494   :  { %1967 = vpow2.f32 %v1877_v23 }
 0x498   :  { %v1966_v21 = vpop.eup %1965 }
 0x499   :  { %309 = vrot.lane.b32.xlu1 %v1966_v21, %s2131_s15 }
 0x49a   :  { %v1968_v32 = vpop.eup %1967 }
 0x49b   :  { %v291_v35 = vadd.f32 1.0, %v1968_v32 }
 0x49d   :  { %1969 = vrcp.f32 %v291_v35  ;;  %v303_v37 = vand.u32 2147483648, %v291_v35  ;;  %vm297_vm1 = vweird.f32 %v291_v35  ;;  %v301_v59 = vand.u32 2147483647, %v291_v35 }
 0x49f   :  { %v304_v0 = vor.u32 1.1754944e-38, %v303_v37  ;;  %vm302_vm4 = vcmp.eq.f32.partialorder %v301_v59, 8.507059e+37 }
 0x4a3   :  { %v1970_v36 = vpop.eup %1969 }
 0x4a4   :  { %v532_v22 = vpop.permute.xlu2 %531  ;;  %v293_v39 = vmul.f32 %v1970_v36, %v291_v35  ;;  %vm298_vm0 = vweird.f32 %v1970_v36 }
 0x4a5   :  { %1885 = vmatmul.msk.f32.vlgmr.msrb.gmra.mxu3 %vm84_vm7, %v532_v22  ;;  %vm299_vm3 = vmor %vm297_vm1, %vm298_vm0 }
 0x4a6   :  { %693 = vmatpush.msrb.mxu3 %v2392_v38  ;;  %v294_v53 = vsub.f32 1.0, %v293_v39 }
 0x4a8   :  { %694 = vmatpush.msrb.mxu3 %v2397_v44  ;;  %v295_v55 = vmul.f32 %v1970_v36, %v294_v53 }
 0x4aa   :  { %695 = vmatpush.msrb.mxu3 %v2404_v45  ;;  %v296_v57 = vadd.f32 %v1970_v36, %v295_v55 }
 0x4ac   :  { %696 = vmatpush.msrb.mxu3 %v2411_v47  ;;  %v300_v60 = vsel %vm299_vm3, %v1970_v36, %v296_v57 }
 0x4ad   :  { %v305_v1 = vsel %vm302_vm4, %v304_v0, %v300_v60 }
 0x4ae   :  { %697 = vmatpush.msrb.mxu3 %v2418_v48 }
 0x4b0   :  { %698 = vmatpush.msrb.mxu3 %v2427_v49 }
 0x4b2   :  { %699 = vmatpush.msrb.mxu3 %v2432_v50 }
 0x4b4   :  { %700 = vmatpush.msrb.mxu3 %v2439_v52 }
 0x4b6   :  { %701 = vmatpush.msrb.mxu3 %v2448_v54 }
 0x4b8   :  { %702 = vmatpush.msrb.mxu3 %v2469_v61 }
 0x4ba   :  { %703 = vmatpush.msrb.mxu3 %v2476_v62 }
 0x4bc   :  { %704 = vmatpush.msrb.mxu3 %v2483_v7 }
 0x4e0   :  { %v431_v24 = vpop.f32.mrf.mxu3 }
 0x4e1   :  { %v432_v27 = vadd.f32 %v2314_v51, %v431_v24 }
 0x4e3   :  { %v434_v31 = vsel %vm206_vm10, %v432_v27, -inf }
 0x4e4   :  { %435 = vmax.xlane.f32.xlu2 %v434_v31  ;;  %v307_v31 = vmul.f32 0.0, %v305_v1 }
 0x50b   :  { %v310_v2 = vpop.permute.xlu1 %309 }
 0x50c   :  { %v312_v6 = vmul.f32 %v310_v2, %v305_v1 }
 0x50e   :  { %314 = vrot.lane.b32.xlu1 %v312_v6, %s2132_s16 }
 0x528   :  { %v552_v11 = vpop.f32.mrf.mxu3 }
 0x529   :  { %v555_v12 = vadd.f32 %v552_v11, %v529_v10 }
 0x52b   :  { %1971 = vtanh.f32 %v555_v12  ;;  %v1886_v24 = vmul.f32 -1.442695, %v555_v12 }
 0x531   :  { %v1972_v13 = vpop.eup %1971 }
 0x532   :  { %578 = vrot.lane.b32.xlu1 %v1972_v13, %s2126_s19 }
 0x557   :  { %v436_v15 = vpop.xlane.xlu2 %435 }
 0x558   :  { %v437_v16 = vsub.f32 %v432_v27, %v436_v15 }
 0x55a   :  { %v438_v21 = vmul.f32 1.442695, %v437_v16 }
 0x55c   :  { %1973 = vpow2.f32 %v438_v21 }
 0x55d   :  { %1975 = vpow2.f32 %v1886_v24 }
 0x562   :  { %v1974_v22 = vpop.eup %1973 }
 0x563   :  { %v440_v23 = vsel %vm206_vm10, %v1974_v22, 0.0  ;;  %v1976_v35 = vpop.eup %1975 }
 0x564   :  { %441 = vadd.xlane.f32.xlu0 %v440_v23  ;;  %v559_v39 = vadd.f32 1.0, %v1976_v35 }
 0x566   :  { %1977 = vrcp.f32 %v559_v39  ;;  %v571_v59 = vand.u32 2147483648, %v559_v39  ;;  %vm565_vm6 = vweird.f32 %v559_v39  ;;  %v569_v60 = vand.u32 2147483647, %v559_v39 }
 0x568   :  { %v572_v1 = vor.u32 1.1754944e-38, %v571_v59  ;;  %vm570_vm12 = vcmp.eq.f32.partialorder %v569_v60, 8.507059e+37 }
 0x56c   :  { %v1978_v27 = vpop.eup %1977 }
 0x56d   :  { %v561_v53 = vmul.f32 %v1978_v27, %v559_v39  ;;  %vm566_vm5 = vweird.f32 %v1978_v27 }
 0x56e   :  { %vm567_vm11 = vmor %vm565_vm6, %vm566_vm5 }
 0x56f   :  { %v562_v55 = vsub.f32 1.0, %v561_v53 }
 0x571   :  { %v563_v57 = vmul.f32 %v1978_v27, %v562_v55 }
 0x573   :  { %v564_v37 = vadd.f32 %v1978_v27, %v563_v57 }
 0x575   :  { %v568_v0 = vsel %vm567_vm11, %v1978_v27, %v564_v37 }
 0x576   :  { %v573_v2 = vsel %vm570_vm12, %v572_v1, %v568_v0 }
 0x580   :  { %v315_v32 = vpop.permute.xlu1 %314 }
 0x581   :  { %v2548_v36 = vadd.f32 %v315_v32, %v307_v31 }
 0x583   :  { %447 = vrot.lane.b32.xlu1 %v2548_v36, %s2133_s17 }
 0x58b   :  { %594 = vrot.lane.b32.xlu1 %v2452_v56, %s2130_s9 }
 0x5a4   :  { %v579_v6 = vpop.permute.xlu1 %578 }
 0x5a5   :  { %v581_v10 = vmul.f32 %v579_v6, %v573_v2 }
 0x5a7   :  { %583 = vrot.lane.b32.xlu0 %v581_v10, %s2127_s28 }
 0x5d7   :  { %v442_v11 = vpop.xlane.xlu0 %441 }
 0x5d8   :  { %1979 = vrcp.f32 %v442_v11 }
 0x5de   :  { %v1980_v12 = vpop.eup %1979 }
 0x5df   :  { %v444_v13 = vmul.f32 %v1980_v12, %v1974_v22  ;;  %v576_v22 = vmul.f32 %v573_v2, %v2452_v56 }
 0x5e1   :  { %v445_v15 = vmul.f32 %v444_v13, %v2459_v58 }
 0x5f5   :  { %v448_v16 = vpop.permute.xlu1 %447 }
 0x5f6   :  { %v450_v21 = vsel %vm153_vm8, %v445_v15, %v448_v16 }
 0x5f7   :  { %1882 = vmatmul.msk.f32.vlgmr.msra.gmra.mxu0 %vm227_vm15, %v450_v21 }
 0x5f8   :  { %822 = vmatpush.msra.mxu0 %v2218_v17 }
 0x5fa   :  { %823 = vmatpush.msra.mxu0 %v2223_v18 }
 0x5fc   :  { %824 = vmatpush.msra.mxu0 %v2229_v19 }
 0x5fd   :  { %v595_v24 = vpop.permute.xlu1 %594 }
 0x5fe   :  { %825 = vmatpush.msra.mxu0 %v2235_v20 }
 0x600   :  { %826 = vmatpush.msra.mxu0 %v2243_v33 }
 0x602   :  { %827 = vmatpush.msra.mxu0 %v2249_v34 }
 0x619   :  { %v584_v58 = vpop.permute.xlu0 %583 }
 0x61a   :  { %v2565_v23 = vadd.f32 %v584_v58, %v576_v22  ;;  %v740_v58 = vld [vmem:[#allocation2 + $0x6] sm:$0x3] }
 0x61c   :  { %1981 = vtanh.f32 %v2565_v23  ;;  %v2570_v31 = vsel %vm84_vm7, %v595_v24, %v2565_v23 }
 0x61d   :  { %1887 = vmatmul.msk.f32.vlgmr.msra.gmra.mxu1 %vm153_vm8, %v2570_v31 }
 0x61e   :  { %885 = vmatpush.msra.mxu1 %v2323_v8 }
 0x620   :  { %886 = vmatpush.msra.mxu1 %v2328_v9 }
 0x622   :  { %v1982_v32 = vpop.eup %1981  ;;  %887 = vmatpush.msra.mxu1 %v2341_v25 }
 0x623   :  { %589 = vrot.lane.b32.xlu1 %v1982_v32, %s2128_s11 }
 0x624   :  { %888 = vmatpush.msra.mxu1 %v2346_v26 }
 0x626   :  { %889 = vmatpush.msra.mxu1 %v2356_v28 }
 0x628   :  { %890 = vmatpush.msra.mxu1 %v2362_v29 }
 0x62a   :  { %891 = vmatpush.msra.mxu1 %v2368_v30 }
 0x674   :  { %v471_v56 = vpop.f32.mrf.mxu0 }
 0x675   :  { %v472_v35 = vadd.f32 %v2508_v63, %v471_v56 }
 0x677   :  { %v474_v39 = vmax.f32 %v472_v35, 0.0 }
 0x679   :  { %1883 = vmatmul.msk.f32.vlgmr.msra.gmra.mxu2 %vm69_vm2, %v474_v39 }
 0x67a   :  { %1244 = vmatpush.msra.mxu2 %v2218_v17 }
 0x67c   :  { %1245 = vmatpush.msra.mxu2 %v2223_v18 }
 0x67e   :  { %1246 = vmatpush.msra.mxu2 %v2229_v19 }
 0x680   :  { %1247 = vmatpush.msra.mxu2 %v2235_v20 }
 0x682   :  { %1248 = vmatpush.msra.mxu2 %v2243_v33 }
 0x684   :  { %1249 = vmatpush.msra.mxu2 %v2249_v34 }
 0x695   :  { %v590_v27 = vpop.permute.xlu1 %589 }
 0x696   :  { %v592_v53 = vmul.f32 %v590_v27, %v573_v2 }
 0x698   :  { %742 = vrot.lane.b32.xlu2 %v592_v53, %s2129_s21 }
 0x69a   :  { %v618_v55 = vpop.f32.mrf.mxu1 }
 0x69b   :  { %v619_v57 = vadd.f32 %v2299_v46, %v618_v55 }
 0x69d   :  { %v621_v37 = vmax.f32 %v619_v57, 0.0 }
 0x69f   :  { %1888 = vmatmul.msk.f32.vlgmr.msra.gmra.mxu3 %vm182_vm9, %v621_v37 }
 0x6a0   :  { %848 = vmatpush.msra.mxu3 %v2271_v40 }
 0x6a2   :  { %849 = vmatpush.msra.mxu3 %v2277_v41 }
 0x6a4   :  { %850 = vmatpush.msra.mxu3 %v2283_v42 }
 0x6a6   :  { %851 = vmatpush.msra.mxu3 %v2289_v43 }
 0x6f2   :  { %v743_v59 = vpop.permute.xlu2 %742 }
 0x6f3   :  { %1892 = vmatmul.msk.f32.vlgmr.msrb.gmra.mxu1 %vm84_vm7, %v743_v59 }
 0x6f4   :  { %1033 = vmatpush.msrb.mxu1 %v2218_v17 }
 0x6f6   :  { %1034 = vmatpush.msrb.mxu1 %v2223_v18 }
 0x6f8   :  { %1035 = vmatpush.msrb.mxu1 %v2229_v19 }
 0x6fa   :  { %1036 = vmatpush.msrb.mxu1 %v2235_v20 }
 0x6fc   :  { %v495_v60 = vpop.f32.mrf.mxu2  ;;  %1037 = vmatpush.msrb.mxu1 %v2243_v33 }
 0x6fd   :  { %v496_v0 = vadd.f32 %v2526_v14, %v495_v60 }
 0x6fe   :  { %1038 = vmatpush.msrb.mxu1 %v2249_v34 }
 0x6ff   :  { %1983 = vtanh.f32 %v496_v0  ;;  %v1884_v19 = vmul.f32 -1.442695, %v496_v0 }
 0x701   :  { %1985 = vpow2.f32 %v1884_v19 }
 0x705   :  { %v1984_v1 = vpop.eup %1983 }
 0x706   :  { %520 = vrot.lane.b32.xlu0 %v1984_v1, %s2131_s15 }
 0x707   :  { %v1986_v20 = vpop.eup %1985 }
 0x708   :  { %v502_v6 = vadd.f32 1.0, %v1986_v20 }
 0x70a   :  { %1987 = vrcp.f32 %v502_v6  ;;  %v514_v13 = vand.u32 2147483648, %v502_v6  ;;  %vm508_vm14 = vweird.f32 %v502_v6  ;;  %v512_v15 = vand.u32 2147483647, %v502_v6 }
 0x70c   :  { %v515_v22 = vor.u32 1.1754944e-38, %v514_v13  ;;  %vm513_vm1 = vcmp.eq.f32.partialorder %v512_v15, 8.507059e+37 }
 0x710   :  { %v1988_v33 = vpop.eup %1987 }
 0x711   :  { %v504_v10 = vmul.f32 %v1988_v33, %v502_v6  ;;  %vm509_vm13 = vweird.f32 %v1988_v33 }
 0x712   :  { %vm510_vm0 = vmor %vm508_vm14, %vm509_vm13 }
 0x713   :  { %v505_v11 = vsub.f32 1.0, %v504_v10 }
 0x715   :  { %v506_v12 = vmul.f32 %v1988_v33, %v505_v11 }
 0x717   :  { %v507_v34 = vadd.f32 %v1988_v33, %v506_v12 }
 0x719   :  { %v511_v21 = vsel %vm510_vm0, %v1988_v33, %v507_v34 }
 0x71a   :  { %v516_v32 = vsel %vm513_vm1, %v515_v22, %v511_v21 }
 0x71b   :  { %v518_v20 = vmul.f32 %v516_v32, %v2548_v36 }
 0x722   :  { %v642_v2 = vpop.f32.mrf.mxu3 }
 0x723   :  { %v643_v17 = vadd.f32 %v2314_v51, %v642_v2 }
 0x725   :  { %v645_v18 = vsel %vm206_vm10, %v643_v17, -inf }
 0x726   :  { %646 = vmax.xlane.f32.xlu1 %v645_v18 }
 0x770   :  { %v763_v16 = vpop.f32.mrf.mxu1 }
 0x771   :  { %v766_v24 = vadd.f32 %v763_v16, %v740_v58 }
 0x773   :  { %1989 = vtanh.f32 %v766_v24  ;;  %v1893_v59 = vmul.f32 -1.442695, %v766_v24 }
 0x778   :  { %v521_v56 = vpop.permute.xlu0 %520 }
 0x779   :  { %v523_v35 = vmul.f32 %v521_v56, %v516_v32  ;;  %v1990_v39 = vpop.eup %1989 }
 0x77b   :  { %525 = vrot.lane.b32.xlu0 %v523_v35, %s2132_s16 }
 0x783   :  { %789 = vrot.lane.b32.xlu0 %v1990_v39, %s2126_s19 }
 0x799   :  { %v647_v27 = vpop.xlane.xlu1 %646 }
 0x79a   :  { %v648_v53 = vsub.f32 %v643_v17, %v647_v27 }
 0x79c   :  { %v649_v55 = vmul.f32 1.442695, %v648_v53 }
 0x79e   :  { %1991 = vpow2.f32 %v649_v55 }
 0x79f   :  { %1993 = vpow2.f32 %v1893_v59 }
 0x7a4   :  { %v1992_v57 = vpop.eup %1991 }
 0x7a5   :  { %v651_v37 = vsel %vm206_vm10, %v1992_v57, 0.0  ;;  %v1994_v60 = vpop.eup %1993 }
 0x7a6   :  { %652 = vadd.xlane.f32.xlu2 %v651_v37  ;;  %v770_v0 = vadd.f32 1.0, %v1994_v60 }
 0x7a8   :  { %1995 = vrcp.f32 %v770_v0  ;;  %v782_v10 = vand.u32 2147483648, %v770_v0  ;;  %vm776_vm4 = vweird.f32 %v770_v0  ;;  %v780_v11 = vand.u32 2147483647, %v770_v0 }
 0x7aa   :  { %v783_v34 = vor.u32 1.1754944e-38, %v782_v10  ;;  %vm781_vm6 = vcmp.eq.f32.partialorder %v780_v11, 8.507059e+37 }
 0x7ae   :  { %v1996_v1 = vpop.eup %1995 }
 0x7af   :  { %v772_v2 = vmul.f32 %v1996_v1, %v770_v0  ;;  %vm777_vm3 = vweird.f32 %v1996_v1 }
 0x7b0   :  { %vm778_vm5 = vmor %vm776_vm4, %vm777_vm3 }
 0x7b1   :  { %v773_v18 = vsub.f32 1.0, %v772_v2 }
 0x7b3   :  { %v774_v19 = vmul.f32 %v1996_v1, %v773_v18 }
 0x7b5   :  { %v775_v17 = vadd.f32 %v1996_v1, %v774_v19 }
 0x7b7   :  { %v779_v12 = vsel %vm778_vm5, %v1996_v1, %v775_v17 }
 0x7b8   :  { %v784_v15 = vsel %vm781_vm6, %v783_v34, %v779_v12 }
 0x7b9   :  { %v787_v56 = vmul.f32 %v784_v15, %v2565_v23 }
 0x7ed   :  { %v526_v6 = vpop.permute.xlu0 %525 }
 0x7ee   :  { %v2612_v33 = vadd.f32 %v526_v6, %v518_v20 }
 0x7f0   :  { %658 = vrot.lane.b32.xlu0 %v2612_v33, %s2133_s17 }
 0x7f5   :  { %v790_v13 = vpop.permute.xlu0 %789 }
 0x7f6   :  { %v792_v16 = vmul.f32 %v790_v13, %v784_v15 }
 0x7f8   :  { %794 = vrot.lane.b32.xlu0 %v792_v16, %s2127_s28 }
 0x800   :  { %805 = vrot.lane.b32.xlu0 %v2565_v23, %s2130_s9 }
 0x819   :  { %v653_v36 = vpop.xlane.xlu2 %652 }
 0x81a   :  { %1997 = vrcp.f32 %v653_v36 }
 0x820   :  { %v1998_v21 = vpop.eup %1997 }
 0x821   :  { %v655_v22 = vmul.f32 %v1998_v21, %v1992_v57 }
 0x823   :  { %v656_v58 = vmul.f32 %v655_v22, %v2570_v31 }
 0x862   :  { %v659_v24 = vpop.permute.xlu0 %658 }
 0x863   :  { %v661_v32 = vsel %vm153_vm8, %v656_v58, %v659_v24 }
 0x864   :  { %1889 = vmatmul.msk.f32.vlgmr.msrb.gmra.mxu0 %vm227_vm15, %v661_v32 }
 0x865   :  { %970 = vmatpush.msrb.mxu0 %v2191_v3 }
 0x867   :  { %971 = vmatpush.msrb.mxu0 %v2196_v4 }
 0x869   :  { %972 = vmatpush.msrb.mxu0 %v2202_v5 }
 0x86a   :  { %v795_v35 = vpop.permute.xlu0 %794 }
 0x86b   :  { %v2626_v39 = vadd.f32 %v795_v35, %v787_v56 }
 0x86d   :  { %1999 = vtanh.f32 %v2626_v39 }
 0x872   :  { %v806_v27 = vpop.permute.xlu0 %805 }
 0x873   :  { %v2000_v31 = vpop.eup %1999  ;;  %v2631_v53 = vsel %vm84_vm7, %v806_v27, %v2626_v39 }
 0x874   :  { %800 = vrot.lane.b32.xlu1 %v2000_v31, %s2128_s11  ;;  %1894 = vmatmul.msk.f32.vlgmr.msra.gmra.mxu0 %vm153_vm8, %v2631_v53 }
 0x875   :  { %1096 = vmatpush.msra.mxu0 %v2323_v8 }
 0x877   :  { %1097 = vmatpush.msra.mxu0 %v2328_v9 }
 0x879   :  { %1098 = vmatpush.msra.mxu0 %v2341_v25 }
 0x87b   :  { %1099 = vmatpush.msra.mxu0 %v2346_v26 }
 0x87d   :  { %1100 = vmatpush.msra.mxu0 %v2356_v28 }
 0x87f   :  { %1101 = vmatpush.msra.mxu0 %v2362_v29 }
 0x881   :  { %1102 = vmatpush.msra.mxu0 %v2368_v30 }
 0x8e1   :  { %v682_v3 = vpop.f32.mrf.mxu0 }
 0x8e2   :  { %v683_v4 = vadd.f32 %v2508_v63, %v682_v3 }
 0x8e4   :  { %v685_v5 = vmax.f32 %v683_v4, 0.0 }
 0x8e6   :  { %1890 = vmatmul.msk.f32.vlgmr.msrb.gmra.mxu3 %vm69_vm2, %v685_v5  ;;  %v801_v23 = vpop.permute.xlu1 %800 }
 0x8e7   :  { %v803_v8 = vmul.f32 %v801_v23, %v784_v15  ;;  %1059 = vmatpush.msrb.mxu3 %v2271_v40 }
 0x8e9   :  { %953 = vrot.lane.b32.xlu0 %v803_v8, %s2129_s21  ;;  %1060 = vmatpush.msrb.mxu3 %v2277_v41 }
 0x8eb   :  { %1061 = vmatpush.msrb.mxu3 %v2283_v42 }
 0x8ed   :  { %1062 = vmatpush.msrb.mxu3 %v2289_v43 }
 0x8f1   :  { %v829_v9 = vpop.f32.mrf.mxu0 }
 0x8f2   :  { %v830_v55 = vadd.f32 %v2299_v46, %v829_v9 }
 0x8f4   :  { %v832_v57 = vmax.f32 %v830_v55, 0.0 }
 0x8f6   :  { %1895 = vmatmul.msk.f32.vlgmr.msra.gmra.mxu3 %vm182_vm9, %v832_v57 }
 0x8f7   :  { %1115 = vmatpush.msra.mxu3 %v2392_v38 }
 0x8f9   :  { %1116 = vmatpush.msra.mxu3 %v2397_v44 }
 0x8fb   :  { %1117 = vmatpush.msra.mxu3 %v2404_v45 }
 0x8fd   :  { %1118 = vmatpush.msra.mxu3 %v2411_v47 }
 0x8ff   :  { %1119 = vmatpush.msra.mxu3 %v2418_v48 }
 0x901   :  { %1120 = vmatpush.msra.mxu3 %v2427_v49 }
 0x903   :  { %1121 = vmatpush.msra.mxu3 %v2432_v50 }
 0x905   :  { %1122 = vmatpush.msra.mxu3 %v2439_v52 }
 0x907   :  { %1123 = vmatpush.msra.mxu3 %v2448_v54  ;;  %v951_v54 = vld [vmem:[#allocation2 + $0x8] sm:$0x3] }
 0x909   :  { %1124 = vmatpush.msra.mxu3 %v2469_v61 }
 0x90b   :  { %1125 = vmatpush.msra.mxu3 %v2476_v62 }
 0x90d   :  { %1126 = vmatpush.msra.mxu3 %v2483_v7 }
 0x95b   :  { %v954_v46 = vpop.permute.xlu0 %953 }
 0x95c   :  { %1899 = vmatmul.msk.f32.vlgmr.msrb.gmra.mxu0 %vm84_vm7, %v954_v46  ;;  %v2690_v46 = vld [vmem:[%s3137_s1 + $0x20] sm:$0xff] }
 0x95d   :  { %1270 = vmatpush.msrb.mxu0 %v2271_v40 }
 0x95f   :  { %1271 = vmatpush.msrb.mxu0 %v2277_v41 }
 0x961   :  { %1272 = vmatpush.msrb.mxu0 %v2283_v42 }
 0x963   :  { %1273 = vmatpush.msrb.mxu0 %v2289_v43 }
 0x969   :  { %v706_v38 = vpop.f32.mrf.mxu3 }
 0x96a   :  { %v707_v44 = vadd.f32 %v2526_v14, %v706_v38  ;;  %v2696_v38 = vld [vmem:[%s3137_s1 + $0x18] sm:$0xff] }
 0x96c   :  { %2001 = vtanh.f32 %v707_v44  ;;  %v1891_v40 = vmul.f32 -1.442695, %v707_v44  ;;  %v2703_v44 = vld [vmem:[%s3137_s1 + $0x10] sm:$0xff] }
 0x96e   :  { %2003 = vpow2.f32 %v1891_v40 }
 0x972   :  { %v2002_v45 = vpop.eup %2001 }
 0x973   :  { %731 = vrot.lane.b32.xlu0 %v2002_v45, %s2131_s15 }
 0x974   :  { %v2004_v41 = vpop.eup %2003 }
 0x975   :  { %v713_v50 = vadd.f32 1.0, %v2004_v41  ;;  %v2725_v41 = vld [vmem:[%s3141_s4 + $0x28] sm:$0xff] }
 0x977   :  { %2005 = vrcp.f32 %v713_v50  ;;  %v725_v59 = vand.u32 2147483648, %v713_v50  ;;  %vm719_vm12 = vweird.f32 %v713_v50 }
 0x979   :  { %v853_v47 = vpop.f32.mrf.mxu3  ;;  %v726_v1 = vor.u32 1.1754944e-38, %v725_v59 }
 0x97a   :  { %v854_v48 = vadd.f32 %v2314_v51, %v853_v47  ;;  %v723_v51 = vand.u32 2147483647, %v713_v50 }
 0x97c   :  { %v856_v49 = vsel %vm206_vm10, %v854_v48, -inf  ;;  %vm724_vm14 = vcmp.eq.f32.partialorder %v723_v51, 8.507059e+37  ;;  %v2786_v51 = vld [vmem:[%s3140_s3 + $0x18] sm:$0xff] }
 0x97d   :  { %857 = vmax.xlane.f32.xlu2 %v856_v49  ;;  %v2006_v42 = vpop.eup %2005 }
 0x97e   :  { %v715_v43 = vmul.f32 %v2006_v42, %v713_v50  ;;  %vm720_vm11 = vweird.f32 %v2006_v42 }
 0x97f   :  { %vm721_vm13 = vmor %vm719_vm12, %vm720_vm11 }
 0x980   :  { %v716_v52 = vsub.f32 1.0, %v715_v43 }
 0x982   :  { %v717_v7 = vmul.f32 %v2006_v42, %v716_v52 }
 0x984   :  { %v718_v37 = vadd.f32 %v2006_v42, %v717_v7  ;;  %v2773_v7 = vld [vmem:[%s3139_s2 + $0x8] sm:$0xff] }
 0x986   :  { %v722_v0 = vsel %vm721_vm13, %v2006_v42, %v718_v37  ;;  %v2779_v37 = vld [vmem:[%s3139_s2] sm:$0xff] }
 0x987   :  { %v727_v2 = vsel %vm724_vm14, %v726_v1, %v722_v0  ;;  %v2798_v0 = vld [vmem:[%s3140_s3 + $0x8] sm:$0xff]  ;;  %v2804_v1 = vld [vmem:[%s3140_s3] sm:$0xff] }
 0x988   :  { %v729_v22 = vmul.f32 %v727_v2, %v2612_v33 }
 0x9d9   :  { %v974_v61 = vpop.f32.mrf.mxu0 }
 0x9da   :  { %v977_v62 = vadd.f32 %v974_v61, %v951_v54  ;;  %v2761_v61 = vld [vmem:[%s3139_s2 + $0x18] sm:$0xff] }
 0x9dc   :  { %2007 = vtanh.f32 %v977_v62  ;;  %v1900_v12 = vmul.f32 -1.442695, %v977_v62  ;;  %v2767_v62 = vld [vmem:[%s3139_s2 + $0x10] sm:$0xff] }
 0x9e2   :  { %v2008_v60 = vpop.eup %2007 }
 0x9e3   :  { %1000 = vrot.lane.b32.xlu2 %v2008_v60, %s2126_s19  ;;  %v2792_v60 = vld [vmem:[%s3140_s3 + $0x10] sm:$0xff] }
 0x9e5   :  { %v732_v18 = vpop.permute.xlu0 %731 }
 0x9e6   :  { %v734_v19 = vmul.f32 %v732_v18, %v727_v2 }
 0x9e8   :  { %736 = vrot.lane.b32.xlu0 %v734_v19, %s2132_s16 }
 0x9f0   :  { %v858_v20 = vpop.xlane.xlu2 %857 }
 0x9f1   :  { %v859_v6 = vsub.f32 %v854_v48, %v858_v20 }
 0x9f3   :  { %v860_v17 = vmul.f32 1.442695, %v859_v6  ;;  %v2812_v6 = vld [vmem:[%s3140_s3 + $0x20] ss:$0 sm:$0xff] }
 0x9f5   :  { %2009 = vpow2.f32 %v860_v17 }
 0x9f6   :  { %2011 = vpow2.f32 %v1900_v12 }
 0x9fb   :  { %v2010_v10 = vpop.eup %2009 }
 0x9fc   :  { %v862_v11 = vsel %vm206_vm10, %v2010_v10, 0.0  ;;  %v2012_v34 = vpop.eup %2011 }
 0x9fd   :  { %863 = vadd.xlane.f32.xlu1 %v862_v11  ;;  %v981_v13 = vadd.f32 1.0, %v2012_v34 }
 0x9ff   :  { %2013 = vrcp.f32 %v981_v13  ;;  %v993_v56 = vand.u32 2147483648, %v981_v13  ;;  %vm987_vm1 = vweird.f32 %v981_v13  ;;  %v991_v35 = vand.u32 2147483647, %v981_v13 }
 0xa01   :  { %v994_v3 = vor.u32 1.1754944e-38, %v993_v56  ;;  %vm992_vm4 = vcmp.eq.f32.partialorder %v991_v35, 8.507059e+37 }
 0xa05   :  { %v2014_v15 = vpop.eup %2013 }
 0xa06   :  { %v983_v16 = vmul.f32 %v2014_v15, %v981_v13  ;;  %vm988_vm0 = vweird.f32 %v2014_v15 }
 0xa07   :  { %vm989_vm3 = vmor %vm987_vm1, %vm988_vm0 }
 0xa08   :  { %v984_v36 = vsub.f32 1.0, %v983_v16  ;;  %v1162_v16 = vld [vmem:[#allocation2 + $0xa] sm:$0x3] }
 0xa0a   :  { %v985_v21 = vmul.f32 %v2014_v15, %v984_v36 }
 0xa0c   :  { %v986_v24 = vadd.f32 %v2014_v15, %v985_v21 }
 0xa0e   :  { %v990_v27 = vsel %vm989_vm3, %v2014_v15, %v986_v24 }
 0xa0f   :  { %v995_v4 = vsel %vm992_vm4, %v994_v3, %v990_v27 }
 0xa3d   :  { %v1001_v31 = vpop.permute.xlu2 %1000 }
 0xa3e   :  { %v1003_v5 = vmul.f32 %v1001_v31, %v995_v4 }
 0xa5a   :  { %v737_v58 = vpop.permute.xlu0 %736 }
 0xa5b   :  { %v2677_v32 = vadd.f32 %v737_v58, %v729_v22 }
 0xa5d   :  { %869 = vrot.lane.b32.xlu0 %v2677_v32, %s2133_s17 }
 0xa65   :  { %1005 = vrot.lane.b32.xlu0 %v1003_v5, %s2127_s28 }
 0xa6d   :  { %1016 = vrot.lane.b32.xlu0 %v2626_v39, %s2130_s9 }
 0xa70   :  { %v864_v33 = vpop.xlane.xlu1 %863 }
 0xa71   :  { %2015 = vrcp.f32 %v864_v33 }
 0xa77   :  { %v2016_v23 = vpop.eup %2015 }
 0xa78   :  { %v866_v8 = vmul.f32 %v2016_v23, %v2010_v10 }
 0xa7a   :  { %v867_v9 = vmul.f32 %v866_v8, %v2631_v53  ;;  %v998_v53 = vmul.f32 %v995_v4, %v2626_v39  ;;  %v2719_v39 = vld [vmem:[%s3141_s4 + $0x30] sm:$0xff] }
 0xacf   :  { %v870_v55 = vpop.permute.xlu0 %869 }
 0xad0   :  { %v872_v57 = vsel %vm153_vm8, %v867_v9, %v870_v55 }
 0xad1   :  { %1896 = vmatmul.msk.f32.vlgmr.msra.gmra.mxu1 %vm227_vm15, %v872_v57 }
 0xad2   :  { %1181 = vmatpush.msra.mxu1 %v2690_v46 }
 0xad4   :  { %1182 = vmatpush.msra.mxu1 %v2696_v38 }
 0xad6   :  { %1183 = vmatpush.msra.mxu1 %v2703_v44 }
 0xad7   :  { %v1006_v45 = vpop.permute.xlu0 %1005 }
 0xad8   :  { %v2706_v47 = vadd.f32 %v1006_v45, %v998_v53 }
 0xada   :  { %2017 = vtanh.f32 %v2706_v47 }
 0xadf   :  { %v1017_v48 = vpop.permute.xlu0 %1016 }
 0xae0   :  { %v2018_v49 = vpop.eup %2017  ;;  %v2711_v40 = vsel %vm84_vm7, %v1017_v48, %v2706_v47 }
 0xae1   :  { %1011 = vrot.lane.b32.xlu2 %v2018_v49, %s2128_s11  ;;  %1901 = vmatmul.msk.f32.vlgmr.msrb.gmra.mxu1 %vm153_vm8, %v2711_v40 }
 0xae2   :  { %1307 = vmatpush.msrb.mxu1 %v2719_v39 }
 0xae4   :  { %1308 = vmatpush.msrb.mxu1 %v2725_v41 }
 0xae6   :  { %1309 = vmatpush.msrb.mxu1 %v2341_v25 }
 0xae8   :  { %1310 = vmatpush.msrb.mxu1 %v2346_v26  ;;  %v2742_v26 = vld [vmem:[%s3139_s2 + $0x30] ss:$0 sm:$0xff] }
 0xaea   :  { %1311 = vmatpush.msrb.mxu1 %v2356_v28 }
 0xaec   :  { %1312 = vmatpush.msrb.mxu1 %v2362_v29 }
 0xaee   :  { %1313 = vmatpush.msrb.mxu1 %v2368_v30  ;;  %v2749_v30 = vld [vmem:[%s3139_s2 + $0x28] sm:$0xff] }
 0xb3b   :  { %v1012_v50 = vpop.permute.xlu2 %1011 }
 0xb3c   :  { %v1014_v42 = vmul.f32 %v1012_v50, %v995_v4 }
 0xb3e   :  { %1164 = vrot.lane.b32.xlu0 %v1014_v42, %s2129_s21 }
 0xb4e   :  { %v893_v43 = vpop.f32.mrf.mxu1 }
 0xb4f   :  { %v894_v52 = vadd.f32 %v2508_v63, %v893_v43  ;;  %v2755_v63 = vld [vmem:[%s3139_s2 + $0x20] sm:$0xff] }
 0xb51   :  { %v896_v54 = vmax.f32 %v894_v52, 0.0 }
 0xb53   :  { %1897 = vmatmul.msk.f32.vlgmr.msrb.gmra.mxu2 %vm69_vm2, %v896_v54 }
 0xb54   :  { %1392 = vmatpush.msrb.mxu2 %v2690_v46 }
 0xb56   :  { %1393 = vmatpush.msrb.mxu2 %v2696_v38 }
 0xb58   :  { %1394 = vmatpush.msrb.mxu2 %v2703_v44 }
 0xb5e   :  { %v1040_v25 = vpop.f32.mrf.mxu1 }
 0xb5f   :  { %v1041_v28 = vadd.f32 %v2742_v26, %v1040_v25 }
 0xb61   :  { %v1043_v29 = vmax.f32 %v1041_v28, 0.0 }
 0xb63   :  { %1902 = vmatmul.msk.f32.vlgmr.msrb.gmra.mxu3 %vm182_vm9, %v1043_v29 }
 0xb64   :  { %1455 = vmatpush.msrb.mxu3 %v2749_v30 }
 0xb66   :  { %1456 = vmatpush.msrb.mxu3 %v2755_v63 }
 0xb68   :  { %1457 = vmatpush.msrb.mxu3 %v2761_v61 }
 0xb6a   :  { %1458 = vmatpush.msrb.mxu3 %v2767_v62 }
 0xb6c   :  { %1459 = vmatpush.msrb.mxu3 %v2773_v7 }
 0xb6e   :  { %1460 = vmatpush.msrb.mxu3 %v2779_v37 }
 0xbb0   :  { %v1165_v59 = vpop.permute.xlu0 %1164 }
 0xbb1   :  { %1906 = vmatmul.msk.f32.vlgmr.msra.gmra.mxu1 %vm84_vm7, %v1165_v59 }
 0xbb2   :  { %1481 = vmatpush.msra.mxu1 %v2786_v51 }
 0xbb4   :  { %1482 = vmatpush.msra.mxu1 %v2792_v60 }
 0xbb6   :  { %1483 = vmatpush.msra.mxu1 %v2798_v0 }
 0xbb8   :  { %1484 = vmatpush.msra.mxu1 %v2804_v1 }
 0xbd6   :  { %v917_v2 = vpop.f32.mrf.mxu2 }
 0xbd7   :  { %v918_v18 = vadd.f32 %v2526_v14, %v917_v2 }
 0xbd9   :  { %2019 = vtanh.f32 %v918_v18  ;;  %v1898_v11 = vmul.f32 -1.442695, %v918_v18 }
 0xbdb   :  { %2021 = vpow2.f32 %v1898_v11 }
 0xbdf   :  { %v2020_v19 = vpop.eup %2019 }
 0xbe0   :  { %942 = vrot.lane.b32.xlu2 %v2020_v19, %s2131_s15 }
 0xbe1   :  { %v2022_v14 = vpop.eup %2021 }
 0xbe2   :  { %v924_v12 = vadd.f32 1.0, %v2022_v14 }
 0xbe4   :  { %2023 = vrcp.f32 %v924_v12  ;;  %v936_v24 = vand.u32 2147483648, %v924_v12  ;;  %vm930_vm6 = vweird.f32 %v924_v12  ;;  %v934_v56 = vand.u32 2147483647, %v924_v12 }
 0xbe6   :  { %v1064_v20 = vpop.f32.mrf.mxu3  ;;  %v937_v31 = vor.u32 1.1754944e-38, %v936_v24  ;;  %vm935_vm12 = vcmp.eq.f32.partialorder %v934_v56, 8.507059e+37  ;;  %v2886_v56 = vld [vmem:[%s3142_s5 + $0x18] sm:$0xff] }
 0xbe7   :  { %v1065_v17 = vadd.f32 %v2812_v6, %v1064_v20 }
 0xbe9   :  { %v1067_v10 = vsel %vm206_vm10, %v1065_v17, -inf }
 0xbea   :  { %1068 = vmax.xlane.f32.xlu0 %v1067_v10  ;;  %v2024_v34 = vpop.eup %2023 }
 0xbeb   :  { %v926_v13 = vmul.f32 %v2024_v34, %v924_v12  ;;  %vm931_vm5 = vweird.f32 %v2024_v34 }
 0xbec   :  { %vm932_vm11 = vmor %vm930_vm6, %vm931_vm5 }
 0xbed   :  { %v927_v15 = vsub.f32 1.0, %v926_v13  ;;  %v2842_v13 = vld [vmem:[%s3142_s5 + $0x50] sm:$0xff] }
 0xbef   :  { %v928_v22 = vmul.f32 %v2024_v34, %v927_v15  ;;  %v2854_v15 = vld [vmem:[%s3142_s5 + $0x40] sm:$0xff] }
 0xbf1   :  { %v929_v58 = vadd.f32 %v2024_v34, %v928_v22  ;;  %v2878_v22 = vld [vmem:[%s3142_s5 + $0x20] sm:$0xff] }
 0xbf3   :  { %v933_v27 = vsel %vm932_vm11, %v2024_v34, %v929_v58  ;;  %v2836_v34 = vld [vmem:[%s3142_s5 + $0x58] sm:$0xff] }
 0xbf4   :  { %v938_v3 = vsel %vm935_vm12, %v937_v31, %v933_v27  ;;  %v2894_v31 = vld [vmem:[%s3142_s5 + $0x10] sm:$0xff] }
 0xbf5   :  { %v940_v49 = vmul.f32 %v938_v3, %v2677_v32 }
 0xbfe   :  { %1227 = vrot.lane.b32.xlu0 %v2706_v47, %s2130_s9 }
 0xc2e   :  { %v1185_v36 = vpop.f32.mrf.mxu1 }
 0xc2f   :  { %v1188_v21 = vadd.f32 %v1185_v36, %v1162_v16  ;;  %v2860_v16 = vld [vmem:[%s3142_s5 + $0x38] sm:$0xff]  ;;  %v2866_v36 = vld [vmem:[%s3142_s5 + $0x30] sm:$0xff] }
 0xc31   :  { %2025 = vtanh.f32 %v1188_v21  ;;  %v1907_v57 = vmul.f32 -1.442695, %v1188_v21  ;;  %v2872_v21 = vld [vmem:[%s3142_s5 + $0x28] sm:$0xff] }
 0xc37   :  { %v2026_v35 = vpop.eup %2025 }
 0xc38   :  { %1211 = vrot.lane.b32.xlu1 %v2026_v35, %s2126_s19 }
 0xc3a   :  { %v943_v4 = vpop.permute.xlu2 %942 }
 0xc3b   :  { %v945_v5 = vmul.f32 %v943_v4, %v938_v3  ;;  %v2907_v3 = vld [vmem:[%s3142_s5 + $0x8] sm:$0xff]  ;;  %v2914_v4 = vld [vmem:[%s3142_s5] sm:$0xff] }
 0xc3d   :  { %947 = vrot.lane.b32.xlu2 %v945_v5, %s2132_s16 }
 0xc5d   :  { %v1069_v33 = vpop.xlane.xlu0 %1068 }
 0xc5e   :  { %v1070_v23 = vsub.f32 %v1065_v17, %v1069_v33  ;;  %v2921_v33 = vld [vmem:[%s3141_s4 + $0x20] sm:$0xff] }
 0xc60   :  { %v1071_v8 = vmul.f32 1.442695, %v1070_v23  ;;  %v2928_v23 = vld [vmem:[%s3141_s4 + $0x18] sm:$0xff] }
 0xc62   :  { %2027 = vpow2.f32 %v1071_v8  ;;  %v2934_v8 = vld [vmem:[%s3141_s4 + $0x10] sm:$0xff] }
 0xc63   :  { %2029 = vpow2.f32 %v1907_v57 }
 0xc68   :  { %v2028_v9 = vpop.eup %2027 }
 0xc69   :  { %v1073_v55 = vsel %vm206_vm10, %v2028_v9, 0.0  ;;  %v2030_v53 = vpop.eup %2029 }
 0xc6a   :  { %1074 = vadd.xlane.f32.xlu2 %v1073_v55  ;;  %v1192_v45 = vadd.f32 1.0, %v2030_v53  ;;  %v2946_v55 = vld [vmem:[%s3141_s4] sm:$0xff]  ;;  %v2952_v53 = vld [vmem:[%s3141_s4 + $0x38] ss:$0 sm:$0xff] }
 0xc6c   :  { %2031 = vrcp.f32 %v1192_v45  ;;  %v1204_v28 = vand.u32 2147483648, %v1192_v45  ;;  %vm1198_vm14 = vweird.f32 %v1192_v45  ;;  %v1202_v29 = vand.u32 2147483647, %v1192_v45 }
 0xc6e   :  { %v1205_v2 = vor.u32 1.1754944e-38, %v1204_v28  ;;  %vm1203_vm1 = vcmp.eq.f32.partialorder %v1202_v29, 8.507059e+37 }
 0xc70   :  { %v1228_v27 = vpop.permute.xlu0 %1227 }
 0xc72   :  { %v2032_v48 = vpop.eup %2031 }
 0xc73   :  { %v1194_v42 = vmul.f32 %v2032_v48, %v1192_v45  ;;  %vm1199_vm13 = vweird.f32 %v2032_v48 }
 0xc74   :  { %vm1200_vm0 = vmor %vm1198_vm14, %vm1199_vm13 }
 0xc75   :  { %v1195_v52 = vsub.f32 1.0, %v1194_v42 }
 0xc77   :  { %v1196_v54 = vmul.f32 %v2032_v48, %v1195_v52 }
 0xc79   :  { %v1197_v25 = vadd.f32 %v2032_v48, %v1196_v54 }
 0xc7b   :  { %v1201_v59 = vsel %vm1200_vm0, %v2032_v48, %v1197_v25 }
 0xc7c   :  { %v2826_v32 = vsel %vm1203_vm1, %v1205_v2, %v1201_v59 }
 0xc7d   :  { %v1209_v58 = vmul.f32 %v2826_v32, %v2706_v47 }
 0xc97   :  { %v948_v50 = vpop.permute.xlu2 %947 }
 0xc98   :  { %v2822_v43 = vadd.f32 %v948_v50, %v940_v49 }
 0xc9a   :  { %1080 = vrot.lane.b32.xlu1 %v2822_v43, %s2133_s17 }
 0xcaa   :  { %v1212_v18 = vpop.permute.xlu1 %1211 }
 0xcab   :  { %v1214_v19 = vmul.f32 %v1212_v18, %v2826_v32 }
 0xcad   :  { %1216 = vrot.lane.b32.xlu1 %v1214_v19, %s2127_s28 }
 0xcdd   :  { %v1075_v20 = vpop.xlane.xlu2 %1074 }
 0xcde   :  { %2033 = vrcp.f32 %v1075_v20  ;;  %v1373_v20 = vld [vmem:[#allocation2 + $0xc] sm:$0x3] }
 0xce4   :  { %v2034_v17 = vpop.eup %2033 }
 0xce5   :  { %v1077_v10 = vmul.f32 %v2034_v17, %v2028_v9  ;;  %v2940_v9 = vld [vmem:[%s3141_s4 + $0x8] sm:$0xff] }
 0xce7   :  { %v1078_v11 = vmul.f32 %v1077_v10, %v2711_v40  ;;  %v2848_v40 = vld [vmem:[%s3142_s5 + $0x48] sm:$0xff] }
 0xd0c   :  { %v1081_v14 = vpop.permute.xlu1 %1080 }
 0xd0d   :  { %v1083_v12 = vsel %vm153_vm8, %v1078_v11, %v1081_v14 }
 0xd0e   :  { %1903 = vmatmul.msk.f32.vlgmr.msra.gmra.mxu0 %vm227_vm15, %v1083_v12 }
 0xd0f   :  { %1326 = vmatpush.msra.mxu0 %v2836_v34 }
 0xd11   :  { %1327 = vmatpush.msra.mxu0 %v2842_v13 }
 0xd13   :  { %1328 = vmatpush.msra.mxu0 %v2848_v40 }
 0xd15   :  { %1329 = vmatpush.msra.mxu0 %v2854_v15 }
 0xd17   :  { %1330 = vmatpush.msra.mxu0 %v2860_v16 }
 0xd19   :  { %1331 = vmatpush.msra.mxu0 %v2866_v36 }
 0xd1b   :  { %1332 = vmatpush.msra.mxu0 %v2872_v21 }
 0xd1d   :  { %1333 = vmatpush.msra.mxu0 %v2878_v22 }
 0xd1f   :  { %v1217_v24 = vpop.permute.xlu1 %1216  ;;  %1334 = vmatpush.msra.mxu0 %v2886_v56 }
 0xd20   :  { %v2889_v35 = vadd.f32 %v1217_v24, %v1209_v58 }
 0xd21   :  { %1335 = vmatpush.msra.mxu0 %v2894_v31 }
 0xd22   :  { %2035 = vtanh.f32 %v2889_v35  ;;  %v2900_v47 = vsel %vm84_vm7, %v1228_v27, %v2889_v35 }
 0xd23   :  { %1908 = vmatmul.msk.f32.vlgmr.msra.gmra.mxu2 %vm153_vm8, %v2900_v47  ;;  %1336 = vmatpush.msra.mxu0 %v2907_v3 }
 0xd24   :  { %1518 = vmatpush.msra.mxu2 %v2719_v39 }
 0xd25   :  { %1337 = vmatpush.msra.mxu0 %v2914_v4 }
 0xd26   :  { %1519 = vmatpush.msra.mxu2 %v2725_v41 }
 0xd28   :  { %v2036_v5 = vpop.eup %2035  ;;  %1520 = vmatpush.msra.mxu2 %v2921_v33 }
 0xd29   :  { %1222 = vrot.lane.b32.xlu1 %v2036_v5, %s2128_s11 }
 0xd2a   :  { %1521 = vmatpush.msra.mxu2 %v2928_v23 }
 0xd2c   :  { %1522 = vmatpush.msra.mxu2 %v2934_v8 }
 0xd2e   :  { %1523 = vmatpush.msra.mxu2 %v2940_v9 }
 0xd30   :  { %1524 = vmatpush.msra.mxu2 %v2946_v55 }
 0xd8b   :  { %v1104_v57 = vpop.f32.mrf.mxu0 }
 0xd8c   :  { %v1105_v45 = vadd.f32 %v2952_v53, %v1104_v57 }
 0xd8e   :  { %v1107_v48 = vmax.f32 %v1105_v45, 0.0 }
 0xd90   :  { %1904 = vmatmul.msk.f32.vlgmr.msra.gmra.mxu3 %vm69_vm2, %v1107_v48 }
 0xd91   :  { %1603 = vmatpush.msra.mxu3 %v2690_v46 }
 0xd93   :  { %1604 = vmatpush.msra.mxu3 %v2696_v38 }
 0xd95   :  { %1605 = vmatpush.msra.mxu3 %v2703_v44  ;;  %v2977_v44 = vld [vmem:[%s3142_s5 + $0x60] ss:$0 sm:$0xff] }
 0xd9b   :  { %v1223_v49 = vpop.permute.xlu1 %1222 }
 0xd9c   :  { %v1225_v50 = vmul.f32 %v1223_v49, %v2826_v32 }
 0xd9e   :  { %1375 = vrot.lane.b32.xlu2 %v1225_v50, %s2129_s21 }
 0xda6   :  { %v1251_v42 = vpop.f32.mrf.mxu2 }
 0xda7   :  { %v1252_v52 = vadd.f32 %v2742_v26, %v1251_v42 }
 0xda9   :  { %v1254_v54 = vmax.f32 %v1252_v52, 0.0 }
 0xdab   :  { %1909 = vmatmul.msk.f32.vlgmr.msrb.gmra.mxu0 %vm182_vm9, %v1254_v54 }
 0xdac   :  { %1666 = vmatpush.msrb.mxu0 %v2749_v30 }
 0xdae   :  { %1667 = vmatpush.msrb.mxu0 %v2755_v63 }
 0xdb0   :  { %1668 = vmatpush.msrb.mxu0 %v2761_v61 }
 0xdb2   :  { %1669 = vmatpush.msrb.mxu0 %v2767_v62 }
 0xdb4   :  { %1670 = vmatpush.msrb.mxu0 %v2773_v7 }
 0xdb6   :  { %1671 = vmatpush.msrb.mxu0 %v2779_v37 }
 0xdf8   :  { %v1376_v46 = vpop.permute.xlu2 %1375 }
 0xdf9   :  { %1913 = vmatmul.msk.f32.vlgmr.msrb.gmra.mxu2 %vm84_vm7, %v1376_v46 }
 0xdfa   :  { %1692 = vmatpush.msrb.mxu2 %v2786_v51 }
 0xdfc   :  { %1693 = vmatpush.msrb.mxu2 %v2792_v60 }
 0xdfe   :  { %1694 = vmatpush.msrb.mxu2 %v2798_v0 }
 0xe00   :  { %1695 = vmatpush.msrb.mxu2 %v2804_v1 }
 0xe13   :  { %v1128_v38 = vpop.f32.mrf.mxu3 }
 0xe14   :  { %v1129_v30 = vadd.f32 %v2977_v44, %v1128_v38 }
 0xe16   :  { %2037 = vtanh.f32 %v1129_v30  ;;  %v1905_v37 = vmul.f32 -1.442695, %v1129_v30 }
 0xe18   :  { %2039 = vpow2.f32 %v1905_v37 }
 0xe1c   :  { %v2038_v63 = vpop.eup %2037 }
 0xe1d   :  { %1153 = vrot.lane.b32.xlu1 %v2038_v63, %s2131_s15 }
 0xe1e   :  { %v2040_v51 = vpop.eup %2039 }
 0xe1f   :  { %v1135_v60 = vadd.f32 1.0, %v2040_v51 }
 0xe21   :  { %2041 = vrcp.f32 %v1135_v60  ;;  %v1147_v59 = vand.u32 2147483648, %v1135_v60  ;;  %vm1141_vm4 = vweird.f32 %v1135_v60  ;;  %v1145_v2 = vand.u32 2147483647, %v1135_v60 }
 0xe23   :  { %v1148_v19 = vor.u32 1.1754944e-38, %v1147_v59  ;;  %vm1146_vm6 = vcmp.eq.f32.partialorder %v1145_v2, 8.507059e+37 }
 0xe27   :  { %v2042_v0 = vpop.eup %2041 }
 0xe28   :  { %v1275_v61 = vpop.f32.mrf.mxu0  ;;  %v1137_v1 = vmul.f32 %v2042_v0, %v1135_v60  ;;  %vm1142_vm3 = vweird.f32 %v2042_v0 }
 0xe29   :  { %v1276_v62 = vadd.f32 %v2812_v6, %v1275_v61  ;;  %vm1143_vm5 = vmor %vm1141_vm4, %vm1142_vm3 }
 0xe2a   :  { %v1138_v25 = vsub.f32 1.0, %v1137_v1 }
 0xe2b   :  { %v1278_v7 = vsel %vm206_vm10, %v1276_v62, -inf }
 0xe2c   :  { %1279 = vmax.xlane.f32.xlu0 %v1278_v7  ;;  %v1139_v28 = vmul.f32 %v2042_v0, %v1138_v25 }
 0xe2e   :  { %v1140_v29 = vadd.f32 %v2042_v0, %v1139_v28 }
 0xe30   :  { %v1144_v32 = vsel %vm1143_vm5, %v2042_v0, %v1140_v29 }
 0xe31   :  { %v1149_v10 = vsel %vm1146_vm6, %v1148_v19, %v1144_v32 }
 0xe32   :  { %v1151_v46 = vmul.f32 %v1149_v10, %v2822_v43 }
 0xe7c   :  { %v1396_v18 = vpop.f32.mrf.mxu2 }
 0xe7d   :  { %v1399_v17 = vadd.f32 %v1396_v18, %v1373_v20 }
 0xe7f   :  { %2043 = vtanh.f32 %v1399_v17  ;;  %v1914_v45 = vmul.f32 -1.442695, %v1399_v17 }
 0xe85   :  { %v2044_v12 = vpop.eup %2043 }
 0xe8f   :  { %v1154_v11 = vpop.permute.xlu1 %1153 }
 0xe90   :  { %v1156_v14 = vmul.f32 %v1154_v11, %v1149_v10 }
 0xe92   :  { %1158 = vrot.lane.b32.xlu1 %v1156_v14, %s2132_s16 }
 0xe9a   :  { %1422 = vrot.lane.b32.xlu1 %v2044_v12, %s2126_s19 }
 0xe9f   :  { %v1280_v58 = vpop.xlane.xlu0 %1279 }
 0xea0   :  { %v1281_v24 = vsub.f32 %v1276_v62, %v1280_v58 }
 0xea2   :  { %v1282_v27 = vmul.f32 1.442695, %v1281_v24 }
 0xea4   :  { %2045 = vpow2.f32 %v1282_v27 }
 0xea5   :  { %2047 = vpow2.f32 %v1914_v45 }
 0xeaa   :  { %v2046_v5 = vpop.eup %2045 }
 0xeab   :  { %v1284_v57 = vsel %vm206_vm10, %v2046_v5, 0.0  ;;  %v2048_v48 = vpop.eup %2047 }
 0xeac   :  { %1285 = vadd.xlane.f32.xlu2 %v1284_v57  ;;  %v1403_v49 = vadd.f32 1.0, %v2048_v48 }
 0xeae   :  { %2049 = vrcp.f32 %v1403_v49  ;;  %v1415_v61 = vand.u32 2147483648, %v1403_v49  ;;  %vm1409_vm12 = vweird.f32 %v1403_v49  ;;  %v1413_v62 = vand.u32 2147483647, %v1403_v49 }
 0xeb0   :  { %v1416_v37 = vor.u32 1.1754944e-38, %v1415_v61  ;;  %vm1414_vm14 = vcmp.eq.f32.partialorder %v1413_v62, 8.507059e+37 }
 0xeb4   :  { %v2050_v50 = vpop.eup %2049 }
 0xeb5   :  { %v1405_v42 = vmul.f32 %v2050_v50, %v1403_v49  ;;  %vm1410_vm11 = vweird.f32 %v2050_v50 }
 0xeb6   :  { %vm1411_vm13 = vmor %vm1409_vm12, %vm1410_vm11 }
 0xeb7   :  { %v1406_v52 = vsub.f32 1.0, %v1405_v42 }
 0xeb9   :  { %v1407_v54 = vmul.f32 %v2050_v50, %v1406_v52 }
 0xebb   :  { %v1408_v63 = vadd.f32 %v2050_v50, %v1407_v54 }
 0xebd   :  { %v1412_v7 = vsel %vm1411_vm13, %v2050_v50, %v1408_v63  ;;  %v1584_v63 = vld [vmem:[#allocation2 + $0xe] sm:$0x3] }
 0xebe   :  { %v1417_v60 = vsel %vm1414_vm14, %v1416_v37, %v1412_v7 }
 0xebf   :  { %v1420_v2 = vmul.f32 %v1417_v60, %v2889_v35 }
 0xf04   :  { %v1159_v38 = vpop.permute.xlu1 %1158 }
 0xf05   :  { %v2987_v30 = vadd.f32 %v1159_v38, %v1151_v46 }
 0xf07   :  { %1291 = vrot.lane.b32.xlu1 %v2987_v30, %s2133_s17 }
 0xf0c   :  { %v1423_v51 = vpop.permute.xlu1 %1422 }
 0xf0d   :  { %v1425_v0 = vmul.f32 %v1423_v51, %v1417_v60 }
 0xf0f   :  { %1427 = vrot.lane.b32.xlu1 %v1425_v0, %s2127_s28 }
 0xf17   :  { %1438 = vrot.lane.b32.xlu1 %v2889_v35, %s2130_s9 }
 0xf1f   :  { %v1286_v43 = vpop.xlane.xlu2 %1285 }
 0xf20   :  { %2051 = vrcp.f32 %v1286_v43 }
 0xf26   :  { %v2052_v1 = vpop.eup %2051 }
 0xf27   :  { %v1288_v25 = vmul.f32 %v2052_v1, %v2046_v5 }
 0xf29   :  { %v1289_v28 = vmul.f32 %v1288_v25, %v2900_v47 }
 0xf79   :  { %v1292_v29 = vpop.permute.xlu1 %1291 }
 0xf7a   :  { %v1294_v59 = vsel %vm153_vm8, %v1289_v28, %v1292_v29 }
 0xf7b   :  { %1910 = vmatmul.msk.f32.vlgmr.msrb.gmra.mxu1 %vm227_vm15, %v1294_v59 }
 0xf7c   :  { %1537 = vmatpush.msrb.mxu1 %v2836_v34 }
 0xf7e   :  { %1538 = vmatpush.msrb.mxu1 %v2842_v13 }
 0xf80   :  { %1539 = vmatpush.msrb.mxu1 %v2848_v40 }
 0xf81   :  { %v1428_v18 = vpop.permute.xlu1 %1427 }
 0xf82   :  { %v3001_v32 = vadd.f32 %v1428_v18, %v1420_v2  ;;  %1540 = vmatpush.msrb.mxu1 %v2854_v15 }
 0xf84   :  { %2053 = vtanh.f32 %v3001_v32  ;;  %1541 = vmatpush.msrb.mxu1 %v2860_v16 }
 0xf86   :  { %1542 = vmatpush.msrb.mxu1 %v2866_v36 }
 0xf88   :  { %1543 = vmatpush.msrb.mxu1 %v2872_v21 }
 0xf89   :  { %v1439_v47 = vpop.permute.xlu1 %1438 }
 0xf8a   :  { %v2054_v19 = vpop.eup %2053  ;;  %v3010_v35 = vsel %vm84_vm7, %v1439_v47, %v3001_v32  ;;  %1544 = vmatpush.msrb.mxu1 %v2878_v22 }
 0xf8b   :  { %1915 = vmatmul.msk.f32.vlgmr.msrb.gmra.mxu3 %vm153_vm8, %v3010_v35  ;;  %1433 = vrot.lane.b32.xlu0 %v2054_v19, %s2128_s11 }
 0xf8c   :  { %1545 = vmatpush.msrb.mxu1 %v2886_v56  ;;  %1729 = vmatpush.msrb.mxu3 %v2719_v39 }
 0xf8e   :  { %1546 = vmatpush.msrb.mxu1 %v2894_v31  ;;  %1730 = vmatpush.msrb.mxu3 %v2725_v41 }
 0xf90   :  { %1547 = vmatpush.msrb.mxu1 %v2907_v3  ;;  %1731 = vmatpush.msrb.mxu3 %v2921_v33 }
 0xf92   :  { %1548 = vmatpush.msrb.mxu1 %v2914_v4  ;;  %1732 = vmatpush.msrb.mxu3 %v2928_v23 }
 0xf94   :  { %1733 = vmatpush.msrb.mxu3 %v2934_v8 }
 0xf96   :  { %1734 = vmatpush.msrb.mxu3 %v2940_v9 }
 0xf98   :  { %1735 = vmatpush.msrb.mxu3 %v2946_v55 }
 0xff8   :  { %v1315_v20 = vpop.f32.mrf.mxu1 }
 0xff9   :  { %v1316_v39 = vadd.f32 %v2952_v53, %v1315_v20 }
 0xffb   :  { %v1318_v17 = vmax.f32 %v1316_v39, 0.0 }
 0xffd   :  { %v1434_v10 = vpop.permute.xlu0 %1433  ;;  %1911 = vmatmul.msk.f32.vlgmr.msra.gmra.mxu0 %vm69_vm2, %v1318_v17 }
 0xffe   :  { %v1436_v41 = vmul.f32 %v1434_v10, %v1417_v60 }
0x1000   :  { %1586 = vrot.lane.b32.xlu1 %v1436_v41, %s2129_s21 }
0x100e   :  { %v1462_v33 = vpop.f32.mrf.mxu3 }
0x100f   :  { %v1463_v11 = vadd.f32 %v2742_v26, %v1462_v33 }
0x1011   :  { %v1465_v23 = vmax.f32 %v1463_v11, 0.0 }
0x1013   :  { %1916 = vmatmul.msk.f32.vlgmr.msra.gmra.mxu1 %vm182_vm9, %v1465_v23 }
0x1072   :  { %v1587_v8 = vpop.permute.xlu1 %1586 }
0x1073   :  { %1920 = vmatmul.msk.f32.vlgmr.msra.gmra.mxu3 %vm84_vm7, %v1587_v8 }
0x107a   :  { %v1339_v9 = vpop.f32.mrf.mxu0 }
0x107b   :  { %v1340_v55 = vadd.f32 %v2977_v44, %v1339_v9 }
0x107d   :  { %2055 = vtanh.f32 %v1340_v55  ;;  %v1912_v27 = vmul.f32 -1.442695, %v1340_v55 }
0x107f   :  { %2057 = vpow2.f32 %v1912_v27 }
0x1083   :  { %v2056_v14 = vpop.eup %2055 }
0x1084   :  { %1364 = vrot.lane.b32.xlu1 %v2056_v14, %s2131_s15 }
0x1085   :  { %v2058_v5 = vpop.eup %2057 }
0x1086   :  { %v1346_v57 = vadd.f32 1.0, %v2058_v5 }
0x1088   :  { %2059 = vrcp.f32 %v1346_v57  ;;  %v1358_v52 = vand.u32 2147483648, %v1346_v57  ;;  %vm1352_vm1 = vweird.f32 %v1346_v57  ;;  %v1356_v54 = vand.u32 2147483647, %v1346_v57 }
0x108a   :  { %v1359_v38 = vor.u32 1.1754944e-38, %v1358_v52  ;;  %vm1357_vm4 = vcmp.eq.f32.partialorder %v1356_v54, 8.507059e+37 }
0x108e   :  { %v2060_v45 = vpop.eup %2059 }
0x108f   :  { %v1348_v48 = vmul.f32 %v2060_v45, %v1346_v57  ;;  %vm1353_vm0 = vweird.f32 %v2060_v45 }
0x1090   :  { %v1486_v12 = vpop.f32.mrf.mxu1  ;;  %vm1354_vm3 = vmor %vm1352_vm1, %vm1353_vm0 }
0x1091   :  { %v1487_v58 = vadd.f32 %v2812_v6, %v1486_v12  ;;  %v1349_v49 = vsub.f32 1.0, %v1348_v48 }
0x1093   :  { %v1489_v24 = vsel %vm206_vm10, %v1487_v58, -inf  ;;  %v1350_v50 = vmul.f32 %v2060_v45, %v1349_v49 }
0x1094   :  { %1490 = vmax.xlane.f32.xlu2 %v1489_v24 }
0x1095   :  { %v1351_v42 = vadd.f32 %v2060_v45, %v1350_v50 }
0x1097   :  { %v1355_v46 = vsel %vm1354_vm3, %v2060_v45, %v1351_v42 }
0x1098   :  { %v1360_v62 = vsel %vm1357_vm4, %v1359_v38, %v1355_v46 }
0x1099   :  { %v1362_v39 = vmul.f32 %v1360_v62, %v2987_v30 }
0x10f6   :  { %v1607_v61 = vpop.f32.mrf.mxu3  ;;  %v1365_v7 = vpop.permute.xlu1 %1364 }
0x10f7   :  { %v1610_v37 = vadd.f32 %v1607_v61, %v1584_v63  ;;  %v1367_v51 = vmul.f32 %v1365_v7, %v1360_v62 }
0x10f9   :  { %2061 = vtanh.f32 %v1610_v37  ;;  %1369 = vrot.lane.b32.xlu1 %v1367_v51, %s2132_s16  ;;  %v1921_v29 = vmul.f32 -1.442695, %v1610_v37 }
0x10ff   :  { %v2062_v60 = vpop.eup %2061 }
0x1100   :  { %1633 = vrot.lane.b32.xlu0 %v2062_v60, %s2126_s19 }
0x1107   :  { %v1491_v0 = vpop.xlane.xlu2 %1490 }
0x1108   :  { %v1492_v43 = vsub.f32 %v1487_v58, %v1491_v0 }
0x110a   :  { %v1493_v1 = vmul.f32 1.442695, %v1492_v43 }
0x110c   :  { %2063 = vpow2.f32 %v1493_v1 }
0x110d   :  { %2065 = vpow2.f32 %v1921_v29 }
0x1112   :  { %v2064_v25 = vpop.eup %2063 }
0x1113   :  { %v1495_v28 = vsel %vm206_vm10, %v2064_v25, 0.0  ;;  %v2066_v59 = vpop.eup %2065 }
0x1114   :  { %1496 = vadd.xlane.f32.xlu2 %v1495_v28  ;;  %v1614_v2 = vadd.f32 1.0, %v2066_v59 }
0x1116   :  { %2067 = vrcp.f32 %v1614_v2  ;;  %v1626_v33 = vand.u32 2147483648, %v1614_v2  ;;  %vm1620_vm6 = vweird.f32 %v1614_v2  ;;  %v1624_v11 = vand.u32 2147483647, %v1614_v2 }
0x1118   :  { %v1627_v8 = vor.u32 1.1754944e-38, %v1626_v33  ;;  %vm1625_vm12 = vcmp.eq.f32.partialorder %v1624_v11, 8.507059e+37 }
0x111c   :  { %v2068_v18 = vpop.eup %2067 }
0x111d   :  { %v1616_v47 = vmul.f32 %v2068_v18, %v1614_v2  ;;  %vm1621_vm5 = vweird.f32 %v2068_v18 }
0x111e   :  { %vm1622_vm11 = vmor %vm1620_vm6, %vm1621_vm5 }
0x111f   :  { %v1617_v19 = vsub.f32 1.0, %v1616_v47 }
0x1121   :  { %v1618_v20 = vmul.f32 %v2068_v18, %v1617_v19 }
0x1123   :  { %v1619_v10 = vadd.f32 %v2068_v18, %v1618_v20 }
0x1125   :  { %v1623_v23 = vsel %vm1622_vm11, %v2068_v18, %v1619_v10 }
0x1126   :  { %v3047_v55 = vsel %vm1625_vm12, %v1627_v8, %v1623_v23 }
0x1127   :  { %v1631_v57 = vmul.f32 %v3047_v55, %v3001_v32 }
0x112c   :  { %1649 = vrot.lane.b32.xlu2 %v3001_v32, %s2130_s9 }
0x116b   :  { %v1370_v17 = vpop.permute.xlu1 %1369 }
0x116c   :  { %v3043_v41 = vadd.f32 %v1370_v17, %v1362_v39 }
0x116e   :  { %1502 = vrot.lane.b32.xlu1 %v3043_v41, %s2133_s17 }
0x1172   :  { %v1634_v9 = vpop.permute.xlu0 %1633 }
0x1173   :  { %v1636_v30 = vmul.f32 %v1634_v9, %v3047_v55 }
0x1175   :  { %1638 = vrot.lane.b32.xlu0 %v1636_v30, %s2127_s28 }
0x1187   :  { %v1497_v14 = vpop.xlane.xlu2 %1496 }
0x1188   :  { %2069 = vrcp.f32 %v1497_v14 }
0x118e   :  { %v2070_v12 = vpop.eup %2069 }
0x118f   :  { %v1499_v58 = vmul.f32 %v2070_v12, %v2064_v25  ;;  %v1650_v49 = vpop.permute.xlu2 %1649 }
0x1191   :  { %v1500_v24 = vmul.f32 %v1499_v58, %v3010_v35 }
0x11e0   :  { %v1503_v27 = vpop.permute.xlu1 %1502 }
0x11e1   :  { %v1505_v5 = vsel %vm153_vm8, %v1500_v24, %v1503_v27 }
0x11e2   :  { %1917 = vmatmul.msk.f32.vlgmr.msra.gmra.mxu2 %vm227_vm15, %v1505_v5 }
0x11e3   :  { %1748 = vmatpush.msra.mxu2 %v2836_v34 }
0x11e5   :  { %1749 = vmatpush.msra.mxu2 %v2842_v13 }
0x11e7   :  { %v1639_v45 = vpop.permute.xlu0 %1638  ;;  %1750 = vmatpush.msra.mxu2 %v2848_v40 }
0x11e8   :  { %v3059_v48 = vadd.f32 %v1639_v45, %v1631_v57 }
0x11e9   :  { %1751 = vmatpush.msra.mxu2 %v2854_v15 }
0x11ea   :  { %v3064_v35 = vsel %vm84_vm7, %v1650_v49, %v3059_v48 }
0x11eb   :  { %1922 = vmatmul.msk.f32.vlgmr.msrb.gmra.mxu0 %vm153_vm8, %v3064_v35  ;;  %1752 = vmatpush.msra.mxu2 %v2860_v16 }
0x11ed   :  { %1753 = vmatpush.msra.mxu2 %v2866_v36 }
0x11ef   :  { %1754 = vmatpush.msra.mxu2 %v2872_v21 }
0x11f1   :  { %1755 = vmatpush.msra.mxu2 %v2878_v22 }
0x11f3   :  { %1756 = vmatpush.msra.mxu2 %v2886_v56 }
0x11f5   :  { %1757 = vmatpush.msra.mxu2 %v2894_v31 }
0x11f7   :  { %1758 = vmatpush.msra.mxu2 %v2907_v3 }
0x11f9   :  { %1759 = vmatpush.msra.mxu2 %v2914_v4 }
0x1265   :  { %v1526_v34 = vpop.f32.mrf.mxu2 }
0x1266   :  { %v1527_v13 = vadd.f32 %v2952_v53, %v1526_v34 }
0x1268   :  { %v1529_v40 = vmax.f32 %v1527_v13, 0.0  ;;  %v1673_v15 = vpop.f32.mrf.mxu0 }
0x1269   :  { %v1674_v16 = vadd.f32 %v2742_v26, %v1673_v15  ;;  %v1806_v15 = vld [vmem:[%s3143_s6 + $0x10] sm:$0xff] }
0x126a   :  { %1918 = vmatmul.msk.f32.vlgmr.msrb.gmra.mxu1 %vm69_vm2, %v1529_v40  ;;  %v1807_v40 = vld [vmem:[%s3143_s6 + $0x18] sm:$0xff] }
0x126b   :  { %v1676_v36 = vmax.f32 %v1674_v16, 0.0  ;;  %1825 = vmatpush.msra.mxu0 %v1807_v40  ;;  %v1805_v16 = vld [vmem:[%s3143_s6 + $0x8] sm:$0xff] }
0x126d   :  { %1923 = vmatmul.msk.f32.vlgmr.msrb.gmra.mxu2 %vm182_vm9, %v1676_v36  ;;  %1826 = vmatpush.msra.mxu0 %v1806_v15 }
0x126f   :  { %1827 = vmatpush.msra.mxu0 %v1805_v16 }
0x12e7   :  { %v1550_v21 = vpop.f32.mrf.mxu1 }
0x12e8   :  { %v1551_v22 = vadd.f32 %v2977_v44, %v1550_v21 }
0x12ea   :  { %2071 = vtanh.f32 %v1551_v22  ;;  %v1919_v32 = vmul.f32 -1.442695, %v1551_v22 }
0x12ec   :  { %2073 = vpow2.f32 %v1919_v32 }
0x12f0   :  { %v2072_v56 = vpop.eup %2071  ;;  %v1697_v31 = vpop.f32.mrf.mxu2 }
0x12f1   :  { %v1698_v3 = vadd.f32 %v2812_v6, %v1697_v31  ;;  %1575 = vrot.lane.b32.xlu1 %v2072_v56, %s2131_s15  ;;  %v1837_v56 = vld [vmem:[%s3144_s7 + $0x18] sm:$0xff]  ;;  %v1836_v31 = vld [vmem:[%s3144_s7 + $0x10] sm:$0xff] }
0x12f2   :  { %v2074_v26 = vpop.eup %2073  ;;  %1855 = vmatpush.msra.mxu1 %v1837_v56 }
0x12f3   :  { %v1700_v4 = vsel %vm206_vm10, %v1698_v3, -inf  ;;  %v1557_v50 = vadd.f32 1.0, %v2074_v26  ;;  %v1835_v26 = vld [vmem:[%s3144_s7 + $0x8] sm:$0xff] }
0x12f4   :  { %1701 = vmax.xlane.f32.xlu0 %v1700_v4  ;;  %1856 = vmatpush.msra.mxu1 %v1836_v31 }
0x12f5   :  { %2075 = vrcp.f32 %v1557_v50  ;;  %v1569_v63 = vand.u32 2147483648, %v1557_v50  ;;  %vm1563_vm14 = vweird.f32 %v1557_v50  ;;  %v1567_v61 = vand.u32 2147483647, %v1557_v50 }
0x12f6   :  { %1857 = vmatpush.msra.mxu1 %v1835_v26 }
0x12f7   :  { %v1570_v62 = vor.u32 1.1754944e-38, %v1569_v63  ;;  %vm1568_vm1 = vcmp.eq.f32.partialorder %v1567_v61, 8.507059e+37 }
0x12fb   :  { %v2076_v42 = vpop.eup %2075 }
0x12fc   :  { %v1559_v52 = vmul.f32 %v2076_v42, %v1557_v50  ;;  %vm1564_vm13 = vweird.f32 %v2076_v42  ;;  %v1834_v50 = vld [vmem:[%s3144_s7] sm:$0xff] }
0x12fd   :  { %vm1565_vm0 = vmor %vm1563_vm14, %vm1564_vm13  ;;  %1858 = vmatpush.msra.mxu1 %v1834_v50 }
0x12fe   :  { %v1560_v54 = vsub.f32 1.0, %v1559_v52 }
0x1300   :  { %v1561_v46 = vmul.f32 %v2076_v42, %v1560_v54 }
0x1302   :  { %v1562_v38 = vadd.f32 %v2076_v42, %v1561_v46 }
0x1304   :  { %v1566_v6 = vsel %vm1565_vm0, %v2076_v42, %v1562_v38  ;;  %v1943_v42 = vld [vmem:[%s3143_s6 + $0x20] ss:$0 sm:$0xff] }
0x1305   :  { %v1571_v7 = vsel %vm1568_vm1, %v1570_v62, %v1566_v6  ;;  %v1944_v38 = vld [vmem:[%s3144_s7 + $0x20] ss:$0 sm:$0xff] }
0x1306   :  { %v1573_v28 = vmul.f32 %v1571_v7, %v3043_v41 }
0x1363   :  { %v1576_v37 = vpop.permute.xlu1 %1575 }
0x1364   :  { %v1578_v51 = vmul.f32 %v1576_v37, %v1571_v7 }
0x1366   :  { %1580 = vrot.lane.b32.xlu1 %v1578_v51, %s2132_s16 }
0x1367   :  { %v1702_v60 = vpop.xlane.xlu0 %1701 }
0x1368   :  { %v1703_v0 = vsub.f32 %v1698_v3, %v1702_v60 }
0x136a   :  { %v1704_v43 = vmul.f32 1.442695, %v1703_v0 }
0x136c   :  { %2077 = vpow2.f32 %v1704_v43 }
0x1372   :  { %v2078_v1 = vpop.eup %2077 }
0x1373   :  { %v1706_v25 = vsel %vm206_vm10, %v2078_v1, 0.0 }
0x1390   :  { %1707 = vadd.xlane.f32.xlu1 %v1706_v25 }
0x13d8   :  { %v1581_v29 = vpop.permute.xlu1 %1580 }
0x13d9   :  { %v1583_v59 = vadd.f32 %v1581_v29, %v1573_v28 }
0x13db   :  { %1713 = vrot.lane.b32.xlu2 %v1583_v59, %s2133_s17 }
0x1403   :  { %v1708_v2 = vpop.xlane.xlu1 %1707 }
0x1404   :  { %2079 = vrcp.f32 %v1708_v2 }
0x140a   :  { %v2080_v18 = vpop.eup %2079 }
0x140b   :  { %v1710_v47 = vmul.f32 %v2080_v18, %v2078_v1 }
0x140d   :  { %v1711_v19 = vmul.f32 %v1710_v47, %v3064_v35 }
0x1435   :  { %v1714_v20 = vpop.permute.xlu2 %1713 }
0x1436   :  { %v1716_v39 = vsel %vm153_vm8, %v1711_v19, %v1714_v20 }
0x1437   :  { %1924 = vmatmul.msk.f32.vlgmr.msrb.gmra.mxu3 %vm227_vm15, %v1716_v39 }
0x14ba   :  { %v1737_v17 = vpop.f32.mrf.mxu3 }
0x14bb   :  { %v1738_v10 = vadd.f32 %v2952_v53, %v1737_v17 }
0x14bd   :  { %v1740_v33 = vmax.f32 %v1738_v10, 0.0 }
0x14bf   :  { %1925 = vmatmul.msk.f32.vlgmr.msra.gmra.mxu2 %vm69_vm2, %v1740_v33 }
0x1542   :  { %v1761_v41 = vpop.f32.mrf.mxu2 }
0x1543   :  { %v1762_v11 = vadd.f32 %v2977_v44, %v1761_v41 }
0x1545   :  { %2081 = vtanh.f32 %v1762_v11  ;;  %v1926_v9 = vmul.f32 -1.442695, %v1762_v11 }
0x1546   :  { %2083 = vtanh.f32 %v3059_v48 }
0x1547   :  { %2085 = vpow2.f32 %v1926_v9 }
0x154b   :  { %v2082_v23 = vpop.eup %2081 }
0x154c   :  { %1786 = vrot.lane.b32.xlu2 %v2082_v23, %s2131_s15  ;;  %v2084_v8 = vpop.eup %2083 }
0x154d   :  { %v2086_v30 = vpop.eup %2085 }
0x154e   :  { %v1768_v14 = vadd.f32 1.0, %v2086_v30 }
0x1550   :  { %2087 = vrcp.f32 %v1768_v14  ;;  %v1780_v44 = vand.u32 2147483648, %v1768_v14  ;;  %vm1774_vm8 = vweird.f32 %v1768_v14  ;;  %v1778_v5 = vand.u32 2147483647, %v1768_v14 }
0x1552   :  { %v1781_v45 = vor.u32 1.1754944e-38, %v1780_v44  ;;  %vm1779_vm15 = vcmp.eq.f32.partialorder %v1778_v5, 8.507059e+37 }
0x1554   :  { %1644 = vrot.lane.b32.xlu2 %v2084_v8, %s2128_s11 }
0x1556   :  { %v2088_v53 = vpop.eup %2087 }
0x1557   :  { %v1770_v12 = vmul.f32 %v2088_v53, %v1768_v14  ;;  %vm1775_vm2 = vweird.f32 %v2088_v53 }
0x1558   :  { %vm1776_vm10 = vmor %vm1774_vm8, %vm1775_vm2 }
0x1559   :  { %v1771_v58 = vsub.f32 1.0, %v1770_v12 }
0x155b   :  { %v1772_v24 = vmul.f32 %v2088_v53, %v1771_v58 }
0x155d   :  { %v1773_v27 = vadd.f32 %v2088_v53, %v1772_v24 }
0x155f   :  { %v1777_v57 = vsel %vm1776_vm10, %v2088_v53, %v1773_v27 }
0x1560   :  { %v1782_v48 = vsel %vm1779_vm15, %v1781_v45, %v1777_v57 }
0x1561   :  { %v1784_v36 = vmul.f32 %v1782_v48, %v1583_v59 }
0x15a6   :  { %v1787_v49 = vpop.permute.xlu2 %1786 }
0x15a7   :  { %v1789_v35 = vmul.f32 %v1787_v49, %v1782_v48 }
0x15a9   :  { %1791 = vrot.lane.b32.xlu0 %v1789_v35, %s2132_s16 }
0x15ae   :  { %v1645_v34 = vpop.permute.xlu2 %1644 }
0x15af   :  { %v1647_v13 = vmul.f32 %v1645_v34, %v3047_v55  ;;  %v1804_v55 = vld [vmem:[%s3143_s6] sm:$0xff] }
0x15b0   :  { %1828 = vmatpush.msra.mxu0 %v1804_v55 }
0x15b1   :  { %1796 = vrot.lane.b32.xlu2 %v1647_v13, %s2129_s21 }
0x160b   :  { %v1797_v3 = vpop.permute.xlu2 %1796 }
0x161b   :  { %v1792_v21 = vpop.permute.xlu0 %1791 }
0x161c   :  { %v1794_v22 = vadd.f32 %v1792_v21, %v1784_v36 }
0x161e   :  { %1800 = vrot.lane.b32.xlu2 %v1794_v22, %s2131_s15 }
0x1678   :  { %v1801_v4 = vpop.permute.xlu2 %1800 }
0x1679   :  { %v1803_v32 = vsel %vm84_vm7, %v1797_v3, %v1801_v4  ;;  %vm1863_vm7 = vcmask 1024  }
0x167a   :  { %1927 = vmatmul.msk.f32.vlgmr.msra.gmra.mxu0 %vm182_vm9, %v1803_v32 }
0x16f7   :  { %v1830_v52 = vpop.f32.mrf.mxu0 }
0x16f8   :  { %v1831_v54 = vadd.f32 %v1943_v42, %v1830_v52 }
0x16fa   :  { %v1833_v46 = vmax.f32 %v1831_v54, 0.0 }
0x16fc   :  { %1928 = vmatmul.msk.f32.vlgmr.msra.gmra.mxu1 %vm182_vm9, %v1833_v46 }
0x1779   :  { %v1860_v63 = vpop.f32.mrf.mxu1 }
0x177a   :  { %v1861_v61 = vadd.f32 %v1944_v38, %v1860_v63 }
0x177c   :  { %1864 = vst.msk [vmem:[%s3145_s8] sm:$0x3] %vm1863_vm7, %v1861_v61 }

</bundles_post_ra>
